<compile_context>
chip_gen: v6e
topology: v6e:2x2x1
jax: 0.10.0
libtpu: 0.0.40
codegen_flags: <defaults>
</compile_context>

<pallas_src>
import math

import numpy as np
import jax
import jax.numpy as jnp
from jax.experimental import pallas as pl
from jax.experimental.pallas import tpu as pltpu


# ----------------------------------------------------------------------------
# Host-side: antialiased bicubic resize weight matrix (PyTorch/PIL style,
# a = -0.5, align_corners=False, normalized taps -> matches antialias=True).
# TODO(synk): boundary-tap truncation may differ from torch.nn.functional.
#             interpolate at the <1e-2 level near edges; validate tap-by-tap
#             against torch offline.
# ----------------------------------------------------------------------------
def _bicubic_aa_matrix(in_size: int, out_size: int) -> np.ndarray:
    a = -0.5

    def cubic(x):
        x = abs(x)
        if x < 1.0:
            return ((a + 2.0) * x - (a + 3.0)) * x * x + 1.0
        if x < 2.0:
            return (((x - 5.0) * x + 8.0) * x - 4.0) * a
        return 0.0

    scale = in_size / out_size
    support = 2.0 * scale if scale >= 1.0 else 2.0
    invscale = 1.0 / scale if scale >= 1.0 else 1.0

    w = np.zeros((out_size, in_size), dtype=np.float64)
    for i in range(out_size):
        center = scale * (i + 0.5)
        xmin = max(int(center - support + 0.5), 0)
        xmax = min(int(center + support + 0.5), in_size)
        taps = [cubic((j - center + 0.5) * invscale) for j in range(xmin, xmax)]
        total = sum(taps)
        for k, j in enumerate(range(xmin, xmax)):
            w[i, j] = taps[k] / total
    return w.astype(np.float32)


# ----------------------------------------------------------------------------
# Generation-aware planning.
# ----------------------------------------------------------------------------
def _device_plan():
    """Returns (vmem_budget_bytes, vmem_limit_bytes, dual_tensorcore)."""
    try:
        kind = jax.devices()[0].device_kind.lower()
    except Exception:
        kind = ""
    mib = 1024 * 1024
    if "v7" in kind:                       # 64 MiB VMEM, 2 TensorCores
        return 20 * mib, 32 * mib, True
    if "v4" in kind or "v5p" in kind:      # megacore, 128 MiB VMEM
        return 40 * mib, 64 * mib, True
    if "v5" in kind or "v6" in kind:       # v5e / v6e: 1 TC, 128 MiB VMEM
        return 40 * mib, 64 * mib, False
    return 20 * mib, 32 * mib, False       # unknown backend: conservative


def _plan_tiles(bc: int, S: int, mid: int, O: int,
                vmem_budget_bytes: int, dual_tc: bool):
    """Pick batch-tile T (images per grid step) and grid size G (bc padded to T*G).

    T is a multiple of `step` so that T*O and T*S are multiples of 128:
    lane-dense input/output blocks, unmasked stores, and legal (8,128) blocks
    even when G > 1.
    """
    step = math.lcm(128 // math.gcd(128, O), 128 // math.gcd(128, S))

    def est(t):  # f32 VMEM footprint of one grid step (double-buffered I/O + weights)
        f32 = 4
        x_blk = 2 * S * (t * S) * f32
        out_blk = 2 * O * (t * O) * f32
        wts = 2 * f32 * (mid * S + O * mid
                         + (t * S) * (t * mid)      # blockdiag(U^T)
                         + (t * mid) * (t * O))     # blockdiag(D^T)
        live = f32 * t * (S * mid + 2 * mid * mid + O * mid + O * O)
        return x_blk + out_blk + wts + live

    t_cap = max(step, ((bc + step - 1) // step) * step)   # no bigger than padded bc
    t = step
    while t + step <= t_cap and est(t + step) <= vmem_budget_bytes:
        t += step
    G = (bc + t - 1) // t

    # On dual-TensorCore chips prefer >= 2 grid steps when it doesn't shrink
    # the tile below the lane-dense minimum.
    if dual_tc and G == 1 and t >= 2 * step:
        t_half = (t // 2 // step) * step
        if t_half >= step:
            t = t_half
            G = (bc + t - 1) // t
    return t, G


# ----------------------------------------------------------------------------
# Pallas kernel.
#
# Layout (T images per grid step, every block lane-dense, no in-kernel
# transposes; all per-image blocks sit side-by-side along the lane axis):
#   x    : (S,  T*S)    lane-block t = X_t^T
#   b    = x @ blockdiag(U^T)          -> (S,  T*2S)   block t = X_t^T U^T
#   up   = U @ b                       -> (2S, T*2S)   block t = (U X_t U^T)^T
#   act  = LeakyReLU(up)                                (elementwise, f32)
#   g    = D @ act                     -> (O,  T*2S)   block t = D up_t^T
#   out  = g @ blockdiag(D^T)          -> (O,  T*O)    block t = (D up_t D^T)^T
# The remaining per-image transpose is undone with a cheap XLA reshape/transpose
# in the wrapper.
# ----------------------------------------------------------------------------
def _cno_lrelu_kernel(x_ref, u_ref, ubd_ref, d_ref, dbd_ref, o_ref):
    hp = jax.lax.Precision.HIGHEST

    x = x_ref[...]                                                   # (S, T*S)
    b = jnp.dot(x, ubd_ref[...], precision=hp,
                preferred_element_type=jnp.float32)                  # (S, T*2S)
    up = jnp.dot(u_ref[...], b, precision=hp,
                 preferred_element_type=jnp.float32)                 # (2S, T*2S)

    act = jnp.maximum(up, 0.01 * up)                                 # LeakyReLU(0.01)

    g = jnp.dot(d_ref[...], act, precision=hp,
                preferred_element_type=jnp.float32)                  # (O, T*2S)
    out = jnp.dot(g, dbd_ref[...], precision=hp,
                  preferred_element_type=jnp.float32)                # (O, T*O)

    o_ref[...] = out.astype(o_ref.dtype)


def cno_lrelu(x: jax.Array, in_size: int, out_size: int) -> jax.Array:
    """x: (B, C, H, W) float32 -> (B, C, out_size, out_size) float32."""
    B, C, H, W = x.shape
    assert H == W, "CNO_LReLu expects square spatial inputs"
    S = H
    mid = 2 * in_size
    O = out_size
    bc = B * C

    vmem_budget, vmem_limit, dual_tc = _device_plan()
    T, G = _plan_tiles(bc, S, mid, O, vmem_budget, dual_tc)
    bc_pad = T * G

    # Host-built separable resize weights (f32 on the MXU; they are tiny).
    u_np = _bicubic_aa_matrix(S, mid)                     # (2S, S)   rows: up-H
    d_np = _bicubic_aa_matrix(mid, O)                     # (O, 2S)   rows: out-H
    eye = np.eye(T, dtype=np.float64)
    ubd_np = np.kron(eye, u_np.T.astype(np.float64)).astype(np.float32)  # (T*S,  T*2S)
    dbd_np = np.kron(eye, d_np.T.astype(np.float64)).astype(np.float32)  # (T*2S, T*O)

    u = jnp.asarray(u_np)
    d = jnp.asarray(d_np)
    ubd = jnp.asarray(ubd_np)
    dbd = jnp.asarray(dbd_np)

    # Lane-wide, pre-transposed input: x_wide[w, t*S + h] = X_t[h, w].
    x_imgs = x.reshape(bc, S, S).astype(jnp.float32)
    if bc_pad != bc:
        x_imgs = jnp.pad(x_imgs, ((0, bc_pad - bc), (0, 0), (0, 0)))
    x_wide = x_imgs.transpose(2, 0, 1).reshape(S, bc_pad * S)

    out_wide = pl.pallas_call(
        _cno_lrelu_kernel,
        out_shape=jax.ShapeDtypeStruct((O, bc_pad * O), jnp.float32),
        grid_spec=pltpu.PrefetchScalarGridSpec(
            num_scalar_prefetch=0,
            grid=(G,),
            in_specs=[
                pl.BlockSpec((S, T * S), lambda i: (0, i)),          # input tile
                pl.BlockSpec((mid, S), lambda i: (0, 0)),            # U
                pl.BlockSpec((T * S, T * mid), lambda i: (0, 0)),    # blockdiag(U^T)
                pl.BlockSpec((O, mid), lambda i: (0, 0)),            # D
                pl.BlockSpec((T * mid, T * O), lambda i: (0, 0)),    # blockdiag(D^T)
            ],
            out_specs=pl.BlockSpec((O, T * O), lambda i: (0, i)),
        ),
        compiler_params=pltpu.CompilerParams(
            dimension_semantics=("parallel",),     # batch tiles are independent
            vmem_limit_bytes=vmem_limit,
        ),
    )(x_wide, u, ubd, d, dbd)

    # out_wide[w, t*O + h] = out_t[h, w]  ->  NCHW (cheap XLA layout plumbing).
    out = (out_wide.reshape(O, bc_pad, O)    # [w, t, h]
           .transpose(1, 2, 0)               # [t, h, w]
           [:bc]
           .reshape(B, C, O, O))
    return out


# ----------------------------------------------------------------------------
# Pure-JAX reference (same weight matrices, f32) for a sanity check.
# ----------------------------------------------------------------------------
def cno_lrelu_ref(x, in_size, out_size):
    u = jnp.asarray(_bicubic_aa_matrix(x.shape[-1], 2 * in_size))
    d = jnp.asarray(_bicubic_aa_matrix(2 * in_size, out_size))
    hp = jax.lax.Precision.HIGHEST
    up = jnp.einsum('oh,bchw,pw->bcop', u, x, u, precision=hp)
    act = jnp.where(up >= 0.0, up, 0.01 * up)
    return jnp.einsum('oh,bchw,pw->bcop', d, act, d, precision=hp)


if __name__ == "__main__":
    in_size, out_size = 16, 8
    B, C = 2, 4

    key = jax.random.PRNGKey(0)
    x = jax.random.normal(key, (B, C, in_size, in_size), dtype=jnp.float32)

    out = jax.block_until_ready(cno_lrelu(x, in_size, out_size))
    ref = jax.block_until_ready(cno_lrelu_ref(x, in_size, out_size))

    np.testing.assert_allclose(np.asarray(out), np.asarray(ref), rtol=5e-3, atol=5e-3)
    assert out.shape == (B, C, out_size, out_size)
    print("KERNEL_OK")
</pallas_src>

<mosaic_0001>
module attributes {stable_mosaic.version = 11 : i64} {
  func.func @_cno_lrelu_kernel(%arg0: i32, %arg1: memref<16x256xf32, #tpu.memory_space<vmem>>, %arg2: memref<32x16xf32, #tpu.memory_space<vmem>>, %arg3: memref<256x512xf32, #tpu.memory_space<vmem>>, %arg4: memref<8x32xf32, #tpu.memory_space<vmem>>, %arg5: memref<512x128xf32, #tpu.memory_space<vmem>>, %arg6: memref<8x128xf32, #tpu.memory_space<vmem>>) attributes {dimension_semantics = [#tpu.dimension_semantics<parallel>], iteration_bounds = array<i64: 1>, scalar_prefetch = 0 : i64, scratch_operands = 0 : i64, tpu.core_type = #tpu.core_type<tc>, window_params = [{transform_indices = @transform_0, window_bounds = array<i64: 16, 256>}, {pipeline_mode = #tpu.pipeline_mode<synchronous>, transform_indices = @transform_1, window_bounds = array<i64: 32, 16>}, {pipeline_mode = #tpu.pipeline_mode<synchronous>, transform_indices = @transform_2, window_bounds = array<i64: 256, 512>}, {pipeline_mode = #tpu.pipeline_mode<synchronous>, transform_indices = @transform_3, window_bounds = array<i64: 8, 32>}, {pipeline_mode = #tpu.pipeline_mode<synchronous>, transform_indices = @transform_4, window_bounds = array<i64: 512, 128>}, {transform_indices = @transform_5, window_bounds = array<i64: 8, 128>}]} {
    %c0 = arith.constant 0 : index
    %c0_0 = arith.constant 0 : index
    %0 = vector.load %arg1[%c0, %c0_0] : memref<16x256xf32, #tpu.memory_space<vmem>>, vector<16x256xf32>
    %c0_1 = arith.constant 0 : index
    %c0_2 = arith.constant 0 : index
    %1 = vector.load %arg3[%c0_1, %c0_2] : memref<256x512xf32, #tpu.memory_space<vmem>>, vector<256x512xf32>
    %cst = arith.constant dense<0.000000e+00> : vector<16x512xf32>
    %2 = tpu.matmul %0, %1, %cst {dimension_numbers = #tpu.dot_dimension_numbers<[1], [0], [0], [1], [0, 0, 1, 1], [], []>, precision = #tpu.contract_precision<fp32>} : vector<16x256xf32>, vector<256x512xf32>, vector<16x512xf32> -> vector<16x512xf32>
    %c0_3 = arith.constant 0 : index
    %c0_4 = arith.constant 0 : index
    %3 = vector.load %arg2[%c0_3, %c0_4] : memref<32x16xf32, #tpu.memory_space<vmem>>, vector<32x16xf32>
    %cst_5 = arith.constant dense<0.000000e+00> : vector<32x512xf32>
    %4 = tpu.matmul %3, %2, %cst_5 {dimension_numbers = #tpu.dot_dimension_numbers<[1], [0], [0], [1], [0, 0, 1, 1], [], []>, precision = #tpu.contract_precision<fp32>} : vector<32x16xf32>, vector<16x512xf32>, vector<32x512xf32> -> vector<32x512xf32>
    %cst_6 = arith.constant 0.00999999977 : f32
    %5 = vector.broadcast %cst_6 : f32 to vector<32x512xf32>
    %6 = arith.mulf %5, %4 : vector<32x512xf32>
    %7 = arith.maximumf %4, %6 : vector<32x512xf32>
    %c0_7 = arith.constant 0 : index
    %c0_8 = arith.constant 0 : index
    %8 = vector.load %arg4[%c0_7, %c0_8] : memref<8x32xf32, #tpu.memory_space<vmem>>, vector<8x32xf32>
    %cst_9 = arith.constant dense<0.000000e+00> : vector<8x512xf32>
    %9 = tpu.matmul %8, %7, %cst_9 {dimension_numbers = #tpu.dot_dimension_numbers<[1], [0], [0], [1], [0, 0, 1, 1], [], []>, precision = #tpu.contract_precision<fp32>} : vector<8x32xf32>, vector<32x512xf32>, vector<8x512xf32> -> vector<8x512xf32>
    %c0_10 = arith.constant 0 : index
    %c0_11 = arith.constant 0 : index
    %10 = vector.load %arg5[%c0_10, %c0_11] : memref<512x128xf32, #tpu.memory_space<vmem>>, vector<512x128xf32>
    %cst_12 = arith.constant dense<0.000000e+00> : vector<8x128xf32>
    %11 = tpu.matmul %9, %10, %cst_12 {dimension_numbers = #tpu.dot_dimension_numbers<[1], [0], [0], [1], [0, 0, 1, 1], [], []>, precision = #tpu.contract_precision<fp32>} : vector<8x512xf32>, vector<512x128xf32>, vector<8x128xf32> -> vector<8x128xf32>
    %c0_13 = arith.constant 0 : index
    %c0_14 = arith.constant 0 : index
    %12 = vector.load %arg6[%c0_13, %c0_14] : memref<8x128xf32, #tpu.memory_space<vmem>>, vector<8x128xf32>
    tpu.vector_store %arg6[%c0_13, %c0_14], %11 {strides = array<i32>} : memref<8x128xf32, #tpu.memory_space<vmem>>, vector<8x128xf32>,
    return
  }
  func.func @transform_0(%arg0: i32) -> (i32, i32) {
    %c0_i32 = arith.constant 0 : i32
    %c0_i32_0 = arith.constant 0 : i32
    return %c0_i32, %arg0 : i32, i32
  }
  func.func @transform_1(%arg0: i32) -> (i32, i32) {
    %c0_i32 = arith.constant 0 : i32
    %c0_i32_0 = arith.constant 0 : i32
    %c0_i32_1 = arith.constant 0 : i32
    return %c0_i32, %c0_i32_0 : i32, i32
  }
  func.func @transform_2(%arg0: i32) -> (i32, i32) {
    %c0_i32 = arith.constant 0 : i32
    %c0_i32_0 = arith.constant 0 : i32
    %c0_i32_1 = arith.constant 0 : i32
    return %c0_i32, %c0_i32_0 : i32, i32
  }
  func.func @transform_3(%arg0: i32) -> (i32, i32) {
    %c0_i32 = arith.constant 0 : i32
    %c0_i32_0 = arith.constant 0 : i32
    %c0_i32_1 = arith.constant 0 : i32
    return %c0_i32, %c0_i32_0 : i32, i32
  }
  func.func @transform_4(%arg0: i32) -> (i32, i32) {
    %c0_i32 = arith.constant 0 : i32
    %c0_i32_0 = arith.constant 0 : i32
    %c0_i32_1 = arith.constant 0 : i32
    return %c0_i32, %c0_i32_0 : i32, i32
  }
  func.func @transform_5(%arg0: i32) -> (i32, i32) {
    %c0_i32 = arith.constant 0 : i32
    %c0_i32_0 = arith.constant 0 : i32
    return %c0_i32, %arg0 : i32, i32
  }
}

</mosaic_0001>

<bundles_post_ra>
// kernel: tpu_custom_call.1
= control target key start
LH: loop header
LB: loop body
LE: loop exit
PB: predicated region body
PF: predicated region fallthrough
CT: control target
= control target key end

     0   :  { %10 = vsyncpa [#allocation3], 0  ;;  %s11768_s0 = inlined_call_operand.vmem [shape: f32[16,256], index: 0, kind: input, shape index: {}]   ;;  %s11769_s1 = inlined_call_operand.vmem [shape: f32[32,16], index: 1, kind: input, shape index: {}]   ;;  %s11770_s2 = inlined_call_operand.hbm [shape: f32[256,512], index: 2, kind: input, shape index: {}]   ;;  %s11771_s3 = inlined_call_operand.vmem [shape: f32[8,32], index: 3, kind: input, shape index: {}]   ;;  %s11772_s4 = inlined_call_operand.hbm [shape: f32[512,128], index: 4, kind: input, shape index: {}]   ;;  %s11773_s5 = inlined_call_operand.hbm [shape: f32[8,128], index: 5, kind: output, shape index: {}]  }
   0x1   :  { %11 = vsyncpa [#allocation6], 0 }
   0x2   :  { %12 = vsyncpa [#allocation4], 0  ;;  %s7588_s18 = smov [#allocation2]  }
   0x3   :  { %s22_s19 = sshll.u32 %s7588_s18, 4  ;;  %s23_s19 = int_to_ptr.vmem [resolvable:$true] %s22_s19 }
   0x4   :  { %s7530_s20 = scalar_lea.vmem %s23_s19, 16384  ;;  %p7535_p1 = scmp.lt.s32.totalorder %s23_s19, %s23_s19 }
   0x5   :  { %p7531_p0 = scmp.ne.s32.totalorder %s23_s19, %s7530_s20  ;;  %p7536_p2 = scmp.lt.s32.totalorder %s7530_s20, %s7530_s20 }
   0x7   :  { %p7537_p3 = por %p7536_p2, %p7535_p1 }
   0x9   :  { %p7538_p4 = pnand %p7537_p3, %p7531_p0 }
   0xb   :  { %7541 = shalt.err (!%p7538_p4)
}
   0xc   :  { %s7589_s21 = smov 512   ;;  %s7590_s22 = smov 32  }
   0xd   :  { %28 = dma.hbm_to_vmem [thread:$0]  %s11770_s2, 16384, %s23_s19, [#allocation3], %s7589_s21, %s7589_s21, %s7590_s22  }
   0xe   :  { %s7591_s25 = smov [#allocation5]  }
   0xf   :  { %s36_s26 = sshll.u32 %s7591_s25, 4  ;;  %s37_s26 = int_to_ptr.vmem [resolvable:$true] %s36_s26 }
  0x10   :  { %s7550_s27 = scalar_lea.vmem %s37_s26, 8192  ;;  %p7555_p6 = scmp.lt.s32.totalorder %s37_s26, %s37_s26 }
  0x11   :  { %p7551_p5 = scmp.ne.s32.totalorder %s37_s26, %s7550_s27  ;;  %p7556_p7 = scmp.lt.s32.totalorder %s7550_s27, %s7550_s27 }
  0x13   :  { %p7557_p8 = por %p7556_p7, %p7555_p6 }
  0x15   :  { %p7558_p9 = pnand %p7557_p8, %p7551_p5 }
  0x17   :  { %7561 = shalt.err (!%p7558_p9)
}
  0x18   :  { %s7592_s28 = smov 128   ;;  %s7593_s29 = smov 8  }
  0x19   :  { %42 = dma.hbm_to_vmem [thread:$0]  %s11772_s4, 8192, %s37_s26, [#allocation6], %s7592_s28, %s7592_s28, %s7593_s29  }
  0x1a   :  { %7582 = dma.done.wait [#allocation3], 16384  }
  0x1b   :  { %7583 = vsyncadd [#allocation3], 4294950912 }
  0x1c   :  { %7584 = dma.done.wait [#allocation6], 8192  }
  0x1d   :  { %7585 = vsyncadd [#allocation6], 4294959104  ;;  %v114_v0 = vld [vmem:[#allocation2 + $0x1e8] sm:$0xff]  ;;  %v113_v1 = vld [vmem:[#allocation2 + $0x1e0] sm:$0xff]  ;;  %vm2877_vm0 = vcmask 130048   ;;  %vm4199_vm1 = vcmask 261120  }
  0x1e   :  { %v110_v2 = vld [vmem:[#allocation2 + $0x1c8] sm:$0xff]  ;;  %v7632_v3 = vand.u32 4294901760, %v114_v0  ;;  %v7634_v4 = vand.u32 4294901760, %v113_v1  ;;  %v109_v6 = vld [vmem:[#allocation2 + $0x1c0] sm:$0xff] }
  0x1f   :  { %v7636_v5 = vand.u32 4294901760, %v110_v2  ;;  %v106_v7 = vld [vmem:[#allocation2 + $0x1a8] sm:$0xff]  ;;  %v105_v8 = vld [vmem:[#allocation2 + $0x1a0] sm:$0xff]  ;;  %v7638_v9 = vand.u32 4294901760, %v109_v6 }
  0x20   :  { %v7640_v10 = vand.u32 4294901760, %v106_v7  ;;  %v7642_v11 = vand.u32 4294901760, %v105_v8  ;;  %v102_v12 = vld [vmem:[#allocation2 + $0x188] sm:$0xff]  ;;  %v101_v13 = vld [vmem:[#allocation2 + $0x180] sm:$0xff]  ;;  %182 = vmatprep.subr.mxu0 %v7632_v3  ;;  %v7652_v18 = vsub.f32 %v114_v0, %v7632_v3  ;;  %v7665_v23 = vsub.f32 %v113_v1, %v7634_v4 }
  0x21   :  { %v98_v14 = vld [vmem:[#allocation2 + $0x168] sm:$0xff]  ;;  %v7645_v15 = vand.u32 4294901760, %v102_v12  ;;  %v7647_v16 = vand.u32 4294901760, %v101_v13  ;;  %v7654_v19 = vld [vmem:[#allocation2 + $0x160] sm:$0xff]  ;;  %184 = vmatpush1.msra.mxu0 %v7634_v4  ;;  %v7671_v25 = vsub.f32 %v110_v2, %v7636_v5  ;;  %v7685_v31 = vsub.f32 %v109_v6, %v7638_v9 }
  0x22   :  { %v7649_v17 = vand.u32 4294901760, %v98_v14  ;;  %v7656_v20 = vld [vmem:[#allocation2 + $0x148] sm:$0xff]  ;;  %v7658_v21 = vld [vmem:[#allocation2 + $0x140] sm:$0xff]  ;;  %v7662_v22 = vand.u32 4294901760, %v7654_v19  ;;  %186 = vmatprep.subr.mxu0 %v7636_v5  ;;  %v11787_v29 = vand.u32 4294901760, %v7652_v18  ;;  %v11785_v33 = vand.u32 4294901760, %v7665_v23 }
  0x23   :  { %v7668_v24 = vand.u32 4294901760, %v7656_v20  ;;  %v7673_v26 = vld [vmem:[#allocation2 + $0x128] sm:$0xff]  ;;  %v7675_v27 = vld [vmem:[#allocation2 + $0x120] sm:$0xff]  ;;  %v7682_v30 = vand.u32 4294901760, %v7658_v21  ;;  %188 = vmatpush1.msra.mxu0 %v7638_v9  ;;  %v11784_v34 = vand.u32 4294901760, %v7671_v25  ;;  %v7694_v35 = vsub.f32 %v106_v7, %v7640_v10 }
  0x24   :  { %v7677_v28 = vld [vmem:[#allocation2 + $0x108] sm:$0xff]  ;;  %v7688_v32 = vand.u32 4294901760, %v7673_v26  ;;  %v7697_v36 = vand.u32 4294901760, %v7675_v27  ;;  %v7699_v37 = vld [vmem:[#allocation2 + $0x100] sm:$0xff]  ;;  %190 = vmatprep.subr.mxu0 %v7640_v10  ;;  %v345_v38 = vsub.f32 %v7652_v18, %v11787_v29  ;;  %v11782_v39 = vand.u32 4294901760, %v7685_v31 }
  0x25   :  { %12311 = vst [vmem:[#allocation11_spill] sm:$0xff] %v7668_v24  ;;  %12312 = vst [vmem:[#allocation12_spill] sm:$0xff] %v7682_v30  ;;  %v7707_v40 = vsub.f32 %v105_v8, %v7642_v11  ;;  %v7710_v41 = vand.u32 4294901760, %v7677_v28  ;;  %192 = vmatpush1.msra.mxu0 %v7642_v11  ;;  %v351_v42 = vsub.f32 %v7665_v23, %v11785_v33  ;;  %v11780_v44 = vand.u32 4294901760, %v7694_v35  ;;  %v7723_v46 = vld [vmem:[#allocation2 + $0xe8] sm:$0xff]  ;;  %v7733_v51 = vld [vmem:[#allocation2 + $0xe0] sm:$0xff] }
  0x26   :  { %12313 = vst [vmem:[#allocation13_spill] sm:$0xff] %v7688_v32  ;;  %12314 = vst [vmem:[#allocation14_spill] sm:$0xff] %v7697_v36  ;;  %v357_v43 = vsub.f32 %v7671_v25, %v11784_v34  ;;  %v7721_v45 = vsub.f32 %v102_v12, %v7645_v15  ;;  %194 = vmatprep.subr.mxu0 %v7645_v15  ;;  %v346_v47 = vand.u32 4294901760, %v345_v38  ;;  %v7731_v50 = vand.u32 4294901760, %v7699_v37  ;;  %v7740_v56 = vld [vmem:[#allocation2 + $0xc8] sm:$0xff]  ;;  %v7752_v61 = vld [vmem:[#allocation2 + $0xc0] sm:$0xff] }
  0x27   :  { %12315 = vst [vmem:[#allocation15_spill] sm:$0xff] %v7710_v41  ;;  %v363_v48 = vsub.f32 %v7685_v31, %v11782_v39  ;;  %v11779_v49 = vand.u32 4294901760, %v7707_v40  ;;  %196 = vmatpush1.msra.mxu0 %v7647_v16  ;;  %v352_v52 = vand.u32 4294901760, %v351_v42  ;;  %v369_v54 = vsub.f32 %v7694_v35, %v11780_v44  ;;  %v7764_v2 = vld [vmem:[#allocation2 + $0xa8] sm:$0xff]  ;;  %v7865_v34 = vld [vmem:[#allocation2 + $0x40] sm:$0xff] }
  0x28   :  { %12316 = vst [vmem:[#allocation16_spill] sm:$0xff] %v7731_v50  ;;  %v358_v53 = vand.u32 4294901760, %v357_v43  ;;  %v11777_v55 = vand.u32 4294901760, %v7721_v45  ;;  %198 = vmatprep.subr.mxu0 %v7649_v17  ;;  %347 = vmatprep.subr.mxu1 %v346_v47  ;;  %v7747_v59 = vsub.f32 %v101_v13, %v7647_v16  ;;  %v7750_v60 = vand.u32 4294901760, %v7723_v46  ;;  %v7775_v13 = vld [vmem:[#allocation2 + $0xa0] sm:$0xff]  ;;  %v7855_v39 = vld [vmem:[#allocation2 + $0x48] sm:$0xff] }
  0x29   :  { %v364_v57 = vand.u32 4294901760, %v363_v48  ;;  %v375_v58 = vsub.f32 %v7707_v40, %v11779_v49  ;;  %200 = vmatpush1.msra.mxu0 %v7662_v22  ;;  %353 = vmatpush1.msra.mxu1 %v352_v52  ;;  %v370_v62 = vand.u32 4294901760, %v369_v54  ;;  %v7759_v0 = vsub.f32 %v98_v14, %v7649_v17  ;;  %v7842_v49 = vld [vmem:[#allocation2 + $0x60] sm:$0xff] }
  0x2a   :  { %12317 = vst [vmem:[#allocation17_spill] sm:$0xff] %v7750_v60  ;;  %v381_v63 = vsub.f32 %v7721_v45, %v11777_v55  ;;  %v7762_v1 = vand.u32 4294901760, %v7733_v51  ;;  %202 = vmatprep.subr.mxu0 %v7668_v24  ;;  %359 = vmatprep.subr.mxu1 %v358_v53  ;;  %v11775_v7 = vand.u32 4294901760, %v7747_v59  ;;  %v7770_v8 = vsub.f32 %v7654_v19, %v7662_v22 }
  0x2b   :  { %v376_v6 = vand.u32 4294901760, %v375_v58  ;;  %v7773_v12 = vand.u32 4294901760, %v7740_v56  ;;  %204 = vmatpush1.msra.mxu0 %v7682_v30  ;;  %365 = vmatpush1.msra.mxu1 %v364_v57  ;;  %v11774_v38 = vand.u32 4294901760, %v7759_v0  ;;  %v7781_v42 = vsub.f32 %v7656_v20, %v7668_v24  ;;  %v7798_v20 = vld [vmem:[#allocation2 + $0x88] sm:$0xff] }
  0x2c   :  { %12318 = vst [vmem:[#allocation18_spill] sm:$0xff] %v7762_v1  ;;  %v382_v14 = vand.u32 4294901760, %v381_v63  ;;  %v7784_v43 = vand.u32 4294901760, %v7752_v61  ;;  %206 = vmatprep.subr.mxu0 %v7688_v32  ;;  %371 = vmatprep.subr.mxu1 %v370_v62  ;;  %v387_v19 = vsub.f32 %v7747_v59, %v11775_v7  ;;  %v11776_v47 = vand.u32 4294901760, %v7770_v8 }
  0x2d   :  { %12319 = vst [vmem:[#allocation19_spill] sm:$0xff] %v7773_v12  ;;  %v7793_v48 = vsub.f32 %v7658_v21, %v7682_v30  ;;  %v7796_v52 = vand.u32 4294901760, %v7764_v2  ;;  %208 = vmatpush1.msra.mxu0 %v7697_v36  ;;  %377 = vmatpush1.msra.mxu1 %v376_v6  ;;  %v393_v53 = vsub.f32 %v7759_v0, %v11774_v38  ;;  %v11778_v54 = vand.u32 4294901760, %v7781_v42  ;;  %v7821_v38 = vld [vmem:[#allocation2 + $0x80] sm:$0xff] }
  0x2e   :  { %12320 = vst [vmem:[#allocation20_spill] sm:$0xff] %v7784_v43  ;;  %v7807_v57 = vsub.f32 %v7673_v26, %v7688_v32  ;;  %v7810_v21 = vand.u32 4294901760, %v7775_v13  ;;  %210 = vmatprep.subr.mxu0 %v7710_v41  ;;  %383 = vmatprep.subr.mxu1 %v382_v14  ;;  %v388_v58 = vand.u32 4294901760, %v387_v19  ;;  %v399_v62 = vsub.f32 %v7770_v8, %v11776_v47  ;;  %v7831_v47 = vld [vmem:[#allocation2 + $0x68] sm:$0xff] }
  0x2f   :  { %12321 = vst [vmem:[#allocation21_spill] sm:$0xff] %v7796_v52  ;;  %v11781_v63 = vand.u32 4294901760, %v7793_v48  ;;  %v7819_v6 = vsub.f32 %v7675_v27, %v7697_v36  ;;  %212 = vmatpush1.msra.mxu0 %v7731_v50  ;;  %v394_v26 = vand.u32 4294901760, %v393_v53  ;;  %v405_v14 = vsub.f32 %v7781_v42, %v11778_v54  ;;  %v7945_v36 = vld [vmem:[#allocation2 + $0x3e8] sm:$0xff] }
  0x30   :  { %12322 = vst [vmem:[#allocation22_spill] sm:$0xff] %v7810_v21  ;;  %v11783_v19 = vand.u32 4294901760, %v7807_v57  ;;  %v7829_v7 = vand.u32 4294901760, %v7798_v20  ;;  %389 = vmatpush1.msra.mxu1 %v388_v58  ;;  %214 = vmatprep.subr.mxu0 %v7750_v60  ;;  %v400_v27 = vand.u32 4294901760, %v399_v62  ;;  %v7840_v54 = vsub.f32 %v7677_v28, %v7710_v41 }
  0x31   :  { %v411_v55 = vsub.f32 %v7793_v48, %v11781_v63  ;;  %v11786_v53 = vand.u32 4294901760, %v7819_v6  ;;  %395 = vmatprep.subr.mxu1 %v394_v26  ;;  %216 = vmatpush1.msra.mxu0 %v7762_v1  ;;  %v406_v44 = vand.u32 4294901760, %v405_v14  ;;  %v7849_v62 = vand.u32 4294901760, %v7821_v38 }
  0x32   :  { %12323 = vst [vmem:[#allocation23_spill] sm:$0xff] %v7829_v7  ;;  %v417_v58 = vsub.f32 %v7807_v57, %v11783_v19  ;;  %v7853_v63 = vsub.f32 %v7699_v37, %v7731_v50  ;;  %401 = vmatpush1.msra.mxu1 %v400_v27  ;;  %218 = vmatprep.subr.mxu0 %v7773_v12  ;;  %v11790_v14 = vand.u32 4294901760, %v7840_v54  ;;  %v7863_v19 = vand.u32 4294901760, %v7831_v47 }
  0x33   :  { %12324 = vst [vmem:[#allocation24_spill] sm:$0xff] %v7849_v62  ;;  %v412_v28 = vand.u32 4294901760, %v411_v55  ;;  %v423_v26 = vsub.f32 %v7819_v6, %v11786_v53  ;;  %407 = vmatprep.subr.mxu1 %v406_v44  ;;  %220 = vmatpush1.msra.mxu0 %v7784_v43  ;;  %v7871_v55 = vsub.f32 %v7723_v46, %v7750_v60  ;;  %v7874_v33 = vand.u32 4294901760, %v7842_v49  ;;  %v7876_v53 = vld [vmem:[#allocation2 + $0x28] sm:$0xff] }
  0x34   :  { %12325 = vst [vmem:[#allocation25_spill] sm:$0xff] %v7863_v19  ;;  %v418_v37 = vand.u32 4294901760, %v417_v58  ;;  %v11793_v27 = vand.u32 4294901760, %v7853_v63  ;;  %222 = vmatprep.subr.mxu0 %v7796_v52  ;;  %v429_v44 = vsub.f32 %v7840_v54, %v11790_v14  ;;  %v7884_v58 = vsub.f32 %v7733_v51, %v7762_v1  ;;  %v7901_v51 = vld [vmem:[#allocation2 + $0x20] sm:$0xff] }
  0x35   :  { %12326 = vst [vmem:[#allocation26_spill] sm:$0xff] %v7874_v33  ;;  %413 = vmatpush1.msra.mxu1 %v412_v28  ;;  %v424_v29 = vand.u32 4294901760, %v423_v26  ;;  %v7887_v46 = vand.u32 4294901760, %v7855_v39  ;;  %224 = vmatpush1.msra.mxu0 %v7810_v21  ;;  %v7896_v60 = vsub.f32 %v7740_v56, %v7773_v12  ;;  %v7899_v14 = vand.u32 4294901760, %v7865_v34  ;;  %v7912_v56 = vld [vmem:[#allocation2 + $0x8] sm:$0xff] }
  0x36   :  { %419 = vmatprep.subr.mxu1 %v418_v37  ;;  %v435_v28 = vsub.f32 %v7853_v63, %v11793_v27  ;;  %226 = vmatprep.subr.mxu0 %v7829_v7  ;;  %v430_v37 = vand.u32 4294901760, %v429_v44  ;;  %v7907_v27 = vsub.f32 %v7752_v61, %v7784_v43  ;;  %v7910_v26 = vand.u32 4294901760, %v7876_v53  ;;  %v7935_v44 = vld [vmem:[#allocation2] sm:$0xff] }
  0x37   :  { %12327 = vst [vmem:[#allocation27_spill] sm:$0xff] %v7887_v46  ;;  %12328 = vst [vmem:[#allocation28_spill] sm:$0xff] %v7899_v14  ;;  %425 = vmatpush1.msra.mxu1 %v424_v29  ;;  %228 = vmatpush1.msra.mxu0 %v7849_v62  ;;  %v12331_v50 = vand.u32 4294901760, %v7871_v55  ;;  %v7921_v1 = vsub.f32 %v7764_v2, %v7796_v52  ;;  %v12333_v61 = vand.u32 4294901760, %v7884_v58  ;;  %v7943_v41 = vand.u32 4294901760, %v7912_v56 }
  0x38   :  { %12329 = vst [vmem:[#allocation29_spill] sm:$0xff] %v7907_v27  ;;  %12330 = vst [vmem:[#allocation30_spill] sm:$0xff] %v7910_v26  ;;  %v436_v12 = vand.u32 4294901760, %v435_v28  ;;  %431 = vmatprep.subr.mxu1 %v430_v37  ;;  %230 = vmatprep.subr.mxu0 %v7863_v19  ;;  %v7929_v28 = vand.u32 4294901760, %v7901_v51  ;;  %v12336_v37 = vand.u32 4294901760, %v7896_v60  ;;  %v7963_v24 = vand.u32 4294901760, %v7935_v44 }
  0x39   :  { %v441_v29 = vsub.f32 %v7871_v55, %v12331_v50  ;;  %12332 = vst [vmem:[#allocation31_spill] sm:$0xff] %v7921_v1  ;;  %v447_v43 = vsub.f32 %v7884_v58, %v12333_v61  ;;  %v7933_v50 = vsub.f32 %v7775_v13, %v7810_v21  ;;  %232 = vmatpush1.msra.mxu0 %v7874_v33  ;;  %12337 = vst [vmem:[#allocation34_spill] sm:$0xff] %v7943_v41 }
  0x3a   :  { %12334 = vst [vmem:[#allocation32_spill] sm:$0xff] %v7929_v28  ;;  %437 = vmatpush1.msra.mxu1 %v436_v12  ;;  %v453_v52 = vsub.f32 %v7896_v60, %v12336_v37  ;;  %234 = vmatprep.subr.mxu0 %v7887_v46  ;;  %v12338_v13 = vand.u32 4294901760, %v7907_v27  ;;  %v7954_v21 = vsub.f32 %v7798_v20, %v7829_v7  ;;  %v7956_v37 = vld [vmem:[#allocation2 + $0x3e0] sm:$0xff]  ;;  %12341 = vst [vmem:[#allocation36_spill] sm:$0xff] %v7963_v24 }
  0x3b   :  { %12335 = vst [vmem:[#allocation33_spill] sm:$0xff] %v7933_v50  ;;  %v442_v2 = vand.u32 4294901760, %v441_v29  ;;  %v448_v32 = vand.u32 4294901760, %v447_v43  ;;  %236 = vmatpush1.msra.mxu0 %v7899_v14  ;;  %v12340_v43 = vand.u32 4294901760, %v7921_v1  ;;  %v7969_v29 = vld [vmem:[#allocation2 + $0x3c8] sm:$0xff] }
  0x3c   :  { %v459_v12 = vsub.f32 %v7907_v27, %v12338_v13  ;;  %12339 = vst [vmem:[#allocation35_spill] sm:$0xff] %v7954_v21  ;;  %v454_v61 = vand.u32 4294901760, %v453_v52  ;;  %v7967_v13 = vsub.f32 %v7821_v38, %v7849_v62  ;;  %238 = vmatprep.subr.mxu0 %v7910_v26  ;;  %v12343_v52 = vand.u32 4294901760, %v7933_v50 }
  0x3d   :  { %443 = vmatprep.subr.mxu1 %v442_v2  ;;  %v465_v30 = vsub.f32 %v7921_v1, %v12340_v43  ;;  %v7977_v43 = vand.u32 4294901760, %v7945_v36  ;;  %v7979_v1 = vld [vmem:[#allocation2 + $0x3c0] sm:$0xff]  ;;  %240 = vmatpush1.msra.mxu0 %v7929_v28  ;;  %v7988_v62 = vand.u32 4294901760, %v7956_v37 }
  0x3e   :  { %12342 = vst [vmem:[#allocation37_spill] sm:$0xff] %v7967_v13  ;;  %449 = vmatpush1.msra.mxu1 %v448_v32  ;;  %v460_v20 = vand.u32 4294901760, %v459_v12  ;;  %v471_v2 = vsub.f32 %v7933_v50, %v12343_v52  ;;  %v7985_v12 = vsub.f32 %v7831_v47, %v7863_v19  ;;  %v7990_v52 = vld [vmem:[#allocation2 + $0x3a8] sm:$0xff]  ;;  %242 = vmatprep.subr.mxu0 %v7943_v41  ;;  %v8001_v47 = vand.u32 4294901760, %v7969_v29 }
  0x3f   :  { %12344 = vst [vmem:[#allocation38_spill] sm:$0xff] %v7977_v43  ;;  %455 = vmatprep.subr.mxu1 %v454_v61  ;;  %v466_v38 = vand.u32 4294901760, %v465_v30  ;;  %12346 = vst [vmem:[#allocation40_spill] sm:$0xff] %v7988_v62  ;;  %v12347_v61 = vand.u32 4294901760, %v7954_v21  ;;  %v7998_v32 = vsub.f32 %v7842_v49, %v7874_v33  ;;  %244 = vmatpush1.msra.mxu0 %v7963_v24  ;;  %v12350_v19 = vand.u32 4294901760, %v7967_v13  ;;  %v8015_v49 = vld [vmem:[#allocation2 + $0x3a0] sm:$0xff] }
  0x40   :  { %12345 = vst [vmem:[#allocation39_spill] sm:$0xff] %v7985_v12  ;;  %461 = vmatpush1.msra.mxu1 %v460_v20  ;;  %v472_v7 = vand.u32 4294901760, %v471_v2  ;;  %12349 = vst [vmem:[#allocation42_spill] sm:$0xff] %v8001_v47  ;;  %v8010_v50 = vsub.f32 %v7855_v39, %v7887_v46  ;;  %246 = vmatprep.subr.mxu0 %v7977_v43  ;;  %v8024_v2 = vand.u32 4294901760, %v7990_v52  ;;  %v8026_v39 = vld [vmem:[#allocation2 + $0x388] sm:$0xff] }
  0x41   :  { %v477_v30 = vsub.f32 %v7954_v21, %v12347_v61  ;;  %12348 = vst [vmem:[#allocation41_spill] sm:$0xff] %v7998_v32  ;;  %467 = vmatprep.subr.mxu1 %v466_v38  ;;  %v483_v20 = vsub.f32 %v7967_v13, %v12350_v19  ;;  %v8013_v61 = vand.u32 4294901760, %v7979_v1  ;;  %v11836_v38 = vand.u32 4294901760, %v7998_v32  ;;  %248 = vmatpush2.msra.mxu0 %v7988_v62 }
  0x42   :  { %12351 = vst [vmem:[#allocation43_spill] sm:$0xff] %v8010_v50  ;;  %473 = vmatpush1.msra.mxu1 %v472_v7  ;;  %v8021_v19 = vsub.f32 %v7865_v34, %v7899_v14  ;;  %12354 = vst [vmem:[#allocation46_spill] sm:$0xff] %v8024_v2  ;;  %v12355_v13 = vand.u32 4294901760, %v7985_v12  ;;  %250 = vmatprep.subr.mxu0 %v8001_v47  ;;  %v8043_v14 = vand.u32 4294901760, %v8015_v49  ;;  %v8049_v7 = vld [vmem:[#allocation2 + $0x380] sm:$0xff] }
  0x43   :  { %12352 = vst [vmem:[#allocation44_spill] sm:$0xff] %v8013_v61  ;;  %v478_v33 = vand.u32 4294901760, %v477_v30  ;;  %v484_v46 = vand.u32 4294901760, %v483_v20  ;;  %v8035_v30 = vsub.f32 %v7876_v53, %v7910_v26  ;;  %v495_v34 = vsub.f32 %v7998_v32, %v11836_v38  ;;  %252 = vmatpush2.msra.mxu0 %v8013_v61  ;;  %v8059_v32 = vld [vmem:[#allocation2 + $0x368] sm:$0xff] }
  0x44   :  { %12353 = vst [vmem:[#allocation45_spill] sm:$0xff] %v8021_v19  ;;  %v489_v21 = vsub.f32 %v7985_v12, %v12355_v13  ;;  %12357 = vst [vmem:[#allocation48_spill] sm:$0xff] %v8043_v14  ;;  %v8047_v13 = vsub.f32 %v7901_v51, %v7929_v28  ;;  %v8057_v20 = vand.u32 4294901760, %v8026_v39  ;;  %v12361_v51 = vand.u32 4294901760, %v8021_v19  ;;  %254 = vmatprep.subr.mxu0 %v8024_v2 }
  0x45   :  { %12356 = vst [vmem:[#allocation47_spill] sm:$0xff] %v8035_v30  ;;  %479 = vmatprep.subr.mxu1 %v478_v33  ;;  %v12359_v33 = vand.u32 4294901760, %v8010_v50  ;;  %v496_v12 = vand.u32 4294901760, %v495_v34  ;;  %256 = vmatpush2.msra.mxu0 %v8043_v14 }
  0x46   :  { %12358 = vst [vmem:[#allocation49_spill] sm:$0xff] %v8047_v13  ;;  %485 = vmatpush1.msra.mxu1 %v484_v46  ;;  %v490_v53 = vand.u32 4294901760, %v489_v21  ;;  %12360 = vst [vmem:[#allocation50_spill] sm:$0xff] %v8057_v20  ;;  %v507_v28 = vsub.f32 %v8021_v19, %v12361_v51  ;;  %v8068_v46 = vsub.f32 %v7912_v56, %v7943_v41  ;;  %v8077_v51 = vand.u32 4294901760, %v8049_v7  ;;  %v8083_v19 = vld [vmem:[#allocation2 + $0x348] sm:$0xff] }
  0x47   :  { %v501_v26 = vsub.f32 %v8010_v50, %v12359_v33  ;;  %v8070_v33 = vld [vmem:[#allocation2 + $0x360] sm:$0xff]  ;;  %v12363_v50 = vand.u32 4294901760, %v8035_v30  ;;  %v8081_v21 = vsub.f32 %v7935_v44, %v7963_v24  ;;  %258 = vmatprep.subr.mxu0 %v8057_v20  ;;  %v8091_v41 = vand.u32 4294901760, %v8059_v32  ;;  %v8104_v24 = vld [vmem:[#allocation2 + $0x328] sm:$0xff] }
  0x48   :  { %12362 = vst [vmem:[#allocation51_spill] sm:$0xff] %v8068_v46  ;;  %491 = vmatprep.subr.mxu1 %v490_v53  ;;  %12364 = vst [vmem:[#allocation52_spill] sm:$0xff] %v8077_v51  ;;  %v508_v56 = vand.u32 4294901760, %v507_v28  ;;  %v12366_v53 = vand.u32 4294901760, %v8047_v13  ;;  %260 = vmatpush2.msra.mxu0 %v8077_v51  ;;  %v8099_v28 = vsub.f32 %v7945_v36, %v7977_v43  ;;  %v8115_v36 = vand.u32 4294901760, %v8083_v19 }
  0x49   :  { %v502_v38 = vand.u32 4294901760, %v501_v26  ;;  %v513_v34 = vsub.f32 %v8035_v30, %v12363_v50  ;;  %12365 = vst [vmem:[#allocation53_spill] sm:$0xff] %v8081_v21  ;;  %497 = vmatpush1.msra.mxu1 %v496_v12  ;;  %12367 = vst [vmem:[#allocation54_spill] sm:$0xff] %v8091_v41  ;;  %v8093_v30 = vld [vmem:[#allocation2 + $0x340] sm:$0xff]  ;;  %v11859_v12 = vand.u32 4294901760, %v8081_v21  ;;  %262 = vmatprep.subr.mxu0 %v8091_v41 }
  0x4a   :  { %v519_v26 = vsub.f32 %v8047_v13, %v12366_v53  ;;  %12368 = vst [vmem:[#allocation55_spill] sm:$0xff] %v8099_v28  ;;  %v8102_v53 = vand.u32 4294901760, %v8070_v33  ;;  %v12370_v13 = vand.u32 4294901760, %v8068_v46  ;;  %12372 = vst [vmem:[#allocation58_spill] sm:$0xff] %v8115_v36 }
  0x4b   :  { %503 = vmatprep.subr.mxu1 %v502_v38  ;;  %v514_v44 = vand.u32 4294901760, %v513_v34  ;;  %v8112_v34 = vsub.f32 %v7956_v37, %v7988_v62  ;;  %v531_v43 = vsub.f32 %v8081_v21, %v11859_v12  ;;  %v8129_v37 = vld [vmem:[#allocation2 + $0x320] sm:$0xff]  ;;  %v8135_v12 = vsub.f32 %v7979_v1, %v8013_v61 }
  0x4c   :  { %12369 = vst [vmem:[#allocation56_spill] sm:$0xff] %v8102_v53  ;;  %509 = vmatpush1.msra.mxu1 %v508_v56  ;;  %v520_v50 = vand.u32 4294901760, %v519_v26  ;;  %v525_v38 = vsub.f32 %v8068_v46, %v12370_v13  ;;  %264 = vmatpush2.msra.mxu0 %v8102_v53  ;;  %v8124_v13 = vsub.f32 %v7969_v29, %v8001_v47  ;;  %v8127_v26 = vand.u32 4294901760, %v8093_v30  ;;  %v8140_v29 = vld [vmem:[#allocation2 + $0x308] sm:$0xff] }
  0x4d   :  { %12371 = vst [vmem:[#allocation57_spill] sm:$0xff] %v8112_v34  ;;  %515 = vmatprep.subr.mxu1 %v514_v44  ;;  %v11870_v44 = vand.u32 4294901760, %v8112_v34  ;;  %266 = vmatprep.subr.mxu0 %v8115_v36  ;;  %12375 = vst [vmem:[#allocation61_spill] sm:$0xff] %v8135_v12  ;;  %v8138_v56 = vand.u32 4294901760, %v8104_v24  ;;  %v532_v47 = vand.u32 4294901760, %v531_v43  ;;  %v12377_v21 = vand.u32 4294901760, %v8099_v28 }
  0x4e   :  { %12373 = vst [vmem:[#allocation59_spill] sm:$0xff] %v8124_v13  ;;  %12374 = vst [vmem:[#allocation60_spill] sm:$0xff] %v8127_v26  ;;  %521 = vmatpush1.msra.mxu1 %v520_v50  ;;  %v526_v62 = vand.u32 4294901760, %v525_v38  ;;  %268 = vmatpush2.msra.mxu0 %v8127_v26  ;;  %v8149_v38 = vsub.f32 %v7990_v52, %v8024_v2  ;;  %v8157_v43 = vand.u32 4294901760, %v8129_v37  ;;  %v8163_v50 = vld [vmem:[#allocation2 + $0x300] sm:$0xff]  ;;  %v8170_v61 = vand.u32 4294901760, %v8140_v29 }
  0x4f   :  { %12376 = vst [vmem:[#allocation62_spill] sm:$0xff] %v8138_v56  ;;  %v537_v46 = vsub.f32 %v8099_v28, %v12377_v21  ;;  %v543_v1 = vsub.f32 %v8112_v34, %v11870_v44  ;;  %270 = vmatprep.subr.mxu0 %v8138_v56  ;;  %v8161_v21 = vsub.f32 %v8015_v49, %v8043_v14  ;;  %v8172_v34 = vld [vmem:[#allocation2 + $0x2e8] sm:$0xff]  ;;  %v12383_v27 = vand.u32 4294901760, %v8135_v12 }
  0x50   :  { %12378 = vst [vmem:[#allocation63_spill] sm:$0xff] %v8149_v38  ;;  %527 = vmatprep.subr.mxu1 %v526_v62  ;;  %12379 = vst [vmem:[#allocation64_spill] sm:$0xff] %v8157_v43  ;;  %v12381_v62 = vand.u32 4294901760, %v8124_v13  ;;  %272 = vmatpush2.msra.mxu0 %v8157_v43  ;;  %v12385_v14 = vand.u32 4294901760, %v8149_v38 }
  0x51   :  { %12380 = vst [vmem:[#allocation65_spill] sm:$0xff] %v8161_v21  ;;  %533 = vmatpush1.msra.mxu1 %v532_v47  ;;  %v538_v52 = vand.u32 4294901760, %v537_v46  ;;  %12382 = vst [vmem:[#allocation66_spill] sm:$0xff] %v8170_v61  ;;  %v544_v28 = vand.u32 4294901760, %v543_v1  ;;  %v555_v49 = vsub.f32 %v8135_v12, %v12383_v27  ;;  %v8181_v46 = vsub.f32 %v8026_v39, %v8057_v20  ;;  %v8196_v12 = vld [vmem:[#allocation2 + $0x2c8] sm:$0xff] }
  0x52   :  { %v549_v2 = vsub.f32 %v8124_v13, %v12381_v62  ;;  %v8183_v62 = vld [vmem:[#allocation2 + $0x2e0] sm:$0xff]  ;;  %v561_v1 = vsub.f32 %v8149_v38, %v12385_v14  ;;  %274 = vmatprep.subr.mxu0 %v8170_v61  ;;  %v8190_v27 = vand.u32 4294901760, %v8163_v50  ;;  %v8194_v47 = vsub.f32 %v8049_v7, %v8077_v51 }
  0x53   :  { %12384 = vst [vmem:[#allocation67_spill] sm:$0xff] %v8181_v46  ;;  %539 = vmatprep.subr.mxu1 %v538_v52  ;;  %v556_v39 = vand.u32 4294901760, %v555_v49  ;;  %v12388_v52 = vand.u32 4294901760, %v8161_v21  ;;  %v8203_v14 = vand.u32 4294901760, %v8172_v34  ;;  %v8205_v38 = vld [vmem:[#allocation2 + $0x2c0] sm:$0xff]  ;;  %v8214_v49 = vand.u32 4294901760, %v8183_v62 }
  0x54   :  { %v550_v44 = vand.u32 4294901760, %v549_v2  ;;  %12386 = vst [vmem:[#allocation68_spill] sm:$0xff] %v8190_v27  ;;  %12387 = vst [vmem:[#allocation69_spill] sm:$0xff] %v8194_v47  ;;  %545 = vmatpush2.msra.mxu1 %v544_v28  ;;  %v562_v13 = vand.u32 4294901760, %v561_v1  ;;  %276 = vmatpush2.msra.mxu0 %v8190_v27  ;;  %v11893_v7 = vand.u32 4294901760, %v8194_v47  ;;  %v8211_v28 = vsub.f32 %v8059_v32, %v8091_v41 }
  0x55   :  { %v567_v2 = vsub.f32 %v8161_v21, %v12388_v52  ;;  %12389 = vst [vmem:[#allocation70_spill] sm:$0xff] %v8203_v14  ;;  %12391 = vst [vmem:[#allocation72_spill] sm:$0xff] %v8214_v49  ;;  %v8216_v52 = vld [vmem:[#allocation2 + $0x2a8] sm:$0xff]  ;;  %v12392_v51 = vand.u32 4294901760, %v8181_v46  ;;  %278 = vmatprep.subr.mxu0 %v8203_v14  ;;  %v8224_v1 = vsub.f32 %v8070_v33, %v8102_v53  ;;  %v8227_v32 = vand.u32 4294901760, %v8196_v12  ;;  %v8241_v33 = vld [vmem:[#allocation2 + $0x2a0] sm:$0xff] }
  0x56   :  { %551 = vmatprep.subr.mxu1 %v550_v44  ;;  %12390 = vst [vmem:[#allocation71_spill] sm:$0xff] %v8211_v28  ;;  %v579_v41 = vsub.f32 %v8194_v47, %v11893_v7  ;;  %280 = vmatpush2.msra.mxu0 %v8214_v49  ;;  %v8247_v7 = vsub.f32 %v8093_v30, %v8127_v26  ;;  %v12399_v47 = vand.u32 4294901760, %v8211_v28 }
  0x57   :  { %557 = vmatpush2.msra.mxu1 %v556_v39  ;;  %v568_v20 = vand.u32 4294901760, %v567_v2  ;;  %v573_v44 = vsub.f32 %v8181_v46, %v12392_v51  ;;  %12393 = vst [vmem:[#allocation73_spill] sm:$0xff] %v8224_v1  ;;  %12394 = vst [vmem:[#allocation74_spill] sm:$0xff] %v8227_v32  ;;  %v8236_v51 = vsub.f32 %v8083_v19, %v8115_v36  ;;  %v8239_v2 = vand.u32 4294901760, %v8205_v38  ;;  %v8252_v19 = vld [vmem:[#allocation2 + $0x288] sm:$0xff] }
  0x58   :  { %563 = vmatprep.subr.mxu1 %v562_v13  ;;  %v11904_v13 = vand.u32 4294901760, %v8224_v1  ;;  %282 = vmatprep.subr.mxu0 %v8227_v32  ;;  %12397 = vst [vmem:[#allocation77_spill] sm:$0xff] %v8247_v7  ;;  %v8250_v39 = vand.u32 4294901760, %v8216_v52  ;;  %v580_v36 = vand.u32 4294901760, %v579_v41  ;;  %v585_v46 = vsub.f32 %v8211_v28, %v12399_v47 }
  0x59   :  { %12395 = vst [vmem:[#allocation75_spill] sm:$0xff] %v8236_v51  ;;  %12396 = vst [vmem:[#allocation76_spill] sm:$0xff] %v8239_v2  ;;  %569 = vmatpush2.msra.mxu1 %v568_v20  ;;  %v574_v53 = vand.u32 4294901760, %v573_v44  ;;  %284 = vmatpush2.msra.mxu0 %v8239_v2  ;;  %v8261_v44 = vsub.f32 %v8104_v24, %v8138_v56  ;;  %v8269_v41 = vand.u32 4294901760, %v8241_v33  ;;  %v8275_v20 = vld [vmem:[#allocation2 + $0x280] sm:$0xff]  ;;  %v8282_v26 = vand.u32 4294901760, %v8252_v19 }
  0x5a   :  { %12398 = vst [vmem:[#allocation78_spill] sm:$0xff] %v8250_v39  ;;  %v591_v30 = vsub.f32 %v8224_v1, %v11904_v13  ;;  %286 = vmatprep.subr.mxu0 %v8250_v39  ;;  %v8273_v47 = vsub.f32 %v8129_v37, %v8157_v43  ;;  %v586_v24 = vand.u32 4294901760, %v585_v46  ;;  %v8284_v1 = vld [vmem:[#allocation2 + $0x268] sm:$0xff]  ;;  %v12405_v21 = vand.u32 4294901760, %v8247_v7 }
  0x5b   :  { %12400 = vst [vmem:[#allocation79_spill] sm:$0xff] %v8261_v44  ;;  %575 = vmatprep.subr.mxu1 %v574_v53  ;;  %12401 = vst [vmem:[#allocation80_spill] sm:$0xff] %v8269_v41  ;;  %v12403_v53 = vand.u32 4294901760, %v8236_v51  ;;  %288 = vmatpush2.msra.mxu0 %v8269_v41  ;;  %v8293_v46 = vsub.f32 %v8140_v29, %v8170_v61  ;;  %v12407_v43 = vand.u32 4294901760, %v8261_v44 }
  0x5c   :  { %12402 = vst [vmem:[#allocation81_spill] sm:$0xff] %v8273_v47  ;;  %581 = vmatpush2.msra.mxu1 %v580_v36  ;;  %12404 = vst [vmem:[#allocation82_spill] sm:$0xff] %v8282_v26  ;;  %v592_v28 = vand.u32 4294901760, %v591_v30  ;;  %v603_v37 = vsub.f32 %v8247_v7, %v12405_v21  ;;  %290 = vmatprep.subr.mxu0 %v8282_v26  ;;  %v8302_v21 = vand.u32 4294901760, %v8275_v20  ;;  %v8308_v7 = vld [vmem:[#allocation2 + $0x248] sm:$0xff] }
  0x5d   :  { %v597_v56 = vsub.f32 %v8236_v51, %v12403_v53  ;;  %12406 = vst [vmem:[#allocation83_spill] sm:$0xff] %v8293_v46  ;;  %v8295_v53 = vld [vmem:[#allocation2 + $0x260] sm:$0xff]  ;;  %587 = vmatprep.subr.mxu1 %v586_v24  ;;  %v609_v30 = vsub.f32 %v8261_v44, %v12407_v43  ;;  %v8306_v36 = vsub.f32 %v8163_v50, %v8190_v27  ;;  %v12410_v24 = vand.u32 4294901760, %v8273_v47 }
  0x5e   :  { %12408 = vst [vmem:[#allocation84_spill] sm:$0xff] %v8302_v21  ;;  %593 = vmatpush2.msra.mxu1 %v592_v28  ;;  %v604_v29 = vand.u32 4294901760, %v603_v37  ;;  %v8315_v43 = vand.u32 4294901760, %v8284_v1  ;;  %v8317_v44 = vld [vmem:[#allocation2 + $0x240] sm:$0xff]  ;;  %292 = vmatpush2.msra.mxu0 %v8302_v21  ;;  %v8323_v28 = vsub.f32 %v8172_v34, %v8203_v14  ;;  %v8326_v37 = vand.u32 4294901760, %v8295_v53 }
  0x5f   :  { %v598_v13 = vand.u32 4294901760, %v597_v56  ;;  %12409 = vst [vmem:[#allocation85_spill] sm:$0xff] %v8306_v36  ;;  %v615_v56 = vsub.f32 %v8273_v47, %v12410_v24  ;;  %v610_v51 = vand.u32 4294901760, %v609_v30  ;;  %v11927_v50 = vand.u32 4294901760, %v8306_v36  ;;  %v8328_v24 = vld [vmem:[#allocation2 + $0x228] sm:$0xff] }
  0x60   :  { %12411 = vst [vmem:[#allocation86_spill] sm:$0xff] %v8323_v28  ;;  %v12412_v27 = vand.u32 4294901760, %v8293_v46  ;;  %294 = vmatprep.subr.mxu0 %v8315_v43  ;;  %v8336_v30 = vsub.f32 %v8183_v62, %v8214_v49  ;;  %v8339_v34 = vand.u32 4294901760, %v8308_v7  ;;  %v8353_v62 = vld [vmem:[#allocation2 + $0x220] sm:$0xff] }
  0x61   :  { %599 = vmatprep.subr.mxu1 %v598_v13  ;;  %v616_v61 = vand.u32 4294901760, %v615_v56  ;;  %v627_v14 = vsub.f32 %v8306_v36, %v11927_v50  ;;  %296 = vmatpush2.msra.mxu0 %v8326_v37  ;;  %v8351_v56 = vand.u32 4294901760, %v8317_v44  ;;  %v8359_v50 = vsub.f32 %v8205_v38, %v8239_v2 }
  0x62   :  { %605 = vmatpush2.msra.mxu1 %v604_v29  ;;  %v621_v13 = vsub.f32 %v8293_v46, %v12412_v27  ;;  %12413 = vst [vmem:[#allocation87_spill] sm:$0xff] %v8336_v30  ;;  %12414 = vst [vmem:[#allocation88_spill] sm:$0xff] %v8339_v34  ;;  %v8348_v27 = vsub.f32 %v8196_v12, %v8227_v32  ;;  %298 = vmatprep.subr.mxu0 %v8339_v34  ;;  %v8362_v29 = vand.u32 4294901760, %v8328_v24  ;;  %v8364_v12 = vld [vmem:[#allocation2 + $0x208] sm:$0xff] }
  0x63   :  { %611 = vmatprep.subr.mxu1 %v610_v51  ;;  %12416 = vst [vmem:[#allocation90_spill] sm:$0xff] %v8351_v56  ;;  %v11938_v51 = vand.u32 4294901760, %v8336_v30  ;;  %12417 = vst [vmem:[#allocation91_spill] sm:$0xff] %v8359_v50  ;;  %v628_v32 = vand.u32 4294901760, %v627_v14  ;;  %v12419_v36 = vand.u32 4294901760, %v8323_v28  ;;  %300 = vmatpush2.msra.mxu0 %v8351_v56  ;;  %v8381_v14 = vand.u32 4294901760, %v8353_v62 }
  0x64   :  { %12415 = vst [vmem:[#allocation89_spill] sm:$0xff] %v8348_v27  ;;  %617 = vmatpush2.msra.mxu1 %v616_v61  ;;  %v622_v49 = vand.u32 4294901760, %v621_v13  ;;  %12418 = vst [vmem:[#allocation92_spill] sm:$0xff] %v8362_v29  ;;  %v8373_v13 = vsub.f32 %v8216_v52, %v8250_v39  ;;  %302 = vmatprep.subr.mxu0 %v8362_v29  ;;  %v8387_v61 = vld [vmem:[#allocation2 + $0x200] sm:$0xff]  ;;  %v8394_v2 = vand.u32 4294901760, %v8364_v12 }
  0x65   :  { %v633_v46 = vsub.f32 %v8323_v28, %v12419_v36  ;;  %v639_v38 = vsub.f32 %v8336_v30, %v11938_v51  ;;  %v8385_v36 = vsub.f32 %v8241_v33, %v8269_v41  ;;  %v50_v30 = vld [vmem:[%s11768_s0 + $0x8] sm:$0xff]  ;;  %v12423_v33 = vand.u32 4294901760, %v8359_v50  ;;  %304 = vmatpush2.msra.mxu0 %v8381_v14 }
  0x66   :  { %12420 = vst [vmem:[#allocation93_spill] sm:$0xff] %v8373_v13  ;;  %623 = vmatprep.subr.mxu1 %v622_v49  ;;  %v12422_v49 = vand.u32 4294901760, %v8348_v27  ;;  %306 = vmatprep.subr.mxu0 %v8394_v2 }
  0x67   :  { %12421 = vst [vmem:[#allocation94_spill] sm:$0xff] %v8385_v36  ;;  %629 = vmatpush2.msra.mxu1 %v628_v32  ;;  %v634_v52 = vand.u32 4294901760, %v633_v46  ;;  %v640_v28 = vand.u32 4294901760, %v639_v38  ;;  %v651_v41 = vsub.f32 %v8359_v50, %v12423_v33  ;;  %v8406_v46 = vsub.f32 %v8252_v19, %v8282_v26 }
  0x68   :  { %v645_v39 = vsub.f32 %v8348_v27, %v12422_v49  ;;  %v49_v49 = vld [vmem:[%s11768_s0] sm:$0xff]  ;;  %v12425_v38 = vand.u32 4294901760, %v8373_v13  ;;  %v8416_v33 = vand.u32 4294901760, %v8387_v61  ;;  %v8420_v32 = vsub.f32 %v8275_v20, %v8302_v21 }
  0x69   :  { %12424 = vst [vmem:[#allocation95_spill] sm:$0xff] %v8406_v46  ;;  %635 = vmatprep.subr.mxu1 %v634_v52  ;;  %v652_v19 = vand.u32 4294901760, %v651_v41  ;;  %v12426_v26 = vand.u32 4294901760, %v8385_v36  ;;  %v8426_v50 = vand.u32 4294901760, %v50_v30  ;;  %v8432_v20 = vsub.f32 %v8284_v1, %v8315_v43 }
  0x6a   :  { %v646_v51 = vand.u32 4294901760, %v645_v39  ;;  %v657_v27 = vsub.f32 %v8373_v13, %v12425_v38  ;;  %641 = vmatpush2.msra.mxu1 %v640_v28  ;;  %v11956_v39 = vand.u32 4294901760, %v8406_v46  ;;  %308 = vmatpush2.msra.mxu0 %v8416_v33  ;;  %v11955_v13 = vand.u32 4294901760, %v8420_v32 }
  0x6b   :  { %v663_v52 = vsub.f32 %v8385_v36, %v12426_v26  ;;  %12427 = vst [vmem:[#allocation96_spill] sm:$0xff] %v8426_v50  ;;  %v8434_v28 = vand.u32 4294901760, %v49_v49  ;;  %v8440_v21 = vsub.f32 %v50_v30, %v8426_v50  ;;  %745 = vmatprep.subr.mxu0 %v7652_v18  ;;  %v8456_v30 = vsub.f32 %v8308_v7, %v8339_v34 }
  0x6c   :  { %647 = vmatprep.subr.mxu1 %v646_v51  ;;  %v658_v38 = vand.u32 4294901760, %v657_v27  ;;  %v669_v26 = vsub.f32 %v8406_v46, %v11956_v39  ;;  %v8445_v27 = vsub.f32 %v8295_v53, %v8326_v37  ;;  %v675_v1 = vsub.f32 %v8420_v32, %v11955_v13  ;;  %727 = vmatprep.mubr.f32.mxu1 %v8426_v50 }
  0x6d   :  { %12428 = vst [vmem:[#allocation97_spill] sm:$0xff] %v8434_v28  ;;  %653 = vmatpush2.msra.mxu1 %v652_v19  ;;  %v664_v41 = vand.u32 4294901760, %v663_v52  ;;  %12429 = vst [vmem:[#allocation98_spill] sm:$0xff] %v8440_v21  ;;  %v11959_v51 = vand.u32 4294901760, %v8432_v20  ;;  %v8452_v19 = vsub.f32 %v49_v49, %v8434_v28  ;;  %v8460_v53 = vand.u32 4294901760, %v8440_v21 }
  0x6e   :  { %659 = vmatprep.subr.mxu1 %v658_v38  ;;  %12431 = vst [vmem:[#allocation100_spill] sm:$0xff] %v8456_v30  ;;  %v670_v52 = vand.u32 4294901760, %v669_v26  ;;  %v11964_v38 = vand.u32 4294901760, %v8445_v27  ;;  %v8465_v13 = vsub.f32 %v8317_v44, %v8351_v56  ;;  %v676_v39 = vand.u32 4294901760, %v675_v1 }
  0x6f   :  { %12430 = vst [vmem:[#allocation99_spill] sm:$0xff] %v8452_v19  ;;  %665 = vmatpush2.msra.mxu1 %v664_v41  ;;  %12432 = vst [vmem:[#allocation101_spill] sm:$0xff] %v8460_v53  ;;  %v681_v49 = vsub.f32 %v8432_v20, %v11959_v51  ;;  %v8471_v7 = vand.u32 4294901760, %v8452_v19  ;;  %v11971_v41 = vand.u32 4294901760, %v8456_v30  ;;  %v312_v26 = vsub.f32 %v8440_v21, %v8460_v53 }
  0x70   :  { %671 = vmatprep.subr.mxu1 %v670_v52  ;;  %v687_v50 = vsub.f32 %v8445_v27, %v11964_v38  ;;  %v8482_v1 = vsub.f32 %v8328_v24, %v8362_v29  ;;  %v8491_v53 = vsub.f32 %v8353_v62, %v8381_v14  ;;  %v12435_v34 = vand.u32 4294901760, %v8465_v13 }
  0x71   :  { %12433 = vst [vmem:[#allocation102_spill] sm:$0xff] %v8471_v7  ;;  %677 = vmatpush2.msra.mxu1 %v676_v39  ;;  %v682_v51 = vand.u32 4294901760, %v681_v49  ;;  %v318_v56 = vsub.f32 %v8452_v19, %v8471_v7  ;;  %v693_v52 = vsub.f32 %v8456_v30, %v11971_v41  ;;  %v8493_v38 = vand.u32 4294901760, %v312_v26 }
  0x72   :  { %v688_v44 = vand.u32 4294901760, %v687_v50  ;;  %v699_v24 = vsub.f32 %v8465_v13, %v12435_v34  ;;  %v11975_v39 = vand.u32 4294901760, %v8482_v1  ;;  %v11974_v29 = vand.u32 4294901760, %v8491_v53 }
  0x73   :  { %12434 = vst [vmem:[#allocation103_spill] sm:$0xff] %v8493_v38  ;;  %683 = vmatprep.subr.mxu1 %v682_v51  ;;  %v8499_v49 = vand.u32 4294901760, %v318_v56  ;;  %v694_v7 = vand.u32 4294901760, %v693_v52  ;;  %v8504_v41 = vsub.f32 %v8364_v12, %v8394_v2  ;;  %314 = vmatprep.mubr.f32.mxu0 %v8493_v38  ;;  %v8512_v62 = vsub.f32 %v8387_v61, %v8416_v33  ;;  %v12452_v38 = vld [vmem:[#allocation18_spill] sm:$0xff] }
  0x74   :  { %689 = vmatpush2.msra.mxu1 %v688_v44  ;;  %v700_v50 = vand.u32 4294901760, %v699_v24  ;;  %v705_v34 = vsub.f32 %v8482_v1, %v11975_v39  ;;  %v711_v56 = vsub.f32 %v8491_v53, %v11974_v29  ;;  %v12449_v29 = vld [vmem:[#allocation39_spill] sm:$0xff]  ;;  %v12450_v39 = vld [vmem:[#allocation17_spill] sm:$0xff] }
  0x75   :  { %12436 = vst [vmem:[#allocation104_spill] sm:$0xff] %v8499_v49  ;;  %12437 = vst [vmem:[#allocation105_spill] sm:$0xff] %v8504_v41  ;;  %320 = vmatmul.mubr.f32.vlgmr.msra.gmra.mxu0 %v8499_v49  ;;  %695 = vmatprep.subr.mxu1 %v694_v7  ;;  %v11973_v12 = vand.u32 4294901760, %v8504_v41  ;;  %v11972_v26 = vand.u32 4294901760, %v8512_v62  ;;  %v12451_v49 = vld [vmem:[#allocation41_spill] sm:$0xff] }
  0x76   :  { %748 = vmatpush1.msra.mxu0 %v7665_v23  ;;  %701 = vmatpush2.msra.mxu1 %v700_v50  ;;  %v706_v51 = vand.u32 4294901760, %v705_v34  ;;  %v712_v44 = vand.u32 4294901760, %v711_v56  ;;  %v12438_v50 = vld [vmem:[#allocation11_spill] sm:$0xff]  ;;  %v12439_v34 = vld [vmem:[#allocation29_spill] sm:$0xff]  ;;  %v12440_v56 = vld [vmem:[#allocation12_spill] sm:$0xff] }
  0x77   :  { %751 = vmatprep.subr.mxu0 %v7671_v25  ;;  %v717_v61 = vsub.f32 %v8504_v41, %v11973_v12  ;;  %v723_v7 = vsub.f32 %v8512_v62, %v11972_v26  ;;  %v12447_v26 = vld [vmem:[#allocation37_spill] sm:$0xff]  ;;  %v12448_v12 = vld [vmem:[#allocation16_spill] sm:$0xff] }
  0x78   :  { %754 = vmatpush1.msra.mxu0 %v7685_v31  ;;  %707 = vmatprep.subr.mxu1 %v706_v51  ;;  %v12441_v51 = vld [vmem:[#allocation31_spill] sm:$0xff] }
  0x79   :  { %757 = vmatprep.subr.mxu0 %v7694_v35  ;;  %713 = vmatpush2.msra.mxu1 %v712_v44  ;;  %v718_v52 = vand.u32 4294901760, %v717_v61  ;;  %v724_v24 = vand.u32 4294901760, %v723_v7  ;;  %v12442_v44 = vld [vmem:[#allocation13_spill] sm:$0xff]  ;;  %v12444_v7 = vld [vmem:[#allocation14_spill] sm:$0xff] }
  0x7a   :  { %760 = vmatpush1.msra.mxu0 %v7707_v40  ;;  %v12443_v61 = vld [vmem:[#allocation33_spill] sm:$0xff] }
  0x7b   :  { %719 = vmatprep.subr.mxu1 %v718_v52  ;;  %763 = vmatprep.subr.mxu0 %v7721_v45  ;;  %v12445_v52 = vld [vmem:[#allocation35_spill] sm:$0xff] }
  0x7c   :  { %725 = vmatpush2.msra.mxu1 %v724_v24  ;;  %766 = vmatpush1.msra.mxu0 %v7747_v59  ;;  %v12446_v24 = vld [vmem:[#allocation15_spill] sm:$0xff] }
  0x7d   :  { %729 = vmatmul.mubr.f32.vlgmr.msra.gmra.mxu1 %v8434_v28  ;;  %769 = vmatprep.subr.mxu0 %v7759_v0  ;;  %v12453_v28 = vld [vmem:[#allocation43_spill] sm:$0xff] }
  0x7e   :  { %957 = vmatprep.subr.mxu1 %v7632_v3  ;;  %772 = vmatpush1.msra.mxu0 %v7770_v8 }
  0x7f   :  { %959 = vmatpush1.msra.mxu1 %v7634_v4  ;;  %775 = vmatprep.subr.mxu0 %v7781_v42 }
  0x80   :  { %961 = vmatprep.subr.mxu1 %v7636_v5  ;;  %778 = vmatpush1.msra.mxu0 %v7793_v48 }
  0x81   :  { %963 = vmatpush1.msra.mxu1 %v7638_v9  ;;  %781 = vmatprep.subr.mxu0 %v7807_v57 }
  0x82   :  { %965 = vmatprep.subr.mxu1 %v7640_v10  ;;  %784 = vmatpush1.msra.mxu0 %v7819_v6 }
  0x83   :  { %967 = vmatpush1.msra.mxu1 %v7642_v11  ;;  %787 = vmatprep.subr.mxu0 %v7840_v54 }
  0x84   :  { %969 = vmatprep.subr.mxu1 %v7645_v15  ;;  %790 = vmatpush1.msra.mxu0 %v7853_v63 }
  0x85   :  { %971 = vmatpush1.msra.mxu1 %v7647_v16  ;;  %793 = vmatprep.subr.mxu0 %v7871_v55 }
  0x86   :  { %973 = vmatprep.subr.mxu1 %v7649_v17  ;;  %796 = vmatpush1.msra.mxu0 %v7884_v58 }
  0x87   :  { %975 = vmatpush1.msra.mxu1 %v7662_v22  ;;  %799 = vmatprep.subr.mxu0 %v7896_v60 }
  0x88   :  { %977 = vmatprep.subr.mxu1 %v12438_v50  ;;  %802 = vmatpush1.msra.mxu0 %v12439_v34 }
  0x89   :  { %979 = vmatpush1.msra.mxu1 %v12440_v56  ;;  %805 = vmatprep.subr.mxu0 %v12441_v51  ;;  %v12488_v51 = vld [vmem:[#allocation42_spill] sm:$0xff]  ;;  %v12509_v56 = vld [vmem:[#allocation60_spill] sm:$0xff] }
  0x8a   :  { %981 = vmatprep.subr.mxu1 %v12442_v44  ;;  %808 = vmatpush1.msra.mxu0 %v12443_v61  ;;  %v12454_v61 = vld [vmem:[#allocation19_spill] sm:$0xff] }
  0x8b   :  { %983 = vmatpush1.msra.mxu1 %v12444_v7  ;;  %811 = vmatprep.subr.mxu0 %v12445_v52  ;;  %v12455_v7 = vld [vmem:[#allocation45_spill] sm:$0xff]  ;;  %v12456_v52 = vld [vmem:[#allocation20_spill] sm:$0xff]  ;;  %v12487_v44 = vld [vmem:[#allocation75_spill] sm:$0xff] }
  0x8c   :  { %985 = vmatprep.subr.mxu1 %v12446_v24  ;;  %814 = vmatpush1.msra.mxu0 %v12447_v26  ;;  %v12457_v24 = vld [vmem:[#allocation47_spill] sm:$0xff]  ;;  %v12458_v26 = vld [vmem:[#allocation21_spill] sm:$0xff] }
  0x8d   :  { %987 = vmatpush1.msra.mxu1 %v12448_v12  ;;  %817 = vmatprep.subr.mxu0 %v12449_v29  ;;  %v12459_v12 = vld [vmem:[#allocation49_spill] sm:$0xff]  ;;  %v12460_v29 = vld [vmem:[#allocation22_spill] sm:$0xff] }
  0x8e   :  { %989 = vmatprep.subr.mxu1 %v12450_v39  ;;  %820 = vmatpush1.msra.mxu0 %v12451_v49  ;;  %v12461_v39 = vld [vmem:[#allocation51_spill] sm:$0xff] }
  0x8f   :  { %991 = vmatpush1.msra.mxu1 %v12452_v38  ;;  %823 = vmatprep.subr.mxu0 %v12453_v28  ;;  %v12462_v49 = vld [vmem:[#allocation23_spill] sm:$0xff]  ;;  %v12463_v38 = vld [vmem:[#allocation53_spill] sm:$0xff]  ;;  %v12464_v28 = vld [vmem:[#allocation24_spill] sm:$0xff] }
  0x90   :  { %993 = vmatprep.subr.mxu1 %v12454_v61  ;;  %826 = vmatpush1.msra.mxu0 %v12455_v7  ;;  %v12465_v61 = vld [vmem:[#allocation55_spill] sm:$0xff]  ;;  %v12466_v7 = vld [vmem:[#allocation25_spill] sm:$0xff] }
  0x91   :  { %995 = vmatpush1.msra.mxu1 %v12456_v52  ;;  %829 = vmatprep.subr.mxu0 %v12457_v24  ;;  %v12467_v52 = vld [vmem:[#allocation57_spill] sm:$0xff]  ;;  %v12468_v24 = vld [vmem:[#allocation26_spill] sm:$0xff] }
  0x92   :  { %997 = vmatprep.subr.mxu1 %v12458_v26  ;;  %832 = vmatpush1.msra.mxu0 %v12459_v12  ;;  %v12469_v26 = vld [vmem:[#allocation59_spill] sm:$0xff] }
  0x93   :  { %999 = vmatpush1.msra.mxu1 %v12460_v29  ;;  %835 = vmatprep.subr.mxu0 %v12461_v39  ;;  %v12470_v12 = vld [vmem:[#allocation27_spill] sm:$0xff]  ;;  %v12471_v29 = vld [vmem:[#allocation61_spill] sm:$0xff]  ;;  %v12472_v39 = vld [vmem:[#allocation28_spill] sm:$0xff] }
  0x94   :  { %1001 = vmatprep.subr.mxu1 %v12462_v49  ;;  %838 = vmatpush1.msra.mxu0 %v12463_v38  ;;  %v12473_v49 = vld [vmem:[#allocation63_spill] sm:$0xff] }
  0x95   :  { %1003 = vmatpush1.msra.mxu1 %v12464_v28  ;;  %841 = vmatprep.subr.mxu0 %v12465_v61  ;;  %v52_v61 = vld [vmem:[%s11768_s0 + $0x18] sm:$0xff]  ;;  %v12474_v28 = vld [vmem:[#allocation30_spill] sm:$0xff]  ;;  %v12482_v38 = vld [vmem:[#allocation71_spill] sm:$0xff] }
  0x96   :  { %1005 = vmatprep.subr.mxu1 %v12466_v7  ;;  %844 = vmatpush2.msra.mxu0 %v12467_v52  ;;  %v12475_v7 = vld [vmem:[#allocation65_spill] sm:$0xff]  ;;  %v12476_v52 = vld [vmem:[#allocation32_spill] sm:$0xff] }
  0x97   :  { %1007 = vmatpush1.msra.mxu1 %v12468_v24  ;;  %847 = vmatprep.subr.mxu0 %v12469_v26  ;;  %v12477_v24 = vld [vmem:[#allocation67_spill] sm:$0xff]  ;;  %v12481_v26 = vld [vmem:[#allocation36_spill] sm:$0xff] }
  0x98   :  { %1009 = vmatprep.subr.mxu1 %v12470_v12  ;;  %850 = vmatpush2.msra.mxu0 %v12471_v29  ;;  %v51_v29 = vld [vmem:[%s11768_s0 + $0x10] sm:$0xff]  ;;  %v12478_v12 = vld [vmem:[#allocation34_spill] sm:$0xff] }
  0x99   :  { %1011 = vmatpush1.msra.mxu1 %v12472_v39  ;;  %853 = vmatprep.subr.mxu0 %v12473_v49  ;;  %v12479_v39 = vld [vmem:[#allocation69_spill] sm:$0xff]  ;;  %v8603_v49 = vand.u32 4294901760, %v52_v61 }
  0x9a   :  { %1013 = vmatprep.subr.mxu1 %v12474_v28  ;;  %856 = vmatpush2.msra.mxu0 %v12475_v7  ;;  %v12483_v28 = vld [vmem:[#allocation38_spill] sm:$0xff]  ;;  %v12484_v7 = vld [vmem:[#allocation73_spill] sm:$0xff] }
  0x9b   :  { %1015 = vmatpush1.msra.mxu1 %v12476_v52  ;;  %859 = vmatprep.subr.mxu0 %v12477_v24  ;;  %12480 = vst [vmem:[#allocation11_spill] sm:$0xff] %v8603_v49  ;;  %v8609_v52 = vand.u32 4294901760, %v51_v29  ;;  %v12486_v24 = vld [vmem:[#allocation40_spill] sm:$0xff] }
  0x9c   :  { %1017 = vmatprep.subr.mxu1 %v12478_v12  ;;  %862 = vmatpush2.msra.mxu0 %v12479_v39  ;;  %v12489_v12 = vld [vmem:[#allocation77_spill] sm:$0xff]  ;;  %v8616_v39 = vsub.f32 %v52_v61, %v8603_v49 }
  0x9d   :  { %1019 = vmatpush1.msra.mxu1 %v12481_v26  ;;  %865 = vmatprep.subr.mxu0 %v12482_v38  ;;  %12485 = vst [vmem:[#allocation29_spill] sm:$0xff] %v8609_v52  ;;  %v12491_v26 = vld [vmem:[#allocation44_spill] sm:$0xff]  ;;  %v12492_v38 = vld [vmem:[#allocation79_spill] sm:$0xff] }
  0x9e   :  { %1021 = vmatprep.subr.mxu1 %v12483_v28  ;;  %868 = vmatpush2.msra.mxu0 %v12484_v7  ;;  %12490 = vst [vmem:[#allocation106_spill] sm:$0xff] %v8616_v39  ;;  %v12493_v28 = vld [vmem:[#allocation46_spill] sm:$0xff]  ;;  %v8623_v7 = vsub.f32 %v51_v29, %v8609_v52  ;;  %v8630_v61 = vand.u32 4294901760, %v8616_v39 }
  0x9f   :  { %1023 = vmatpush2.msra.mxu1 %v12486_v24  ;;  %871 = vmatprep.subr.mxu0 %v12487_v44  ;;  %v12495_v24 = vld [vmem:[#allocation48_spill] sm:$0xff]  ;;  %v12496_v44 = vld [vmem:[#allocation83_spill] sm:$0xff] }
  0xa0   :  { %1025 = vmatprep.subr.mxu1 %v12488_v51  ;;  %874 = vmatpush2.msra.mxu0 %v12489_v12  ;;  %12494 = vst [vmem:[#allocation107_spill] sm:$0xff] %v8623_v7  ;;  %v12497_v51 = vld [vmem:[#allocation50_spill] sm:$0xff]  ;;  %v12498_v12 = vld [vmem:[#allocation85_spill] sm:$0xff]  ;;  %12499 = vst [vmem:[#allocation108_spill] sm:$0xff] %v8630_v61  ;;  %v8637_v29 = vand.u32 4294901760, %v8623_v7 }
  0xa1   :  { %1027 = vmatpush2.msra.mxu1 %v12491_v26  ;;  %877 = vmatprep.subr.mxu0 %v12492_v38  ;;  %v12500_v26 = vld [vmem:[#allocation52_spill] sm:$0xff]  ;;  %v12501_v38 = vld [vmem:[#allocation86_spill] sm:$0xff] }
  0xa2   :  { %1029 = vmatprep.subr.mxu1 %v12493_v28  ;;  %880 = vmatpush2.msra.mxu0 %v8273_v47  ;;  %v12502_v28 = vld [vmem:[#allocation54_spill] sm:$0xff]  ;;  %v12503_v47 = vld [vmem:[#allocation87_spill] sm:$0xff]  ;;  %12504 = vst [vmem:[#allocation109_spill] sm:$0xff] %v8637_v29 }
  0xa3   :  { %1031 = vmatpush2.msra.mxu1 %v12495_v24  ;;  %883 = vmatprep.subr.mxu0 %v12496_v44  ;;  %v12505_v24 = vld [vmem:[#allocation56_spill] sm:$0xff]  ;;  %v12506_v44 = vld [vmem:[#allocation89_spill] sm:$0xff] }
  0xa4   :  { %1033 = vmatprep.subr.mxu1 %v12497_v51  ;;  %886 = vmatpush2.msra.mxu0 %v12498_v12  ;;  %v12507_v51 = vld [vmem:[#allocation58_spill] sm:$0xff]  ;;  %v12508_v12 = vld [vmem:[#allocation91_spill] sm:$0xff] }
  0xa5   :  { %1035 = vmatpush2.msra.mxu1 %v12500_v26  ;;  %889 = vmatprep.subr.mxu0 %v12501_v38  ;;  %v328_v26 = vsub.f32 %v8616_v39, %v8630_v61  ;;  %v12510_v38 = vld [vmem:[#allocation93_spill] sm:$0xff] }
  0xa6   :  { %1037 = vmatprep.subr.mxu1 %v12502_v28  ;;  %892 = vmatpush2.msra.mxu0 %v12503_v47  ;;  %v12511_v28 = vld [vmem:[#allocation62_spill] sm:$0xff]  ;;  %v12512_v47 = vld [vmem:[#allocation64_spill] sm:$0xff] }
  0xa7   :  { %1039 = vmatpush2.msra.mxu1 %v12505_v24  ;;  %895 = vmatprep.subr.mxu0 %v12506_v44  ;;  %v334_v24 = vsub.f32 %v8623_v7, %v8637_v29 }
  0xa8   :  { %1041 = vmatprep.subr.mxu1 %v12507_v51  ;;  %898 = vmatpush2.msra.mxu0 %v12508_v12  ;;  %v12513_v51 = vld [vmem:[#allocation66_spill] sm:$0xff]  ;;  %v8655_v12 = vand.u32 4294901760, %v328_v26  ;;  %v12520_v26 = vld [vmem:[#allocation76_spill] sm:$0xff] }
  0xa9   :  { %1043 = vmatpush2.msra.mxu1 %v12509_v56  ;;  %901 = vmatprep.subr.mxu0 %v12510_v38  ;;  %v12515_v56 = vld [vmem:[#allocation68_spill] sm:$0xff] }
  0xaa   :  { %1045 = vmatprep.subr.mxu1 %v12511_v28  ;;  %904 = vmatpush2.msra.mxu0 %v8385_v36  ;;  %12514 = vst [vmem:[#allocation89_spill] sm:$0xff] %v8655_v12  ;;  %v12516_v28 = vld [vmem:[#allocation70_spill] sm:$0xff]  ;;  %v8661_v36 = vand.u32 4294901760, %v334_v24  ;;  %v12518_v38 = vld [vmem:[#allocation72_spill] sm:$0xff] }
  0xab   :  { %1047 = vmatpush2.msra.mxu1 %v12512_v47  ;;  %907 = vmatprep.subr.mxu0 %v8406_v46  ;;  %v12519_v46 = vld [vmem:[#allocation74_spill] sm:$0xff]  ;;  %v12522_v24 = vld [vmem:[#allocation80_spill] sm:$0xff] }
  0xac   :  { %1049 = vmatprep.subr.mxu1 %v12513_v51  ;;  %910 = vmatpush2.msra.mxu0 %v8420_v32  ;;  %12517 = vst [vmem:[#allocation64_spill] sm:$0xff] %v8661_v36 }
  0xad   :  { %1051 = vmatpush2.msra.mxu1 %v12515_v56  ;;  %913 = vmatprep.subr.mxu0 %v8432_v20 }
  0xae   :  { %1053 = vmatprep.subr.mxu1 %v12516_v28  ;;  %916 = vmatpush2.msra.mxu0 %v8445_v27  ;;  %v12521_v28 = vld [vmem:[#allocation78_spill] sm:$0xff] }
  0xaf   :  { %1055 = vmatpush2.msra.mxu1 %v12518_v38  ;;  %919 = vmatprep.subr.mxu0 %v8456_v30  ;;  %v12523_v30 = vld [vmem:[#allocation82_spill] sm:$0xff] }
  0xb0   :  { %1057 = vmatprep.subr.mxu1 %v12519_v46  ;;  %330 = vmatprep.mubr.f32.mxu0 %v8655_v12  ;;  %v12524_v12 = vld [vmem:[#allocation84_spill] sm:$0xff] }
  0xb1   :  { %922 = vmatpush2.msra.mxu0 %v8465_v13  ;;  %1059 = vmatpush2.msra.mxu1 %v12520_v26 }
  0xb2   :  { %336 = vmatmul.mubr.f32.gmra.mxu0 %v8661_v36  ;;  %925 = vmatprep.subr.mxu0 %v8482_v1  ;;  %v12525_v36 = vand.u32 4294901760, %v7652_v18  ;;  %v12531_v18 = vld [vmem:[#allocation92_spill] sm:$0xff] }
  0xb3   :  { %1061 = vmatprep.subr.mxu1 %v12521_v28  ;;  %928 = vmatpush2.msra.mxu0 %v8491_v53 }
  0xb4   :  { %1063 = vmatpush2.msra.mxu1 %v12522_v24  ;;  %931 = vmatprep.subr.mxu0 %v8504_v41  ;;  %v12526_v41 = vand.u32 4294901760, %v7665_v23  ;;  %v12532_v23 = vand.u32 4294901760, %v7694_v35  ;;  %v12538_v35 = vand.u32 4294901760, %v7759_v0  ;;  %v12545_v0 = vand.u32 4294901760, %v7853_v63  ;;  %v12559_v63 = vld [vmem:[#allocation15_spill] sm:$0xff] }
  0xb5   :  { %1065 = vmatprep.subr.mxu1 %v12523_v30  ;;  %934 = vmatpush2.msra.mxu0 %v8512_v62 }
  0xb6   :  { %937 = vmatprep.mubr.f32.mxu0 %v8440_v21  ;;  %1067 = vmatpush2.msra.mxu1 %v12524_v12  ;;  %v12527_v21 = vand.u32 4294901760, %v7671_v25  ;;  %v12528_v12 = vld [vmem:[#allocation88_spill] sm:$0xff]  ;;  %v12533_v25 = vand.u32 4294901760, %v7707_v40  ;;  %v12539_v40 = vand.u32 4294901760, %v7770_v8 }
  0xb7   :  { %735 = vmatprep.mubr.f32.mxu1 %v8603_v49  ;;  %940 = vmatmul.mubr.f32.vlgmr.msra.gmra.mxu0 %v8452_v19  ;;  %v12529_v19 = vld [vmem:[#allocation90_spill] sm:$0xff]  ;;  %v12530_v49 = vand.u32 4294901760, %v7685_v31  ;;  %v12535_v31 = vld [vmem:[#allocation101_spill] sm:$0xff]  ;;  %v12550_v8 = vld [vmem:[#allocation12_spill] sm:$0xff] }
  0xb8   :  { %1069 = vmatprep.subr.mxu1 %v8315_v43  ;;  %1112 = vmatprep.subr.mxu0 %v12525_v36  ;;  %v12536_v36 = vand.u32 4294901760, %v7747_v59  ;;  %v12541_v59 = vand.u32 4294901760, %v7793_v48  ;;  %v12553_v48 = vld [vmem:[#allocation13_spill] sm:$0xff] }
  0xb9   :  { %737 = vmatmul.mubr.f32.gmra.mxu1 %v8609_v52  ;;  %1116 = vmatpush1.msra.mxu0 %v12526_v41  ;;  %v12537_v41 = vld [vmem:[#allocation102_spill] sm:$0xff] }
  0xba   :  { %1071 = vmatpush2.msra.mxu1 %v8326_v37  ;;  %1120 = vmatprep.subr.mxu0 %v12527_v21  ;;  %v12534_v21 = vand.u32 4294901760, %v7721_v45  ;;  %v12540_v45 = vand.u32 4294901760, %v7781_v42 }
  0xbb   :  { %1073 = vmatprep.subr.mxu1 %v12528_v12  ;;  %947 = vmatprep.mubr.f32.mxu0 %v8616_v39 }
  0xbc   :  { %1075 = vmatpush2.msra.mxu1 %v12529_v19  ;;  %1124 = vmatpush1.msra.mxu0 %v12530_v49  ;;  %v12563_v49 = vld [vmem:[#allocation39_spill] sm:$0xff] }
  0xbd   :  { %950 = vmatmul.mubr.f32.gmra.mxu0 %v8623_v7  ;;  %1077 = vmatprep.subr.mxu1 %v12531_v18 }
  0xbe   :  { %1128 = vmatprep.subr.mxu0 %v12532_v23  ;;  %1079 = vmatpush2.msra.mxu1 %v8381_v14  ;;  %v12566_v23 = vld [vmem:[#allocation41_spill] sm:$0xff] }
  0xbf   :  { %1132 = vmatpush1.msra.mxu0 %v12533_v25  ;;  %1081 = vmatprep.subr.mxu1 %v8394_v2  ;;  %v12567_v25 = vand.u32 4294901760, %v12566_v23  ;;  %v12598_v23 = vld [vmem:[#allocation28_spill] sm:$0xff] }
  0xc0   :  { %1136 = vmatprep.subr.mxu0 %v12534_v21  ;;  %1083 = vmatpush2.msra.mxu1 %v8416_v33  ;;  %v12568_v21 = vld [vmem:[#allocation18_spill] sm:$0xff] }
  0xc1   :  { %1087 = vmatprep.mubr.f32.mxu1 %v12535_v31  ;;  %1140 = vmatpush1.msra.mxu0 %v12536_v36  ;;  %v12569_v36 = vld [vmem:[#allocation43_spill] sm:$0xff] }
  0xc2   :  { %1091 = vmatmul.mubr.f32.vlgmr.msra.gmra.mxu1 %v12537_v41  ;;  %1144 = vmatprep.subr.mxu0 %v12538_v35  ;;  %v12570_v35 = vand.u32 4294901760, %v12569_v36  ;;  %v12601_v36 = vld [vmem:[#allocation30_spill] sm:$0xff]  ;;  %v12696_v41 = vld [vmem:[#allocation97_spill] sm:$0xff] }
  0xc3   :  { %1383 = vmatprep.subr.mxu1 %v7632_v3  ;;  %1148 = vmatpush1.msra.mxu0 %v12539_v40  ;;  %v12542_v3 = vand.u32 4294901760, %v7807_v57  ;;  %v12556_v57 = vld [vmem:[#allocation14_spill] sm:$0xff]  ;;  %v12571_v40 = vld [vmem:[#allocation19_spill] sm:$0xff] }
  0xc4   :  { %1385 = vmatpush1.msra.mxu1 %v7634_v4  ;;  %1152 = vmatprep.subr.mxu0 %v12540_v45  ;;  %v12543_v4 = vand.u32 4294901760, %v7819_v6  ;;  %v12560_v6 = vld [vmem:[#allocation37_spill] sm:$0xff] }
  0xc5   :  { %1387 = vmatprep.subr.mxu1 %v7636_v5  ;;  %1099 = vmatprep.mubr.f32.mxu1 %v8630_v61  ;;  %v12544_v5 = vand.u32 4294901760, %v7840_v54  ;;  %v12572_v45 = vld [vmem:[#allocation45_spill] sm:$0xff]  ;;  %v79_v61 = vld [vmem:[#allocation2 + $0xd0] sm:$0xff] }
  0xc6   :  { %1156 = vmatpush1.msra.mxu0 %v12541_v59  ;;  %1389 = vmatpush1.msra.mxu1 %v7638_v9  ;;  %v12546_v9 = vand.u32 4294901760, %v7871_v55  ;;  %v12561_v55 = vand.u32 4294901760, %v12560_v6  ;;  %v12573_v59 = vand.u32 4294901760, %v12572_v45  ;;  %v12592_v6 = vld [vmem:[#allocation26_spill] sm:$0xff]  ;;  %v12604_v45 = vld [vmem:[#allocation32_spill] sm:$0xff] }
  0xc7   :  { %1103 = vmatmul.mubr.f32.gmra.mxu1 %v8637_v29  ;;  %1160 = vmatprep.subr.mxu0 %v12542_v3  ;;  %v12574_v3 = vld [vmem:[#allocation20_spill] sm:$0xff] }
  0xc8   :  { %1391 = vmatprep.subr.mxu1 %v7640_v10  ;;  %1164 = vmatpush1.msra.mxu0 %v12543_v4  ;;  %v12547_v10 = vand.u32 4294901760, %v7884_v58  ;;  %v12562_v58 = vld [vmem:[#allocation16_spill] sm:$0xff]  ;;  %v12575_v4 = vld [vmem:[#allocation47_spill] sm:$0xff] }
  0xc9   :  { %1393 = vmatpush1.msra.mxu1 %v7642_v11  ;;  %1168 = vmatprep.subr.mxu0 %v12544_v5  ;;  %v12548_v11 = vand.u32 4294901760, %v7896_v60  ;;  %v12576_v5 = vand.u32 4294901760, %v12575_v4  ;;  %v12607_v4 = vld [vmem:[#allocation34_spill] sm:$0xff] }
  0xca   :  { %1395 = vmatprep.subr.mxu1 %v7645_v15  ;;  %1172 = vmatpush1.msra.mxu0 %v12545_v0  ;;  %v12549_v15 = vand.u32 4294901760, %v12439_v34  ;;  %v12565_v34 = vld [vmem:[#allocation17_spill] sm:$0xff] }
  0xcb   :  { %1397 = vmatpush1.msra.mxu1 %v7647_v16  ;;  %1176 = vmatprep.subr.mxu0 %v12546_v9  ;;  %v12551_v16 = vld [vmem:[#allocation31_spill] sm:$0xff]  ;;  %v12577_v0 = vld [vmem:[#allocation21_spill] sm:$0xff] }
  0xcc   :  { %1399 = vmatprep.subr.mxu1 %v7649_v17  ;;  %1180 = vmatpush1.msra.mxu0 %v12547_v10  ;;  %v12552_v42 = vand.u32 4294901760, %v12551_v16  ;;  %v12554_v17 = vld [vmem:[#allocation33_spill] sm:$0xff]  ;;  %v12583_v16 = vld [vmem:[#allocation23_spill] sm:$0xff] }
  0xcd   :  { %1401 = vmatpush1.msra.mxu1 %v7662_v22  ;;  %1184 = vmatprep.subr.mxu0 %v12548_v11  ;;  %v12555_v54 = vand.u32 4294901760, %v12554_v17  ;;  %v12557_v22 = vld [vmem:[#allocation35_spill] sm:$0xff]  ;;  %v12578_v9 = vld [vmem:[#allocation49_spill] sm:$0xff]  ;;  %v12580_v11 = vld [vmem:[#allocation22_spill] sm:$0xff] }
  0xce   :  { %1403 = vmatprep.subr.mxu1 %v12438_v50  ;;  %1188 = vmatpush1.msra.mxu0 %v12549_v15  ;;  %v12558_v60 = vand.u32 4294901760, %v12557_v22  ;;  %v12564_v50 = vand.u32 4294901760, %v12563_v49  ;;  %v12579_v10 = vand.u32 4294901760, %v12578_v9  ;;  %v12581_v15 = vld [vmem:[#allocation51_spill] sm:$0xff]  ;;  %v12586_v17 = vld [vmem:[#allocation24_spill] sm:$0xff]  ;;  %v12589_v22 = vld [vmem:[#allocation25_spill] sm:$0xff] }
  0xcf   :  { %1405 = vmatpush1.msra.mxu1 %v12550_v8  ;;  %1192 = vmatprep.subr.mxu0 %v12552_v42  ;;  %v12582_v8 = vand.u32 4294901760, %v12581_v15  ;;  %v12584_v42 = vld [vmem:[#allocation53_spill] sm:$0xff]  ;;  %v12595_v49 = vld [vmem:[#allocation27_spill] sm:$0xff]  ;;  %v12610_v9 = vld [vmem:[#allocation36_spill] sm:$0xff] }
  0xd0   :  { %1407 = vmatprep.subr.mxu1 %v12553_v48  ;;  %1196 = vmatpush1.msra.mxu0 %v12555_v54  ;;  %v12585_v48 = vand.u32 4294901760, %v12584_v42  ;;  %v12587_v54 = vld [vmem:[#allocation55_spill] sm:$0xff]  ;;  %v116_v15 = vld [vmem:[#allocation2 + $0x1f8] sm:$0xff] }
  0xd1   :  { %1409 = vmatpush1.msra.mxu1 %v12556_v57  ;;  %1200 = vmatprep.subr.mxu0 %v12558_v60  ;;  %v12588_v57 = vand.u32 4294901760, %v12587_v54  ;;  %v12590_v60 = vld [vmem:[#allocation57_spill] sm:$0xff]  ;;  %v12617_v54 = vld [vmem:[#allocation75_spill] sm:$0xff] }
  0xd2   :  { %1411 = vmatprep.subr.mxu1 %v12559_v63  ;;  %1204 = vmatpush1.msra.mxu0 %v12561_v55  ;;  %v12591_v63 = vand.u32 4294901760, %v12590_v60  ;;  %v12593_v55 = vld [vmem:[#allocation59_spill] sm:$0xff]  ;;  %v12620_v60 = vld [vmem:[#allocation77_spill] sm:$0xff] }
  0xd3   :  { %1413 = vmatpush1.msra.mxu1 %v12562_v58  ;;  %1208 = vmatprep.subr.mxu0 %v12564_v50  ;;  %v12594_v58 = vand.u32 4294901760, %v12593_v55  ;;  %v12596_v50 = vld [vmem:[#allocation61_spill] sm:$0xff] }
  0xd4   :  { %1415 = vmatprep.subr.mxu1 %v12565_v34  ;;  %1212 = vmatpush1.msra.mxu0 %v12567_v25  ;;  %v12597_v34 = vand.u32 4294901760, %v12596_v50  ;;  %v12599_v25 = vld [vmem:[#allocation63_spill] sm:$0xff]  ;;  %v112_v55 = vld [vmem:[#allocation2 + $0x1d8] sm:$0xff] }
  0xd5   :  { %1417 = vmatpush1.msra.mxu1 %v12568_v21  ;;  %1216 = vmatprep.subr.mxu0 %v12570_v35  ;;  %v12600_v21 = vand.u32 4294901760, %v12599_v25  ;;  %v12602_v35 = vld [vmem:[#allocation65_spill] sm:$0xff]  ;;  %v12627_v25 = vld [vmem:[#allocation46_spill] sm:$0xff] }
  0xd6   :  { %1419 = vmatprep.subr.mxu1 %v12571_v40  ;;  %1220 = vmatpush1.msra.mxu0 %v12573_v59  ;;  %v12603_v40 = vand.u32 4294901760, %v12602_v35  ;;  %v12605_v59 = vld [vmem:[#allocation67_spill] sm:$0xff]  ;;  %v12630_v35 = vld [vmem:[#allocation48_spill] sm:$0xff] }
  0xd7   :  { %1421 = vmatpush1.msra.mxu1 %v12574_v3  ;;  %1224 = vmatprep.subr.mxu0 %v12576_v5  ;;  %v12606_v3 = vand.u32 4294901760, %v12605_v59  ;;  %v12608_v5 = vld [vmem:[#allocation69_spill] sm:$0xff]  ;;  %v8832_v59 = vand.u32 4294901760, %v112_v55 }
  0xd8   :  { %1423 = vmatprep.subr.mxu1 %v12577_v0  ;;  %1228 = vmatpush1.msra.mxu0 %v12579_v10  ;;  %v12609_v0 = vand.u32 4294901760, %v12608_v5  ;;  %v12611_v10 = vld [vmem:[#allocation71_spill] sm:$0xff]  ;;  %v12634_v5 = vld [vmem:[#allocation50_spill] sm:$0xff] }
  0xd9   :  { %1425 = vmatpush1.msra.mxu1 %v12580_v11  ;;  %1232 = vmatprep.subr.mxu0 %v12582_v8  ;;  %v12612_v11 = vand.u32 4294901760, %v12611_v10  ;;  %v12613_v8 = vld [vmem:[#allocation38_spill] sm:$0xff]  ;;  %12633 = vst [vmem:[#allocation72_spill] sm:$0xff] %v8832_v59 }
  0xda   :  { %1427 = vmatprep.subr.mxu1 %v12583_v16  ;;  %1236 = vmatpush1.msra.mxu0 %v12585_v48  ;;  %v12614_v16 = vld [vmem:[#allocation73_spill] sm:$0xff]  ;;  %v115_v48 = vld [vmem:[#allocation2 + $0x1f0] sm:$0xff] }
  0xdb   :  { %1429 = vmatpush1.msra.mxu1 %v12586_v17  ;;  %1240 = vmatprep.subr.mxu0 %v12588_v57  ;;  %v12615_v42 = vand.u32 4294901760, %v12614_v16  ;;  %v12616_v17 = vld [vmem:[#allocation40_spill] sm:$0xff]  ;;  %v12618_v57 = vand.u32 4294901760, %v12617_v54  ;;  %v12639_v16 = vld [vmem:[#allocation86_spill] sm:$0xff]  ;;  %v104_v54 = vld [vmem:[#allocation2 + $0x198] sm:$0xff] }
  0xdc   :  { %1431 = vmatprep.subr.mxu1 %v12589_v22  ;;  %1244 = vmatpush2.msra.mxu0 %v12591_v63  ;;  %v12619_v22 = vld [vmem:[#allocation42_spill] sm:$0xff]  ;;  %v12621_v63 = vand.u32 4294901760, %v12620_v60 }
  0xdd   :  { %1433 = vmatpush1.msra.mxu1 %v12592_v6  ;;  %1248 = vmatprep.subr.mxu0 %v12594_v58  ;;  %v8819_v6 = vand.u32 4294901760, %v116_v15  ;;  %v12623_v58 = vld [vmem:[#allocation44_spill] sm:$0xff] }
  0xde   :  { %1435 = vmatprep.subr.mxu1 %v12595_v49  ;;  %1252 = vmatpush2.msra.mxu0 %v12597_v34  ;;  %v12624_v49 = vld [vmem:[#allocation79_spill] sm:$0xff]  ;;  %v8824_v34 = vand.u32 4294901760, %v115_v48 }
  0xdf   :  { %1437 = vmatpush1.msra.mxu1 %v12598_v23  ;;  %1256 = vmatprep.subr.mxu0 %v12600_v21  ;;  %12622 = vst [vmem:[#allocation66_spill] sm:$0xff] %v8819_v6  ;;  %v12625_v50 = vand.u32 4294901760, %v12624_v49  ;;  %v111_v23 = vld [vmem:[#allocation2 + $0x1d0] sm:$0xff]  ;;  %v12628_v21 = vld [vmem:[#allocation81_spill] sm:$0xff] }
  0xe0   :  { %1439 = vmatprep.subr.mxu1 %v12601_v36  ;;  %1260 = vmatpush2.msra.mxu0 %v12603_v40  ;;  %12626 = vst [vmem:[#allocation68_spill] sm:$0xff] %v8824_v34  ;;  %v12629_v36 = vand.u32 4294901760, %v12628_v21  ;;  %v12631_v40 = vld [vmem:[#allocation83_spill] sm:$0xff]  ;;  %v8837_v10 = vand.u32 4294901760, %v111_v23  ;;  %v12646_v49 = vld [vmem:[#allocation56_spill] sm:$0xff] }
  0xe1   :  { %1441 = vmatpush1.msra.mxu1 %v12604_v45  ;;  %1264 = vmatprep.subr.mxu0 %v12606_v3  ;;  %v12632_v45 = vand.u32 4294901760, %v12631_v40  ;;  %v108_v3 = vld [vmem:[#allocation2 + $0x1b8] sm:$0xff]  ;;  %v12649_v21 = vld [vmem:[#allocation91_spill] sm:$0xff]  ;;  %v8867_v40 = vand.u32 4294901760, %v104_v54 }
  0xe2   :  { %1443 = vmatprep.subr.mxu1 %v12607_v4  ;;  %1268 = vmatpush2.msra.mxu0 %v12609_v0  ;;  %v107_v4 = vld [vmem:[#allocation2 + $0x1b0] sm:$0xff]  ;;  %v12635_v0 = vld [vmem:[#allocation85_spill] sm:$0xff]  ;;  %12637 = vst [vmem:[#allocation74_spill] sm:$0xff] %v8837_v10 }
  0xe3   :  { %1445 = vmatpush1.msra.mxu1 %v12610_v9  ;;  %1272 = vmatprep.subr.mxu0 %v12612_v11  ;;  %v12636_v9 = vand.u32 4294901760, %v12635_v0  ;;  %v8840_v11 = vsub.f32 %v116_v15, %v8819_v6  ;;  %v103_v15 = vld [vmem:[#allocation2 + $0x190] sm:$0xff]  ;;  %12651 = vst [vmem:[#allocation80_spill] sm:$0xff] %v8867_v40 }
  0xe4   :  { %1447 = vmatprep.subr.mxu1 %v12613_v8  ;;  %1276 = vmatpush2.msra.mxu0 %v12615_v42  ;;  %v12638_v8 = vld [vmem:[#allocation52_spill] sm:$0xff]  ;;  %v12640_v42 = vand.u32 4294901760, %v12639_v16 }
  0xe5   :  { %1449 = vmatpush2.msra.mxu1 %v12616_v17  ;;  %1280 = vmatprep.subr.mxu0 %v12618_v57  ;;  %v8846_v17 = vsub.f32 %v115_v48, %v8824_v34  ;;  %v12641_v57 = vld [vmem:[#allocation54_spill] sm:$0xff]  ;;  %v99_v0 = vld [vmem:[#allocation2 + $0x170] sm:$0xff] }
  0xe6   :  { %1451 = vmatprep.subr.mxu1 %v12619_v22  ;;  %1284 = vmatpush2.msra.mxu0 %v12621_v63  ;;  %v12642_v22 = vld [vmem:[#allocation87_spill] sm:$0xff]  ;;  %v8851_v63 = vand.u32 4294901760, %v108_v3  ;;  %v12648_v48 = vld [vmem:[#allocation58_spill] sm:$0xff] }
  0xe7   :  { %1453 = vmatpush2.msra.mxu1 %v12623_v58  ;;  %1288 = vmatprep.subr.mxu0 %v12625_v50  ;;  %v12643_v60 = vand.u32 4294901760, %v12642_v22  ;;  %v8853_v58 = vand.u32 4294901760, %v107_v4  ;;  %v12647_v50 = vand.u32 4294901760, %v12506_v44  ;;  %v12653_v44 = vld [vmem:[#allocation93_spill] sm:$0xff]  ;;  %v11991_v16 = vand.u32 4294901760, %v8846_v17 }
  0xe8   :  { %1455 = vmatprep.subr.mxu1 %v12627_v25  ;;  %1292 = vmatpush2.msra.mxu0 %v12629_v36  ;;  %12644 = vst [vmem:[#allocation76_spill] sm:$0xff] %v8851_v63  ;;  %v8859_v25 = vsub.f32 %v112_v55, %v8832_v59  ;;  %v12650_v36 = vand.u32 4294901760, %v12649_v21  ;;  %v8873_v55 = vand.u32 4294901760, %v103_v15 }
  0xe9   :  { %1457 = vmatpush2.msra.mxu1 %v12630_v35  ;;  %1296 = vmatprep.subr.mxu0 %v12632_v45  ;;  %12645 = vst [vmem:[#allocation78_spill] sm:$0xff] %v8853_v58  ;;  %v8865_v35 = vsub.f32 %v111_v23, %v8837_v10  ;;  %v100_v45 = vld [vmem:[#allocation2 + $0x178] sm:$0xff]  ;;  %v8880_v22 = vsub.f32 %v107_v4, %v8853_v58  ;;  %v12663_v4 = vand.u32 4294901760, %v8420_v32 }
  0xea   :  { %1459 = vmatprep.subr.mxu1 %v12634_v5  ;;  %1300 = vmatpush2.msra.mxu0 %v12636_v9  ;;  %v11992_v5 = vand.u32 4294901760, %v8840_v11  ;;  %v12652_v9 = vld [vmem:[#allocation60_spill] sm:$0xff]  ;;  %12655 = vst [vmem:[#allocation82_spill] sm:$0xff] %v8873_v55  ;;  %v8888_v21 = vand.u32 4294901760, %v100_v45  ;;  %v8914_v32 = vsub.f32 %v8846_v17, %v11991_v16 }
  0xeb   :  { %1461 = vmatpush2.msra.mxu1 %v12638_v8  ;;  %1304 = vmatprep.subr.mxu0 %v12640_v42  ;;  %v12654_v8 = vand.u32 4294901760, %v12653_v44  ;;  %v12656_v42 = vld [vmem:[#allocation62_spill] sm:$0xff]  ;;  %v95_v44 = vld [vmem:[#allocation2 + $0x150] sm:$0xff] }
  0xec   :  { %1463 = vmatprep.subr.mxu1 %v12641_v57  ;;  %1308 = vmatpush2.msra.mxu0 %v12643_v60  ;;  %v12657_v57 = vld [vmem:[#allocation94_spill] sm:$0xff]  ;;  %v96_v60 = vld [vmem:[#allocation2 + $0x158] sm:$0xff]  ;;  %12661 = vst [vmem:[#allocation88_spill] sm:$0xff] %v8888_v21 }
  0xed   :  { %1465 = vmatpush2.msra.mxu1 %v12646_v49  ;;  %1312 = vmatprep.subr.mxu0 %v12647_v50  ;;  %v12658_v23 = vand.u32 4294901760, %v12657_v57  ;;  %v8883_v49 = vsub.f32 %v108_v3, %v8851_v63  ;;  %v12659_v50 = vld [vmem:[#allocation95_spill] sm:$0xff]  ;;  %v8899_v3 = vsub.f32 %v8840_v11, %v11992_v5  ;;  %v12664_v57 = vand.u32 4294901760, %v8432_v20 }
  0xee   :  { %1467 = vmatprep.subr.mxu1 %v12648_v48  ;;  %1316 = vmatpush2.msra.mxu0 %v12650_v36  ;;  %v12660_v48 = vand.u32 4294901760, %v12659_v50  ;;  %v8890_v36 = vand.u32 4294901760, %v99_v0  ;;  %v91_v50 = vld [vmem:[#allocation2 + $0x130] sm:$0xff]  ;;  %v8939_v20 = vsub.f32 %v100_v45, %v8888_v21  ;;  %v12677_v45 = vand.u32 4294901760, %v8482_v1 }
  0xef   :  { %1469 = vmatpush2.msra.mxu1 %v12652_v9  ;;  %1320 = vmatprep.subr.mxu0 %v12654_v8  ;;  %v11993_v9 = vand.u32 4294901760, %v8859_v25  ;;  %v92_v8 = vld [vmem:[#allocation2 + $0x138] sm:$0xff]  ;;  %v12681_v1 = vand.u32 4294901760, %v8883_v49 }
  0xf0   :  { %1471 = vmatprep.subr.mxu1 %v12656_v42  ;;  %1324 = vmatpush2.msra.mxu0 %v12658_v23  ;;  %12662 = vst [vmem:[#allocation90_spill] sm:$0xff] %v8890_v36  ;;  %v8903_v42 = vsub.f32 %v104_v54, %v8867_v40  ;;  %v8916_v23 = vand.u32 4294901760, %v96_v60  ;;  %v12668_v54 = vand.u32 4294901760, %v8445_v27  ;;  %v8929_v5 = vsub.f32 %v99_v0, %v8890_v36 }
  0xf1   :  { %1473 = vmatpush2.msra.mxu1 %v12512_v47  ;;  %1328 = vmatprep.subr.mxu0 %v12660_v48  ;;  %v11994_v47 = vand.u32 4294901760, %v8865_v35  ;;  %v12667_v48 = vld [vmem:[#allocation70_spill] sm:$0xff]  ;;  %v8934_v27 = vsub.f32 %v8859_v25, %v11993_v9  ;;  %12674 = vst [vmem:[#allocation14_spill] sm:$0xff] %v8939_v20  ;;  %v83_v9 = vld [vmem:[#allocation2 + $0xf0] sm:$0xff] }
  0xf2   :  { %1475 = vmatprep.subr.mxu1 %v12513_v51  ;;  %1332 = vmatpush2.msra.mxu0 %v12663_v4  ;;  %v8909_v51 = vsub.f32 %v103_v15, %v8873_v55  ;;  %12666 = vst [vmem:[#allocation12_spill] sm:$0xff] %v8916_v23  ;;  %v88_v4 = vld [vmem:[#allocation2 + $0x118] sm:$0xff]  ;;  %12672 = vst [vmem:[#allocation13_spill] sm:$0xff] %v8929_v5  ;;  %v8961_v15 = vsub.f32 %v96_v60, %v8916_v23 }
  0xf3   :  { %1477 = vmatpush2.msra.mxu1 %v12515_v56  ;;  %1336 = vmatprep.subr.mxu0 %v12664_v57  ;;  %v8921_v56 = vand.u32 4294901760, %v95_v44  ;;  %v12670_v57 = vld [vmem:[#allocation100_spill] sm:$0xff]  ;;  %v8948_v0 = vsub.f32 %v8865_v35, %v11994_v47  ;;  %v12679_v47 = vand.u32 4294901760, %v8491_v53 }
  0xf4   :  { %12665 = vst [vmem:[#allocation92_spill] sm:$0xff] %v8909_v51  ;;  %1479 = vmatprep.subr.mxu1 %v12667_v48  ;;  %1340 = vmatpush2.msra.mxu0 %v12668_v54  ;;  %v12671_v16 = vand.u32 4294901760, %v12670_v57  ;;  %v8936_v48 = vand.u32 4294901760, %v92_v8  ;;  %v87_v54 = vld [vmem:[#allocation2 + $0x110] sm:$0xff]  ;;  %v8950_v57 = vand.u32 4294901760, %v91_v50  ;;  %12678 = vst [vmem:[#allocation15_spill] sm:$0xff] %v8961_v15 }
  0xf5   :  { %12669 = vst [vmem:[#allocation31_spill] sm:$0xff] %v8921_v56  ;;  %1481 = vmatpush2.msra.mxu1 %v12518_v38  ;;  %v12675_v38 = vand.u32 4294901760, %v8465_v13  ;;  %v8957_v13 = vand.u32 4294901760, %v88_v4  ;;  %v8979_v60 = vand.u32 4294901760, %v87_v54 }
  0xf6   :  { %1344 = vmatprep.subr.mxu0 %v12671_v16  ;;  %12673 = vst [vmem:[#allocation33_spill] sm:$0xff] %v8936_v48  ;;  %1483 = vmatprep.subr.mxu1 %v12519_v46  ;;  %12676 = vst [vmem:[#allocation35_spill] sm:$0xff] %v8950_v57  ;;  %v84_v16 = vld [vmem:[#allocation2 + $0xf8] sm:$0xff]  ;;  %v12682_v46 = vand.u32 4294901760, %v8880_v22  ;;  %v8988_v29 = vsub.f32 %v92_v8, %v8936_v48  ;;  %v12691_v8 = vld [vmem:[#allocation96_spill] sm:$0xff] }
  0xf7   :  { %1348 = vmatpush2.msra.mxu0 %v12675_v38  ;;  %1485 = vmatpush2.msra.mxu1 %v12520_v26  ;;  %v8967_v26 = vsub.f32 %v95_v44, %v8921_v56  ;;  %12683 = vst [vmem:[#allocation16_spill] sm:$0xff] %v8979_v60  ;;  %v9002_v44 = vand.u32 4294901760, %v84_v16  ;;  %v9022_v7 = vsub.f32 %v87_v54, %v8979_v60  ;;  %v76_v54 = vld [vmem:[#allocation2 + $0xb8] sm:$0xff] }
  0xf8   :  { %1352 = vmatprep.subr.mxu0 %v12677_v45  ;;  %1487 = vmatprep.subr.mxu1 %v12521_v28  ;;  %v8972_v45 = vsub.f32 %v8883_v49, %v12681_v1  ;;  %v8977_v38 = vsub.f32 %v8880_v22, %v12682_v46  ;;  %v12684_v28 = vld [vmem:[#allocation105_spill] sm:$0xff]  ;;  %12686 = vst [vmem:[#allocation39_spill] sm:$0xff] %v8988_v29  ;;  %v12687_v46 = vand.u32 4294901760, %v8512_v62  ;;  %v9068_v39 = vand.u32 4294901760, %v76_v54 }
  0xf9   :  { %1356 = vmatpush2.msra.mxu0 %v12679_v47  ;;  %12680 = vst [vmem:[#allocation37_spill] sm:$0xff] %v8967_v26  ;;  %1489 = vmatpush2.msra.mxu1 %v12522_v24  ;;  %v12685_v53 = vand.u32 4294901760, %v12684_v28  ;;  %v8995_v24 = vsub.f32 %v91_v50, %v8950_v57  ;;  %v12689_v28 = vand.u32 4294901760, %v8903_v42  ;;  %12690 = vst [vmem:[#allocation41_spill] sm:$0xff] %v9002_v44  ;;  %v80_v1 = vld [vmem:[#allocation2 + $0xd8] sm:$0xff]  ;;  %v12692_v47 = vld [vmem:[#allocation84_spill] sm:$0xff] }
  0xfa   :  { %1491 = vmatprep.subr.mxu1 %v12523_v30  ;;  %1366 = vmatprep.mubr.f32.mxu0 %v12691_v8  ;;  %v12693_v30 = vand.u32 4294901760, %v8909_v51  ;;  %12697 = vst [vmem:[#allocation19_spill] sm:$0xff] %v9022_v7  ;;  %12707 = vst [vmem:[#allocation49_spill] sm:$0xff] %v9068_v39 }
  0xfb   :  { %1360 = vmatprep.subr.mxu0 %v12685_v53  ;;  %12688 = vst [vmem:[#allocation17_spill] sm:$0xff] %v8995_v24  ;;  %v9000_v53 = vsub.f32 %v8903_v42, %v12689_v28  ;;  %1493 = vmatpush2.msra.mxu1 %v12692_v47  ;;  %v9015_v28 = vsub.f32 %v88_v4, %v8957_v13  ;;  %v12698_v4 = vand.u32 4294901760, %v8939_v20  ;;  %v9037_v47 = vand.u32 4294901760, %v80_v1 }
  0xfc   :  { %1364 = vmatpush2.msra.mxu0 %v12687_v46  ;;  %v9009_v62 = vsub.f32 %v8909_v51, %v12693_v30  ;;  %v9011_v46 = vand.u32 4294901760, %v83_v9  ;;  %1495 = vmatprep.subr.mxu1 %v8315_v43  ;;  %v12699_v43 = vand.u32 4294901760, %v8929_v5  ;;  %v75_v30 = vld [vmem:[#allocation2 + $0xb0] sm:$0xff]  ;;  %v72_v51 = vld [vmem:[#allocation2 + $0x98] sm:$0xff] }
  0xfd   :  { %12695 = vst [vmem:[#allocation43_spill] sm:$0xff] %v9015_v28  ;;  %1368 = vmatmul.mubr.f32.vlgmr.msra.gmra.mxu0 %v12696_v41  ;;  %1528 = vmatprep.subr.mxu0 %v8819_v6  ;;  %v9030_v50 = vsub.f32 %v8939_v20, %v12698_v4  ;;  %12700 = vst [vmem:[#allocation45_spill] sm:$0xff] %v9037_v47  ;;  %v9043_v6 = vand.u32 4294901760, %v79_v61  ;;  %v9047_v20 = vsub.f32 %v84_v16, %v9002_v44  ;;  %v71_v4 = vld [vmem:[#allocation2 + $0x90] sm:$0xff] }
  0xfe   :  { %12694 = vst [vmem:[#allocation18_spill] sm:$0xff] %v9011_v46  ;;  %1497 = vmatpush2.msra.mxu1 %v8326_v37  ;;  %v9035_v31 = vsub.f32 %v8929_v5, %v12699_v43  ;;  %1530 = vmatpush1.msra.mxu0 %v8824_v34  ;;  %v12703_v43 = vld [vmem:[#allocation11_spill] sm:$0xff]  ;;  %v9053_v5 = vsub.f32 %v83_v9, %v9011_v46  ;;  %v12706_v16 = vand.u32 4294901760, %v8967_v26  ;;  %v9070_v9 = vand.u32 4294901760, %v75_v30 }
  0xff   :  { %1499 = vmatprep.subr.mxu1 %v12528_v12  ;;  %12701 = vst [vmem:[#allocation20_spill] sm:$0xff] %v9043_v6  ;;  %12702 = vst [vmem:[#allocation47_spill] sm:$0xff] %v9047_v20  ;;  %1532 = vmatprep.subr.mxu0 %v8832_v59  ;;  %v12705_v12 = vand.u32 4294901760, %v8961_v15  ;;  %v9095_v34 = vand.u32 4294901760, %v71_v4 }
 0x100   :  { %1374 = vmatprep.mubr.f32.mxu0 %v12703_v43  ;;  %12704 = vst [vmem:[#allocation21_spill] sm:$0xff] %v9053_v5  ;;  %1501 = vmatpush2.msra.mxu1 %v12529_v19  ;;  %v9066_v59 = vsub.f32 %v8967_v26, %v12706_v16  ;;  %12708 = vst [vmem:[#allocation22_spill] sm:$0xff] %v9070_v9  ;;  %v9083_v26 = vsub.f32 %v80_v1, %v9037_v47  ;;  %v9101_v1 = vand.u32 4294901760, %v72_v51 }
 0x101   :  { %v9058_v37 = vsub.f32 %v8961_v15, %v12705_v12  ;;  %1534 = vmatpush1.msra.mxu0 %v8837_v10  ;;  %1503 = vmatprep.subr.mxu1 %v12531_v18  ;;  %v12709_v10 = vand.u32 4294901760, %v8988_v29  ;;  %v9088_v12 = vsub.f32 %v79_v61, %v9043_v6  ;;  %v12712_v18 = vand.u32 4294901760, %v8995_v24  ;;  %12713 = vst [vmem:[#allocation53_spill] sm:$0xff] %v9095_v34  ;;  %v68_v15 = vld [vmem:[#allocation2 + $0x78] sm:$0xff] }
 0x102   :  { %1376 = vmatmul.mubr.f32.gmra.mxu0 %v8609_v52  ;;  %12710 = vst [vmem:[#allocation51_spill] sm:$0xff] %v9083_v26  ;;  %1536 = vmatprep.subr.mxu0 %v8851_v63  ;;  %12714 = vst [vmem:[#allocation24_spill] sm:$0xff] %v9101_v1  ;;  %v12715_v61 = vand.u32 4294901760, %v9015_v28 }
 0x103   :  { %v9080_v16 = vsub.f32 %v8988_v29, %v12709_v10  ;;  %1505 = vmatpush2.msra.mxu1 %v8381_v14  ;;  %12711 = vst [vmem:[#allocation23_spill] sm:$0xff] %v9088_v12  ;;  %v9093_v19 = vsub.f32 %v8995_v24, %v12712_v18  ;;  %v67_v29 = vld [vmem:[#allocation2 + $0x70] sm:$0xff]  ;;  %1538 = vmatpush1.msra.mxu0 %v8853_v58  ;;  %v9126_v18 = vand.u32 4294901760, %v68_v15 }
 0x104   :  { %1507 = vmatprep.subr.mxu1 %v8394_v2  ;;  %v9106_v63 = vsub.f32 %v9015_v28, %v12715_v61  ;;  %1540 = vmatprep.subr.mxu0 %v8867_v40  ;;  %v9113_v58 = vsub.f32 %v75_v30, %v9070_v9  ;;  %v12717_v2 = vand.u32 4294901760, %v9022_v7  ;;  %v63_v24 = vld [vmem:[#allocation2 + $0x50] sm:$0xff]  ;;  %v9121_v61 = vsub.f32 %v76_v54, %v9068_v39  ;;  %v64_v30 = vld [vmem:[#allocation2 + $0x58] sm:$0xff] }
 0x105   :  { %1509 = vmatpush2.msra.mxu1 %v8416_v33  ;;  %1511 = vmatprep.mubr.f32.mxu1 %v12691_v8  ;;  %12719 = vst [vmem:[#allocation57_spill] sm:$0xff] %v9126_v18  ;;  %v9128_v10 = vand.u32 4294901760, %v67_v29  ;;  %v60_v28 = vld [vmem:[#allocation2 + $0x38] sm:$0xff]  ;;  %v12723_v8 = vand.u32 4294901760, %v8899_v3  ;;  %v12724_v54 = vand.u32 4294901760, %v9053_v5  ;;  %v9179_v40 = vsub.f32 %v68_v15, %v9126_v18 }
 0x106   :  { %12716 = vst [vmem:[#allocation55_spill] sm:$0xff] %v9113_v58  ;;  %v9118_v14 = vsub.f32 %v9022_v7, %v12717_v2  ;;  %12718 = vst [vmem:[#allocation25_spill] sm:$0xff] %v9121_v61  ;;  %1542 = vmatpush1.msra.mxu0 %v8873_v55  ;;  %1513 = vmatmul.mubr.f32.vlgmr.msra.gmra.mxu1 %v12696_v41  ;;  %v9135_v2 = vsub.f32 %v71_v4, %v9095_v34  ;;  %v12722_v55 = vand.u32 4294901760, %v9047_v20  ;;  %v59_v41 = vld [vmem:[#allocation2 + $0x30] sm:$0xff] }
 0x107   :  { %12720 = vst [vmem:[#allocation26_spill] sm:$0xff] %v9128_v10  ;;  %1544 = vmatprep.subr.mxu0 %v8888_v21  ;;  %1693 = vmatprep.subr.mxu1 %v12723_v8  ;;  %v9150_v4 = vsub.f32 %v9053_v5, %v12724_v54  ;;  %v9152_v21 = vand.u32 4294901760, %v63_v24  ;;  %v12727_v7 = vand.u32 4294901760, %v8914_v32  ;;  %v9161_v8 = vand.u32 4294901760, %v64_v30  ;;  %12733 = vst [vmem:[#allocation65_spill] sm:$0xff] %v9179_v40 }
 0x108   :  { %12721 = vst [vmem:[#allocation59_spill] sm:$0xff] %v9135_v2  ;;  %v9140_v33 = vsub.f32 %v9047_v20, %v12722_v55  ;;  %1546 = vmatpush1.msra.mxu0 %v8890_v36  ;;  %v9155_v55 = vsub.f32 %v72_v51, %v9101_v1  ;;  %v55_v36 = vld [vmem:[#allocation2 + $0x10] sm:$0xff]  ;;  %v12729_v5 = vand.u32 4294901760, %v8934_v27  ;;  %1519 = vmatprep.mubr.f32.mxu1 %v12703_v43  ;;  %v9176_v3 = vand.u32 4294901760, %v60_v28 }
 0x109   :  { %12725 = vst [vmem:[#allocation27_spill] sm:$0xff] %v9152_v21  ;;  %1699 = vmatpush1.msra.mxu1 %v12727_v7  ;;  %1548 = vmatprep.subr.mxu0 %v8916_v23  ;;  %12728 = vst [vmem:[#allocation28_spill] sm:$0xff] %v9161_v8  ;;  %v9169_v51 = vsub.f32 %v67_v29, %v9128_v10  ;;  %v12731_v7 = vand.u32 4294901760, %v9083_v26  ;;  %v56_v23 = vld [vmem:[#allocation2 + $0x18] sm:$0xff]  ;;  %v12735_v29 = vand.u32 4294901760, %v9088_v12  ;;  %v9200_v27 = vand.u32 4294901760, %v55_v36 }
 0x10a   :  { %12726 = vst [vmem:[#allocation61_spill] sm:$0xff] %v9155_v55  ;;  %1705 = vmatprep.subr.mxu1 %v12729_v5  ;;  %12732 = vst [vmem:[#allocation30_spill] sm:$0xff] %v9176_v3  ;;  %1550 = vmatpush1.msra.mxu0 %v8921_v56  ;;  %v12734_v5 = vand.u32 4294901760, %v8948_v0  ;;  %v9197_v0 = vsub.f32 %v63_v24, %v9152_v21  ;;  %v179_v56 = vld [vmem:[#allocation2 + $0x3f0] sm:$0xff]  ;;  %v12740_v43 = vand.u32 4294901760, %v9121_v61  ;;  %v12741_v15 = vand.u32 4294901760, %v9113_v58 }
 0x10b   :  { %12730 = vst [vmem:[#allocation63_spill] sm:$0xff] %v9169_v51  ;;  %v9174_v32 = vsub.f32 %v9083_v26, %v12731_v7  ;;  %v9188_v54 = vsub.f32 %v9088_v12, %v12735_v29  ;;  %v9190_v7 = vand.u32 4294901760, %v59_v41  ;;  %1521 = vmatmul.mubr.f32.gmra.mxu1 %v8609_v52  ;;  %1552 = vmatprep.subr.mxu0 %v8936_v48  ;;  %12738 = vst [vmem:[#allocation34_spill] sm:$0xff] %v9200_v27 }
 0x10c   :  { %1711 = vmatpush1.msra.mxu1 %v12734_v5  ;;  %12737 = vst [vmem:[#allocation67_spill] sm:$0xff] %v9197_v0  ;;  %v12739_v29 = vand.u32 4294901760, %v8972_v45  ;;  %1554 = vmatpush1.msra.mxu0 %v8950_v57  ;;  %v9208_v52 = vsub.f32 %v9121_v61, %v12740_v43  ;;  %v9213_v24 = vsub.f32 %v9113_v58, %v12741_v15  ;;  %v9215_v48 = vand.u32 4294901760, %v56_v23  ;;  %v180_v5 = vld [vmem:[#allocation2 + $0x3f8] sm:$0xff]  ;;  %v175_v61 = vld [vmem:[#allocation2 + $0x3d0] sm:$0xff] }
 0x10d   :  { %12736 = vst [vmem:[#allocation32_spill] sm:$0xff] %v9190_v7  ;;  %v9218_v12 = vsub.f32 %v64_v30, %v9161_v8  ;;  %v12744_v45 = vand.u32 4294901760, %v8977_v38  ;;  %1556 = vmatprep.subr.mxu0 %v8957_v13  ;;  %v9227_v15 = vsub.f32 %v60_v28, %v9176_v3  ;;  %v12746_v58 = vand.u32 4294901760, %v9000_v53  ;;  %v176_v43 = vld [vmem:[#allocation2 + $0x3d8] sm:$0xff] }
 0x10e   :  { %1717 = vmatprep.subr.mxu1 %v12739_v29  ;;  %12742 = vst [vmem:[#allocation69_spill] sm:$0xff] %v9215_v48  ;;  %1558 = vmatpush1.msra.mxu0 %v8979_v60  ;;  %v9234_v30 = vsub.f32 %v59_v41, %v9190_v7  ;;  %v9241_v57 = vand.u32 4294901760, %v179_v56  ;;  %v12750_v28 = vand.u32 4294901760, %v9009_v62  ;;  %v9252_v41 = vsub.f32 %v55_v36, %v9200_v27 }
 0x10f   :  { %12743 = vst [vmem:[#allocation36_spill] sm:$0xff] %v9218_v12  ;;  %1723 = vmatpush1.msra.mxu1 %v12744_v45  ;;  %12745 = vst [vmem:[#allocation71_spill] sm:$0xff] %v9227_v15  ;;  %v12748_v45 = vand.u32 4294901760, %v9135_v2  ;;  %1560 = vmatprep.subr.mxu0 %v9002_v44  ;;  %v9254_v38 = vand.u32 4294901760, %v180_v5  ;;  %v12754_v60 = vand.u32 4294901760, %v9030_v50  ;;  %v12756_v36 = vand.u32 4294901760, %v9035_v31 }
 0x110   :  { %1729 = vmatprep.subr.mxu1 %v12746_v58  ;;  %12747 = vst [vmem:[#allocation38_spill] sm:$0xff] %v9234_v30  ;;  %12749 = vst [vmem:[#allocation73_spill] sm:$0xff] %v9241_v57  ;;  %v12751_v58 = vand.u32 4294901760, %v9155_v55  ;;  %1562 = vmatpush1.msra.mxu0 %v9011_v46  ;;  %v12758_v50 = vand.u32 4294901760, %v9169_v51  ;;  %v172_v44 = vld [vmem:[#allocation2 + $0x3b8] sm:$0xff]  ;;  %v12760_v31 = vand.u32 4294901760, %v9058_v37 }
 0x111   :  { %v9239_v29 = vsub.f32 %v9135_v2, %v12748_v45  ;;  %1735 = vmatpush1.msra.mxu1 %v12750_v28  ;;  %12752 = vst [vmem:[#allocation40_spill] sm:$0xff] %v9252_v41  ;;  %12753 = vst [vmem:[#allocation75_spill] sm:$0xff] %v9254_v38  ;;  %v171_v2 = vld [vmem:[#allocation2 + $0x3b0] sm:$0xff]  ;;  %1564 = vmatprep.subr.mxu0 %v9037_v47  ;;  %v12757_v45 = vand.u32 4294901760, %v9179_v40  ;;  %v9278_v28 = vand.u32 4294901760, %v176_v43  ;;  %v168_v46 = vld [vmem:[#allocation2 + $0x398] sm:$0xff] }
 0x112   :  { %v9249_v53 = vsub.f32 %v9155_v55, %v12751_v58  ;;  %1741 = vmatprep.subr.mxu1 %v12754_v60  ;;  %v9263_v58 = vand.u32 4294901760, %v175_v61  ;;  %v9276_v62 = vsub.f32 %v9169_v51, %v12758_v50  ;;  %1566 = vmatpush1.msra.mxu0 %v9043_v6  ;;  %v9290_v50 = vsub.f32 %v56_v23, %v9215_v48  ;;  %v167_v51 = vld [vmem:[#allocation2 + $0x390] sm:$0xff] }
 0x113   :  { %1747 = vmatpush1.msra.mxu1 %v12756_v36  ;;  %v9271_v60 = vsub.f32 %v9179_v40, %v12757_v45  ;;  %12759 = vst [vmem:[#allocation77_spill] sm:$0xff] %v9278_v28  ;;  %v9286_v45 = vsub.f32 %v179_v56, %v9241_v57  ;;  %v12763_v40 = vand.u32 4294901760, %v9066_v59  ;;  %1568 = vmatprep.subr.mxu0 %v9068_v39  ;;  %v9301_v56 = vand.u32 4294901760, %v171_v2  ;;  %v163_v6 = vld [vmem:[#allocation2 + $0x370] sm:$0xff]  ;;  %v164_v39 = vld [vmem:[#allocation2 + $0x378] sm:$0xff] }
 0x114   :  { %12755 = vst [vmem:[#allocation42_spill] sm:$0xff] %v9263_v58  ;;  %1753 = vmatprep.subr.mxu1 %v12760_v31  ;;  %12762 = vst [vmem:[#allocation79_spill] sm:$0xff] %v9290_v50  ;;  %v12764_v31 = vand.u32 4294901760, %v9197_v0  ;;  %v9304_v47 = vsub.f32 %v180_v5, %v9254_v38  ;;  %v12767_v23 = vand.u32 4294901760, %v9080_v16  ;;  %1570 = vmatpush1.msra.mxu0 %v9070_v9  ;;  %v12768_v59 = vand.u32 4294901760, %v9218_v12 }
 0x115   :  { %12761 = vst [vmem:[#allocation44_spill] sm:$0xff] %v9286_v45  ;;  %1759 = vmatpush1.msra.mxu1 %v12763_v40  ;;  %12765 = vst [vmem:[#allocation46_spill] sm:$0xff] %v9301_v56  ;;  %v9315_v37 = vsub.f32 %v175_v61, %v9263_v58  ;;  %v12771_v5 = vand.u32 4294901760, %v9093_v19  ;;  %1572 = vmatprep.subr.mxu0 %v9101_v1  ;;  %v12772_v9 = vand.u32 4294901760, %v9227_v15  ;;  %v9330_v61 = vand.u32 4294901760, %v167_v51 }
 0x116   :  { %v9299_v36 = vsub.f32 %v9197_v0, %v12764_v31  ;;  %12766 = vst [vmem:[#allocation81_spill] sm:$0xff] %v9304_v47  ;;  %1765 = vmatprep.subr.mxu1 %v12767_v23  ;;  %v9312_v40 = vsub.f32 %v9218_v12, %v12768_v59  ;;  %v9317_v31 = vand.u32 4294901760, %v172_v44  ;;  %v12774_v0 = vand.u32 4294901760, %v9106_v63  ;;  %1574 = vmatpush1.msra.mxu0 %v9095_v34 }
 0x117   :  { %12769 = vst [vmem:[#allocation48_spill] sm:$0xff] %v9315_v37  ;;  %1771 = vmatpush1.msra.mxu1 %v12771_v5  ;;  %v9328_v59 = vsub.f32 %v9227_v15, %v12772_v9  ;;  %12773 = vst [vmem:[#allocation50_spill] sm:$0xff] %v9330_v61  ;;  %v12775_v19 = vand.u32 4294901760, %v9234_v30  ;;  %v9340_v16 = vand.u32 4294901760, %v168_v46  ;;  %v9344_v9 = vsub.f32 %v176_v43, %v9278_v28 }
 0x118   :  { %12770 = vst [vmem:[#allocation83_spill] sm:$0xff] %v9317_v31  ;;  %1777 = vmatprep.subr.mxu1 %v12774_v0  ;;  %v12778_v1 = vand.u32 4294901760, %v9118_v14  ;;  %1576 = vmatprep.subr.mxu0 %v9126_v18  ;;  %v9351_v0 = vsub.f32 %v171_v2, %v9301_v56  ;;  %v12780_v23 = vand.u32 4294901760, %v9140_v33  ;;  %v9364_v63 = vand.u32 4294901760, %v163_v6  ;;  %v160_v2 = vld [vmem:[#allocation2 + $0x358] sm:$0xff]  ;;  %v155_v18 = vld [vmem:[#allocation2 + $0x330] sm:$0xff] }
 0x119   :  { %v9338_v5 = vsub.f32 %v9234_v30, %v12775_v19  ;;  %12776 = vst [vmem:[#allocation85_spill] sm:$0xff] %v9340_v16  ;;  %12777 = vst [vmem:[#allocation52_spill] sm:$0xff] %v9344_v9  ;;  %v159_v30 = vld [vmem:[#allocation2 + $0x350] sm:$0xff]  ;;  %1578 = vmatpush1.msra.mxu0 %v9128_v10  ;;  %v9367_v19 = vsub.f32 %v172_v44, %v9317_v31  ;;  %v12784_v34 = vand.u32 4294901760, %v9150_v4  ;;  %v9376_v14 = vand.u32 4294901760, %v164_v39 }
 0x11a   :  { %1783 = vmatpush1.msra.mxu1 %v12778_v1  ;;  %12779 = vst [vmem:[#allocation86_spill] sm:$0xff] %v9351_v0  ;;  %v12781_v1 = vand.u32 4294901760, %v9252_v41  ;;  %12782 = vst [vmem:[#allocation54_spill] sm:$0xff] %v9364_v63  ;;  %1580 = vmatprep.subr.mxu0 %v9161_v8  ;;  %v12787_v10 = vand.u32 4294901760, %v9174_v32  ;;  %v156_v8 = vld [vmem:[#allocation2 + $0x338] sm:$0xff]  ;;  %v12792_v44 = vand.u32 4294901760, %v9286_v45 }
 0x11b   :  { %1789 = vmatprep.subr.mxu1 %v12780_v23  ;;  %12783 = vst [vmem:[#allocation87_spill] sm:$0xff] %v9367_v19  ;;  %v9374_v23 = vsub.f32 %v167_v51, %v9330_v61  ;;  %12786 = vst [vmem:[#allocation58_spill] sm:$0xff] %v9376_v14  ;;  %1582 = vmatpush1.msra.mxu0 %v9152_v21  ;;  %v9389_v51 = vand.u32 4294901760, %v159_v30  ;;  %v9404_v33 = vand.u32 4294901760, %v160_v2 }
 0x11c   :  { %v9362_v43 = vsub.f32 %v9252_v41, %v12781_v1  ;;  %1795 = vmatpush1.msra.mxu1 %v12784_v34  ;;  %v12788_v34 = vand.u32 4294901760, %v9290_v50  ;;  %v12790_v1 = vand.u32 4294901760, %v9188_v54  ;;  %1584 = vmatprep.subr.mxu0 %v9176_v3  ;;  %v9407_v21 = vsub.f32 %v168_v46, %v9340_v16 }
 0x11d   :  { %12785 = vst [vmem:[#allocation56_spill] sm:$0xff] %v9374_v23  ;;  %1801 = vmatprep.subr.mxu1 %v12787_v10  ;;  %12789 = vst [vmem:[#allocation91_spill] sm:$0xff] %v9389_v51  ;;  %v12791_v10 = vand.u32 4294901760, %v9304_v47  ;;  %v12795_v54 = vand.u32 4294901760, %v9208_v52  ;;  %1586 = vmatpush1.msra.mxu0 %v9190_v7  ;;  %v12798_v52 = vand.u32 4294901760, %v9315_v37  ;;  %v9431_v3 = vsub.f32 %v164_v39, %v9376_v14 }
 0x11e   :  { %v9386_v4 = vsub.f32 %v9290_v50, %v12788_v34  ;;  %1807 = vmatpush1.msra.mxu1 %v12790_v1  ;;  %v9402_v34 = vsub.f32 %v9286_v45, %v12792_v44  ;;  %12793 = vst [vmem:[#allocation60_spill] sm:$0xff] %v9404_v33  ;;  %12794 = vst [vmem:[#allocation93_spill] sm:$0xff] %v9407_v21  ;;  %v151_v45 = vld [vmem:[#allocation2 + $0x310] sm:$0xff]  ;;  %1588 = vmatprep.subr.mxu0 %v9215_v48  ;;  %v9428_v1 = vand.u32 4294901760, %v155_v18 }
 0x11f   :  { %v9397_v32 = vsub.f32 %v9304_v47, %v12791_v10  ;;  %1813 = vmatprep.subr.mxu1 %v12795_v54  ;;  %v9414_v10 = vsub.f32 %v163_v6, %v9364_v63  ;;  %v12797_v47 = vand.u32 4294901760, %v9213_v24  ;;  %v9424_v46 = vsub.f32 %v9315_v37, %v12798_v52  ;;  %v152_v6 = vld [vmem:[#allocation2 + $0x318] sm:$0xff]  ;;  %12801 = vst [vmem:[#allocation70_spill] sm:$0xff] %v9431_v3 }
 0x120   :  { %v9426_v54 = vand.u32 4294901760, %v156_v8  ;;  %12800 = vst [vmem:[#allocation95_spill] sm:$0xff] %v9428_v1  ;;  %v12802_v44 = vand.u32 4294901760, %v9249_v53  ;;  %1590 = vmatpush1.msra.mxu0 %v9200_v27  ;;  %v12803_v24 = vand.u32 4294901760, %v9344_v9  ;;  %v9443_v48 = vsub.f32 %v159_v30, %v9389_v51 }
 0x121   :  { %12796 = vst [vmem:[#allocation62_spill] sm:$0xff] %v9414_v10  ;;  %1819 = vmatpush1.msra.mxu1 %v12797_v47  ;;  %v1872_v47 = vand.u32 4294901760, %v9386_v4  ;;  %v12805_v39 = vand.u32 4294901760, %v9239_v29  ;;  %1592 = vmatprep.subr.mxu0 %v9254_v38  ;;  %v1884_v53 = vand.u32 4294901760, %v9397_v32  ;;  %v9452_v27 = vand.u32 4294901760, %v151_v45  ;;  %v148_v4 = vld [vmem:[#allocation2 + $0x2f8] sm:$0xff] }
 0x122   :  { %12799 = vst [vmem:[#allocation94_spill] sm:$0xff] %v9426_v54  ;;  %1825 = vmatprep.subr.mxu1 %v12802_v44  ;;  %v9440_v52 = vsub.f32 %v9344_v9, %v12803_v24  ;;  %12804 = vst [vmem:[#allocation100_spill] sm:$0xff] %v9443_v48  ;;  %v147_v24 = vld [vmem:[#allocation2 + $0x2f0] sm:$0xff]  ;;  %v12807_v37 = vand.u32 4294901760, %v9271_v60  ;;  %1594 = vmatpush2.msra.mxu0 %v9241_v57  ;;  %v12808_v30 = vand.u32 4294901760, %v9367_v19  ;;  %v9467_v44 = vand.u32 4294901760, %v152_v6 }
 0x123   :  { %1831 = vmatpush1.msra.mxu1 %v12805_v39  ;;  %12806 = vst [vmem:[#allocation105_spill] sm:$0xff] %v9452_v27  ;;  %v12809_v39 = vand.u32 4294901760, %v9351_v0  ;;  %v9470_v7 = vsub.f32 %v160_v2, %v9404_v33  ;;  %v12812_v60 = vand.u32 4294901760, %v9276_v62  ;;  %1596 = vmatprep.subr.mxu0 %v9278_v28  ;;  %v9481_v38 = vsub.f32 %v156_v8, %v9426_v54  ;;  %v144_v57 = vld [vmem:[#allocation2 + $0x2d8] sm:$0xff]  ;;  %v139_v28 = vld [vmem:[#allocation2 + $0x2b0] sm:$0xff] }
 0x124   :  { %1837 = vmatprep.subr.mxu1 %v12807_v37  ;;  %v9460_v29 = vsub.f32 %v9367_v19, %v12808_v30  ;;  %12810 = vst [vmem:[#allocation84_spill] sm:$0xff] %v9467_v44  ;;  %v9477_v30 = vsub.f32 %v155_v18, %v9428_v1  ;;  %1598 = vmatpush2.msra.mxu0 %v9263_v58  ;;  %v1896_v62 = vand.u32 4294901760, %v9440_v52  ;;  %v12816_v2 = vand.u32 4294901760, %v9374_v23 }
 0x125   :  { %v9465_v32 = vsub.f32 %v9351_v0, %v12809_v39  ;;  %12811 = vst [vmem:[#allocation110_spill] sm:$0xff] %v9470_v7  ;;  %1843 = vmatpush1.msra.mxu1 %v12812_v60  ;;  %v143_v39 = vld [vmem:[#allocation2 + $0x2d0] sm:$0xff]  ;;  %12814 = vst [vmem:[#allocation112_spill] sm:$0xff] %v9481_v38  ;;  %v12815_v0 = vand.u32 4294901760, %v9312_v40  ;;  %v9492_v18 = vand.u32 4294901760, %v147_v24  ;;  %v12818_v8 = vand.u32 4294901760, %v9299_v36  ;;  %1600 = vmatprep.subr.mxu0 %v9317_v31 }
 0x126   :  { %12813 = vst [vmem:[#allocation111_spill] sm:$0xff] %v9477_v30  ;;  %v9490_v60 = vsub.f32 %v9374_v23, %v12816_v2  ;;  %v12819_v40 = vand.u32 4294901760, %v9407_v21  ;;  %v9504_v52 = vsub.f32 %v151_v45, %v9452_v27  ;;  %v9506_v2 = vand.u32 4294901760, %v148_v4  ;;  %1602 = vmatpush2.msra.mxu0 %v9301_v56 }
 0x127   :  { %1849 = vmatprep.subr.mxu1 %v12815_v0  ;;  %12817 = vst [vmem:[#allocation113_spill] sm:$0xff] %v9492_v18  ;;  %v12822_v37 = vand.u32 4294901760, %v9328_v59  ;;  %v1908_v36 = vand.u32 4294901760, %v9460_v29  ;;  %v12824_v45 = vand.u32 4294901760, %v9338_v5  ;;  %1604 = vmatprep.subr.mxu0 %v9340_v16  ;;  %v12825_v58 = vand.u32 4294901760, %v9431_v3  ;;  %v140_v29 = vld [vmem:[#allocation2 + $0x2b8] sm:$0xff] }
 0x128   :  { %1855 = vmatpush1.msra.mxu1 %v12818_v8  ;;  %v9501_v0 = vsub.f32 %v9407_v21, %v12819_v40  ;;  %12820 = vst [vmem:[#allocation114_spill] sm:$0xff] %v9504_v52  ;;  %12821 = vst [vmem:[#allocation115_spill] sm:$0xff] %v9506_v2  ;;  %v1914_v8 = vand.u32 4294901760, %v9465_v32  ;;  %v9515_v40 = vand.u32 4294901760, %v143_v39  ;;  %v9529_v31 = vsub.f32 %v152_v6, %v9467_v44 }
 0x129   :  { %1861 = vmatprep.subr.mxu1 %v12822_v37  ;;  %v9523_v59 = vsub.f32 %v9431_v3, %v12825_v58  ;;  %v9525_v37 = vand.u32 4294901760, %v144_v57  ;;  %1606 = vmatpush2.msra.mxu0 %v9330_v61  ;;  %v1926_v5 = vand.u32 4294901760, %v9490_v60  ;;  %v12829_v16 = vand.u32 4294901760, %v9414_v10  ;;  %v135_v3 = vld [vmem:[#allocation2 + $0x290] sm:$0xff]  ;;  %v136_v61 = vld [vmem:[#allocation2 + $0x298] sm:$0xff] }
 0x12a   :  { %12823 = vst [vmem:[#allocation116_spill] sm:$0xff] %v9515_v40  ;;  %1867 = vmatpush1.msra.mxu1 %v12824_v45  ;;  %12827 = vst [vmem:[#allocation118_spill] sm:$0xff] %v9529_v31  ;;  %v9534_v45 = vsub.f32 %v147_v24, %v9492_v18  ;;  %v12830_v32 = vand.u32 4294901760, %v9362_v43  ;;  %1608 = vmatprep.subr.mxu0 %v9376_v14  ;;  %v1920_v6 = vand.u32 4294901760, %v9501_v0  ;;  %v9551_v60 = vand.u32 4294901760, %v139_v28  ;;  %v131_v14 = vld [vmem:[#allocation2 + $0x270] sm:$0xff] }
 0x12b   :  { %12826 = vst [vmem:[#allocation117_spill] sm:$0xff] %v9525_v37  ;;  %1873 = vmatprep.subr.mxu1 %v1872_v47  ;;  %v9539_v58 = vsub.f32 %v9414_v10, %v12829_v16  ;;  %v12831_v47 = vand.u32 4294901760, %v9443_v48  ;;  %1610 = vmatpush2.msra.mxu0 %v9364_v63  ;;  %v12833_v43 = vand.u32 4294901760, %v9470_v7  ;;  %v9561_v0 = vsub.f32 %v143_v39, %v9515_v40 }
 0x12c   :  { %12828 = vst [vmem:[#allocation119_spill] sm:$0xff] %v9534_v45  ;;  %1879 = vmatpush1.msra.mxu1 %v12830_v32  ;;  %12832 = vst [vmem:[#allocation120_spill] sm:$0xff] %v9551_v60  ;;  %v9563_v56 = vand.u32 4294901760, %v140_v29  ;;  %1612 = vmatprep.subr.mxu0 %v9404_v33  ;;  %v12838_v16 = vand.u32 4294901760, %v9481_v38  ;;  %v9578_v63 = vand.u32 4294901760, %v135_v3  ;;  %v12841_v39 = vand.u32 4294901760, %v9424_v46 }
 0x12d   :  { %v9549_v24 = vsub.f32 %v9443_v48, %v12831_v47  ;;  %1885 = vmatprep.subr.mxu1 %v1884_v53  ;;  %v9558_v32 = vsub.f32 %v9470_v7, %v12833_v43  ;;  %12834 = vst [vmem:[#allocation121_spill] sm:$0xff] %v9561_v0  ;;  %v9566_v47 = vsub.f32 %v148_v4, %v9506_v2  ;;  %v12837_v48 = vand.u32 4294901760, %v9402_v34  ;;  %v132_v7 = vld [vmem:[#allocation2 + $0x278] sm:$0xff] }
 0x12e   :  { %12835 = vst [vmem:[#allocation122_spill] sm:$0xff] %v9563_v56  ;;  %v1932_v53 = vand.u32 4294901760, %v9523_v59  ;;  %v9575_v43 = vsub.f32 %v9481_v38, %v12838_v16  ;;  %1614 = vmatpush2.msra.mxu0 %v9389_v51  ;;  %v1938_v34 = vand.u32 4294901760, %v9539_v58  ;;  %v9587_v59 = vand.u32 4294901760, %v136_v61 }
 0x12f   :  { %12836 = vst [vmem:[#allocation123_spill] sm:$0xff] %v9566_v47  ;;  %1891 = vmatpush2.msra.mxu1 %v12837_v48  ;;  %v12839_v48 = vand.u32 4294901760, %v9477_v30  ;;  %v9590_v16 = vsub.f32 %v144_v57, %v9525_v37  ;;  %1616 = vmatprep.subr.mxu0 %v9426_v54  ;;  %v9597_v51 = vsub.f32 %v139_v28, %v9551_v60  ;;  %v12843_v58 = vand.u32 4294901760, %v9504_v52 }
 0x130   :  { %1897 = vmatprep.subr.mxu1 %v1896_v62  ;;  %v1950_v62 = vand.u32 4294901760, %v9549_v24  ;;  %v9604_v33 = vand.u32 4294901760, %v131_v14  ;;  %1618 = vmatpush2.msra.mxu0 %v9428_v1  ;;  %v1944_v57 = vand.u32 4294901760, %v9558_v32  ;;  %v9608_v46 = vand.u32 4294901760, %v132_v7  ;;  %v120_v32 = vld [vmem:[#allocation2 + $0x218] sm:$0xff] }
 0x131   :  { %v9585_v4 = vsub.f32 %v9477_v30, %v12839_v48  ;;  %12840 = vst [vmem:[#allocation124_spill] sm:$0xff] %v9590_v16  ;;  %1903 = vmatpush2.msra.mxu1 %v12841_v39  ;;  %12842 = vst [vmem:[#allocation125_spill] sm:$0xff] %v9597_v51  ;;  %v9602_v48 = vsub.f32 %v9504_v52, %v12843_v58  ;;  %v128_v30 = vld [vmem:[#allocation2 + $0x258] sm:$0xff]  ;;  %v127_v39 = vld [vmem:[#allocation2 + $0x250] sm:$0xff]  ;;  %v9612_v28 = vsub.f32 %v140_v29, %v9563_v56 }
 0x132   :  { %1909 = vmatprep.subr.mxu1 %v1908_v36  ;;  %1620 = vmatprep.subr.mxu0 %v9467_v44  ;;  %v1956_v58 = vand.u32 4294901760, %v9575_v43  ;;  %v12845_v54 = vand.u32 4294901760, %v9529_v31  ;;  %v9620_v1 = vsub.f32 %v135_v3, %v9578_v63  ;;  %v124_v52 = vld [vmem:[#allocation2 + $0x238] sm:$0xff]  ;;  %v123_v43 = vld [vmem:[#allocation2 + $0x230] sm:$0xff]  ;;  %v9629_v44 = vsub.f32 %v136_v61, %v9587_v59 }
 0x133   :  { %12844 = vst [vmem:[#allocation126_spill] sm:$0xff] %v9612_v28  ;;  %1915 = vmatpush2.msra.mxu1 %v1914_v8  ;;  %1622 = vmatpush2.msra.mxu0 %v9452_v27  ;;  %v1962_v29 = vand.u32 4294901760, %v9585_v4  ;;  %v9625_v8 = vand.u32 4294901760, %v128_v30  ;;  %v1974_v3 = vand.u32 4294901760, %v9602_v48  ;;  %v12847_v24 = vand.u32 4294901760, %v9566_v47  ;;  %v119_v48 = vld [vmem:[#allocation2 + $0x210] sm:$0xff] }
 0x134   :  { %v1967_v36 = vsub.f32 %v9529_v31, %v12845_v54  ;;  %12846 = vst [vmem:[#allocation127_spill] sm:$0xff] %v9620_v1  ;;  %1921 = vmatprep.subr.mxu1 %v1920_v6  ;;  %1624 = vmatprep.subr.mxu0 %v9506_v2  ;;  %v9634_v54 = vsub.f32 %v131_v14, %v9604_v33  ;;  %v9636_v6 = vand.u32 4294901760, %v127_v39  ;;  %v9653_v27 = vand.u32 4294901760, %v123_v43 }
 0x135   :  { %1927 = vmatpush2.msra.mxu1 %v1926_v5  ;;  %1626 = vmatpush2.msra.mxu0 %v9492_v18  ;;  %v1979_v61 = vsub.f32 %v9566_v47, %v12847_v24  ;;  %v9643_v5 = vand.u32 4294901760, %v124_v52  ;;  %v9647_v14 = vsub.f32 %v132_v7, %v9608_v46  ;;  %v12850_v2 = vand.u32 4294901760, %v9590_v16 }
 0x136   :  { %1933 = vmatprep.subr.mxu1 %v1932_v53  ;;  %1628 = vmatprep.subr.mxu0 %v9525_v37  ;;  %v1968_v4 = vand.u32 4294901760, %v1967_v36  ;;  %v12849_v53 = vand.u32 4294901760, %v9534_v45  ;;  %v9660_v47 = vand.u32 4294901760, %v120_v32  ;;  %v9664_v36 = vsub.f32 %v128_v30, %v9625_v8 }
 0x137   :  { %12848 = vst [vmem:[#allocation128_spill] sm:$0xff] %v9647_v14  ;;  %1939 = vmatpush2.msra.mxu1 %v1938_v34  ;;  %1630 = vmatpush2.msra.mxu0 %v9515_v40  ;;  %v1991_v7 = vsub.f32 %v9590_v16, %v12850_v2  ;;  %v9673_v40 = vand.u32 4294901760, %v119_v48  ;;  %v1980_v34 = vand.u32 4294901760, %v1979_v61  ;;  %v12852_v30 = vand.u32 4294901760, %v9612_v28  ;;  %v12865_v2 = vld [vmem:[#allocation103_spill] sm:$0xff] }
 0x138   :  { %v1985_v18 = vsub.f32 %v9534_v45, %v12849_v53  ;;  %1945 = vmatprep.subr.mxu1 %v1944_v57  ;;  %1632 = vmatprep.subr.mxu0 %v9563_v56  ;;  %v9668_v53 = vsub.f32 %v127_v39, %v9636_v6  ;;  %v12851_v57 = vand.u32 4294901760, %v9561_v0  ;;  %v9682_v39 = vsub.f32 %v124_v52, %v9643_v5 }
 0x139   :  { %1951 = vmatpush2.msra.mxu1 %v1950_v62  ;;  %1634 = vmatpush2.msra.mxu0 %v9551_v60  ;;  %v2003_v62 = vsub.f32 %v9612_v28, %v12852_v30  ;;  %v9686_v37 = vsub.f32 %v123_v43, %v9653_v27  ;;  %v1992_v30 = vand.u32 4294901760, %v1991_v7  ;;  %v12855_v52 = vand.u32 4294901760, %v9629_v44 }
 0x13a   :  { %v1997_v24 = vsub.f32 %v9561_v0, %v12851_v57  ;;  %1957 = vmatprep.subr.mxu1 %v1956_v58  ;;  %1636 = vmatprep.subr.mxu0 %v9587_v59  ;;  %v1986_v57 = vand.u32 4294901760, %v1985_v18  ;;  %v12854_v58 = vand.u32 4294901760, %v9597_v51  ;;  %v9698_v18 = vsub.f32 %v120_v32, %v9660_v47 }
 0x13b   :  { %1963 = vmatpush2.msra.mxu1 %v1962_v29  ;;  %12853 = vst [vmem:[#allocation129_spill] sm:$0xff] %v9686_v37  ;;  %1638 = vmatpush2.msra.mxu0 %v9578_v63  ;;  %v2015_v29 = vsub.f32 %v9629_v44, %v12855_v52  ;;  %v2004_v52 = vand.u32 4294901760, %v2003_v62  ;;  %v12858_v32 = vand.u32 4294901760, %v9647_v14  ;;  %v12860_v62 = vand.u32 4294901760, %v9664_v36 }
 0x13c   :  { %v2009_v61 = vsub.f32 %v9597_v51, %v12854_v58  ;;  %1969 = vmatprep.subr.mxu1 %v1968_v4  ;;  %12856 = vst [vmem:[#allocation130_spill] sm:$0xff] %v9698_v18  ;;  %1640 = vmatprep.subr.mxu0 %v9608_v46  ;;  %v1998_v43 = vand.u32 4294901760, %v1997_v24  ;;  %v9702_v58 = vsub.f32 %v119_v48, %v9673_v40  ;;  %v12857_v4 = vand.u32 4294901760, %v9620_v1 }
 0x13d   :  { %1975 = vmatpush2.msra.mxu1 %v1974_v3  ;;  %1642 = vmatpush2.msra.mxu0 %v9604_v33  ;;  %v2027_v3 = vsub.f32 %v9647_v14, %v12858_v32  ;;  %v12859_v24 = vand.u32 4294901760, %v9634_v54  ;;  %v2039_v32 = vsub.f32 %v9664_v36, %v12860_v62 }
 0x13e   :  { %v2021_v7 = vsub.f32 %v9620_v1, %v12857_v4  ;;  %1981 = vmatprep.subr.mxu1 %v1980_v34  ;;  %1644 = vmatprep.subr.mxu0 %v9625_v8  ;;  %v2010_v48 = vand.u32 4294901760, %v2009_v61  ;;  %v2016_v34 = vand.u32 4294901760, %v2015_v29  ;;  %v12861_v61 = vand.u32 4294901760, %v9668_v53 }
 0x13f   :  { %1987 = vmatpush2.msra.mxu1 %v1986_v57  ;;  %v2033_v4 = vsub.f32 %v9634_v54, %v12859_v24  ;;  %1646 = vmatpush2.msra.mxu0 %v9636_v6  ;;  %v12862_v29 = vand.u32 4294901760, %v9682_v39 }
 0x140   :  { %1993 = vmatprep.subr.mxu1 %v1992_v30  ;;  %1648 = vmatprep.subr.mxu0 %v9643_v5  ;;  %v2022_v57 = vand.u32 4294901760, %v2021_v7  ;;  %v2045_v24 = vsub.f32 %v9668_v53, %v12861_v61  ;;  %v2028_v30 = vand.u32 4294901760, %v2027_v3  ;;  %v12863_v7 = vand.u32 4294901760, %v9686_v37 }
 0x141   :  { %1999 = vmatpush2.msra.mxu1 %v1998_v43  ;;  %1650 = vmatpush2.msra.mxu0 %v9653_v27  ;;  %v2051_v62 = vsub.f32 %v9682_v39, %v12862_v29  ;;  %v2034_v43 = vand.u32 4294901760, %v2033_v4  ;;  %v2040_v61 = vand.u32 4294901760, %v2039_v32 }
 0x142   :  { %2005 = vmatprep.subr.mxu1 %v2004_v52  ;;  %1652 = vmatprep.subr.mxu0 %v9660_v47  ;;  %v2057_v56 = vsub.f32 %v9686_v37, %v12863_v7  ;;  %v12864_v52 = vand.u32 4294901760, %v9698_v18  ;;  %v2046_v29 = vand.u32 4294901760, %v2045_v24  ;;  %v12870_v24 = vld [vmem:[#allocation97_spill] sm:$0xff] }
 0x143   :  { %2011 = vmatpush2.msra.mxu1 %v2010_v48  ;;  %1654 = vmatpush2.msra.mxu0 %v9673_v40  ;;  %v12866_v48 = vand.u32 4294901760, %v9702_v58  ;;  %v2052_v7 = vand.u32 4294901760, %v2051_v62  ;;  %v12872_v62 = vld [vmem:[#allocation66_spill] sm:$0xff] }
 0x144   :  { %2017 = vmatprep.subr.mxu1 %v2016_v34  ;;  %v2063_v3 = vsub.f32 %v9698_v18, %v12864_v52  ;;  %1660 = vmatprep.mubr.f32.mxu0 %v12865_v2  ;;  %v12867_v34 = vld [vmem:[#allocation104_spill] sm:$0xff]  ;;  %v2058_v32 = vand.u32 4294901760, %v2057_v56 }
 0x145   :  { %2023 = vmatpush2.msra.mxu1 %v2022_v57  ;;  %v2069_v4 = vsub.f32 %v9702_v58, %v12866_v48  ;;  %2091 = vmatprep.subr.mxu0 %v8840_v11  ;;  %v12868_v56 = vld [vmem:[#allocation96_spill] sm:$0xff]  ;;  %v12877_v48 = vld [vmem:[#allocation37_spill] sm:$0xff] }
 0x146   :  { %2029 = vmatprep.subr.mxu1 %v2028_v30  ;;  %1666 = vmatmul.mubr.f32.vlgmr.msra.gmra.mxu0 %v12867_v34  ;;  %v2064_v52 = vand.u32 4294901760, %v2063_v3  ;;  %v12869_v57 = vld [vmem:[#allocation92_spill] sm:$0xff]  ;;  %v12871_v30 = vld [vmem:[#allocation14_spill] sm:$0xff]  ;;  %v12875_v3 = vld [vmem:[#allocation15_spill] sm:$0xff] }
 0x147   :  { %2035 = vmatpush2.msra.mxu1 %v2034_v43  ;;  %2094 = vmatpush1.msra.mxu0 %v8846_v17  ;;  %v2070_v2 = vand.u32 4294901760, %v2069_v4  ;;  %v12873_v43 = vld [vmem:[#allocation13_spill] sm:$0xff]  ;;  %v12878_v4 = vld [vmem:[#allocation74_spill] sm:$0xff]  ;;  %v12880_v34 = vld [vmem:[#allocation76_spill] sm:$0xff] }
 0x148   :  { %2041 = vmatprep.subr.mxu1 %v2040_v61  ;;  %2097 = vmatprep.subr.mxu0 %v8859_v25  ;;  %v12874_v61 = vld [vmem:[#allocation68_spill] sm:$0xff] }
 0x149   :  { %2047 = vmatpush2.msra.mxu1 %v2046_v29  ;;  %2100 = vmatpush1.msra.mxu0 %v8865_v35  ;;  %v12876_v29 = vld [vmem:[#allocation72_spill] sm:$0xff] }
 0x14a   :  { %2053 = vmatprep.subr.mxu1 %v2052_v7  ;;  %2103 = vmatprep.subr.mxu0 %v8883_v49  ;;  %v12879_v7 = vld [vmem:[#allocation39_spill] sm:$0xff] }
 0x14b   :  { %2059 = vmatpush2.msra.mxu1 %v2058_v32  ;;  %2106 = vmatpush1.msra.mxu0 %v8880_v22  ;;  %v12881_v32 = vld [vmem:[#allocation17_spill] sm:$0xff] }
 0x14c   :  { %2065 = vmatprep.subr.mxu1 %v2064_v52  ;;  %2109 = vmatprep.subr.mxu0 %v8903_v42  ;;  %v12882_v52 = vld [vmem:[#allocation78_spill] sm:$0xff] }
 0x14d   :  { %2071 = vmatpush2.msra.mxu1 %v2070_v2  ;;  %2073 = vmatprep.mubr.f32.mxu1 %v12868_v56  ;;  %v12883_v2 = vld [vmem:[#allocation43_spill] sm:$0xff] }
 0x14e   :  { %2112 = vmatpush1.msra.mxu0 %v12869_v57  ;;  %2075 = vmatmul.mubr.f32.vlgmr.msra.gmra.mxu1 %v12870_v24  ;;  %v12884_v24 = vld [vmem:[#allocation80_spill] sm:$0xff]  ;;  %v12885_v56 = vld [vmem:[#allocation19_spill] sm:$0xff] }
 0x14f   :  { %2115 = vmatprep.subr.mxu0 %v12871_v30  ;;  %2303 = vmatprep.subr.mxu1 %v12872_v62 }
 0x150   :  { %2118 = vmatpush1.msra.mxu0 %v12873_v43  ;;  %2305 = vmatpush1.msra.mxu1 %v12874_v61 }
 0x151   :  { %2121 = vmatprep.subr.mxu0 %v12875_v3  ;;  %2307 = vmatprep.subr.mxu1 %v12876_v29  ;;  %v12886_v3 = vld [vmem:[#allocation82_spill] sm:$0xff] }
 0x152   :  { %2124 = vmatpush1.msra.mxu0 %v12877_v48  ;;  %2309 = vmatpush1.msra.mxu1 %v12878_v4  ;;  %v12887_v48 = vld [vmem:[#allocation88_spill] sm:$0xff]  ;;  %v12888_v4 = vld [vmem:[#allocation21_spill] sm:$0xff] }
 0x153   :  { %2127 = vmatprep.subr.mxu0 %v12879_v7  ;;  %2311 = vmatprep.subr.mxu1 %v12880_v34  ;;  %v12889_v7 = vld [vmem:[#allocation90_spill] sm:$0xff] }
 0x154   :  { %2130 = vmatpush1.msra.mxu0 %v12881_v32  ;;  %2313 = vmatpush1.msra.mxu1 %v12882_v52  ;;  %v12890_v32 = vld [vmem:[#allocation12_spill] sm:$0xff]  ;;  %v12891_v52 = vld [vmem:[#allocation23_spill] sm:$0xff] }
 0x155   :  { %2133 = vmatprep.subr.mxu0 %v12883_v2  ;;  %2315 = vmatprep.subr.mxu1 %v12884_v24  ;;  %v12892_v2 = vld [vmem:[#allocation31_spill] sm:$0xff]  ;;  %v12893_v24 = vld [vmem:[#allocation25_spill] sm:$0xff] }
 0x156   :  { %2136 = vmatpush1.msra.mxu0 %v12885_v56  ;;  %2317 = vmatpush1.msra.mxu1 %v12886_v3  ;;  %v12894_v56 = vld [vmem:[#allocation33_spill] sm:$0xff]  ;;  %v12895_v3 = vld [vmem:[#allocation55_spill] sm:$0xff] }
 0x157   :  { %2139 = vmatprep.subr.mxu0 %v9047_v20  ;;  %2319 = vmatprep.subr.mxu1 %v12887_v48  ;;  %v12896_v20 = vld [vmem:[#allocation35_spill] sm:$0xff] }
 0x158   :  { %2142 = vmatpush1.msra.mxu0 %v12888_v4  ;;  %2321 = vmatpush1.msra.mxu1 %v12889_v7  ;;  %v12897_v7 = vld [vmem:[#allocation59_spill] sm:$0xff] }
 0x159   :  { %2145 = vmatprep.subr.mxu0 %v9083_v26  ;;  %2323 = vmatprep.subr.mxu1 %v12890_v32  ;;  %v12898_v26 = vld [vmem:[#allocation16_spill] sm:$0xff]  ;;  %v12899_v32 = vld [vmem:[#allocation65_spill] sm:$0xff] }
 0x15a   :  { %2148 = vmatpush1.msra.mxu0 %v12891_v52  ;;  %2325 = vmatpush1.msra.mxu1 %v12892_v2  ;;  %v12900_v52 = vld [vmem:[#allocation41_spill] sm:$0xff]  ;;  %v12901_v2 = vld [vmem:[#allocation63_spill] sm:$0xff] }
 0x15b   :  { %2151 = vmatprep.subr.mxu0 %v12893_v24  ;;  %2327 = vmatprep.subr.mxu1 %v12894_v56  ;;  %v12902_v24 = vld [vmem:[#allocation18_spill] sm:$0xff] }
 0x15c   :  { %2154 = vmatpush1.msra.mxu0 %v12895_v3  ;;  %2329 = vmatpush1.msra.mxu1 %v12896_v20  ;;  %v12903_v3 = vld [vmem:[#allocation45_spill] sm:$0xff]  ;;  %v12904_v20 = vld [vmem:[#allocation67_spill] sm:$0xff] }
 0x15d   :  { %2157 = vmatprep.subr.mxu0 %v9155_v55  ;;  %2331 = vmatprep.subr.mxu1 %v8957_v13  ;;  %v12905_v55 = vld [vmem:[#allocation20_spill] sm:$0xff] }
 0x15e   :  { %2160 = vmatpush1.msra.mxu0 %v12897_v7  ;;  %2333 = vmatpush1.msra.mxu1 %v12898_v26  ;;  %v12906_v7 = vld [vmem:[#allocation49_spill] sm:$0xff]  ;;  %v12907_v26 = vld [vmem:[#allocation38_spill] sm:$0xff] }
 0x15f   :  { %2163 = vmatprep.subr.mxu0 %v12899_v32  ;;  %2335 = vmatprep.subr.mxu1 %v12900_v52  ;;  %v12908_v32 = vld [vmem:[#allocation22_spill] sm:$0xff] }
 0x160   :  { %2166 = vmatpush1.msra.mxu0 %v12901_v2  ;;  %2337 = vmatpush1.msra.mxu1 %v12902_v24  ;;  %v12909_v2 = vld [vmem:[#allocation24_spill] sm:$0xff] }
 0x161   :  { %2169 = vmatprep.subr.mxu0 %v9218_v12  ;;  %2339 = vmatprep.subr.mxu1 %v12903_v3  ;;  %v12910_v12 = vld [vmem:[#allocation53_spill] sm:$0xff] }
 0x162   :  { %2172 = vmatpush1.msra.mxu0 %v12904_v20  ;;  %2341 = vmatpush1.msra.mxu1 %v12905_v55  ;;  %v12911_v3 = vld [vmem:[#allocation81_spill] sm:$0xff]  ;;  %v12913_v55 = vld [vmem:[#allocation44_spill] sm:$0xff] }
 0x163   :  { %2175 = vmatprep.subr.mxu0 %v9227_v15  ;;  %2343 = vmatprep.subr.mxu1 %v12906_v7  ;;  %v12912_v20 = vld [vmem:[#allocation57_spill] sm:$0xff]  ;;  %v12914_v15 = vld [vmem:[#allocation26_spill] sm:$0xff] }
 0x164   :  { %2178 = vmatpush1.msra.mxu0 %v12907_v26  ;;  %2345 = vmatpush1.msra.mxu1 %v12908_v32  ;;  %v12915_v26 = vld [vmem:[#allocation28_spill] sm:$0xff] }
 0x165   :  { %2181 = vmatprep.subr.mxu0 %v9290_v50  ;;  %2347 = vmatprep.subr.mxu1 %v12909_v2  ;;  %v12916_v32 = vld [vmem:[#allocation48_spill] sm:$0xff]  ;;  %v12917_v50 = vld [vmem:[#allocation27_spill] sm:$0xff] }
 0x166   :  { %2184 = vmatpush1.msra.mxu0 %v9252_v41  ;;  %2349 = vmatpush1.msra.mxu1 %v12910_v12  ;;  %v12918_v41 = vld [vmem:[#allocation30_spill] sm:$0xff] }
 0x167   :  { %2187 = vmatprep.subr.mxu0 %v12911_v3  ;;  %2351 = vmatprep.subr.mxu1 %v12912_v20  ;;  %v12919_v12 = vld [vmem:[#allocation86_spill] sm:$0xff]  ;;  %v12920_v3 = vld [vmem:[#allocation32_spill] sm:$0xff] }
 0x168   :  { %2190 = vmatpush2.msra.mxu0 %v12913_v55  ;;  %2353 = vmatpush1.msra.mxu1 %v12914_v15  ;;  %v12921_v55 = vld [vmem:[#allocation69_spill] sm:$0xff] }
 0x169   :  { %2193 = vmatprep.subr.mxu0 %v9344_v9  ;;  %2355 = vmatprep.subr.mxu1 %v12915_v26  ;;  %v12922_v9 = vld [vmem:[#allocation34_spill] sm:$0xff] }
 0x16a   :  { %2196 = vmatpush2.msra.mxu0 %v12916_v32  ;;  %2357 = vmatpush1.msra.mxu1 %v12917_v50  ;;  %v12923_v26 = vld [vmem:[#allocation70_spill] sm:$0xff]  ;;  %v12924_v32 = vld [vmem:[#allocation75_spill] sm:$0xff] }
 0x16b   :  { %2199 = vmatprep.subr.mxu0 %v9367_v19  ;;  %2359 = vmatprep.subr.mxu1 %v12918_v41  ;;  %v12925_v19 = vld [vmem:[#allocation73_spill] sm:$0xff]  ;;  %v12926_v41 = vld [vmem:[#allocation110_spill] sm:$0xff] }
 0x16c   :  { %2202 = vmatpush2.msra.mxu0 %v12919_v12  ;;  %2361 = vmatpush1.msra.mxu1 %v12920_v3  ;;  %v12927_v12 = vld [vmem:[#allocation77_spill] sm:$0xff]  ;;  %v12928_v3 = vld [vmem:[#allocation100_spill] sm:$0xff] }
 0x16d   :  { %2205 = vmatprep.subr.mxu0 %v9407_v21  ;;  %2363 = vmatprep.subr.mxu1 %v12921_v55  ;;  %v12929_v21 = vld [vmem:[#allocation42_spill] sm:$0xff] }
 0x16e   :  { %2208 = vmatpush2.msra.mxu0 %v9374_v23  ;;  %2365 = vmatpush1.msra.mxu1 %v12922_v9  ;;  %v12930_v23 = vld [vmem:[#allocation83_spill] sm:$0xff] }
 0x16f   :  { %2211 = vmatprep.subr.mxu0 %v12923_v26  ;;  %2367 = vmatprep.subr.mxu1 %v12924_v32  ;;  %v12931_v9 = vld [vmem:[#allocation111_spill] sm:$0xff]  ;;  %v12932_v26 = vld [vmem:[#allocation46_spill] sm:$0xff] }
 0x170   :  { %2214 = vmatpush2.msra.mxu0 %v9414_v10  ;;  %2369 = vmatpush2.msra.mxu1 %v12925_v19  ;;  %v12933_v10 = vld [vmem:[#allocation85_spill] sm:$0xff]  ;;  %v12934_v19 = vld [vmem:[#allocation114_spill] sm:$0xff] }
 0x171   :  { %2217 = vmatprep.subr.mxu0 %v12926_v41  ;;  %2371 = vmatprep.subr.mxu1 %v12927_v12  ;;  %v12935_v41 = vld [vmem:[#allocation50_spill] sm:$0xff]  ;;  %v12936_v12 = vld [vmem:[#allocation123_spill] sm:$0xff] }
 0x172   :  { %2220 = vmatpush2.msra.mxu0 %v12928_v3  ;;  %2373 = vmatpush2.msra.mxu1 %v12929_v21  ;;  %v12937_v3 = vld [vmem:[#allocation58_spill] sm:$0xff] }
 0x173   :  { %2223 = vmatprep.subr.mxu0 %v9481_v38  ;;  %2375 = vmatprep.subr.mxu1 %v12930_v23  ;;  %v12938_v38 = vld [vmem:[#allocation54_spill] sm:$0xff] }
 0x174   :  { %2226 = vmatpush2.msra.mxu0 %v12931_v9  ;;  %2377 = vmatpush2.msra.mxu1 %v12932_v26  ;;  %v12939_v9 = vld [vmem:[#allocation60_spill] sm:$0xff] }
 0x175   :  { %2229 = vmatprep.subr.mxu0 %v9529_v31  ;;  %2379 = vmatprep.subr.mxu1 %v12933_v10  ;;  %v12940_v31 = vld [vmem:[#allocation91_spill] sm:$0xff] }
 0x176   :  { %2232 = vmatpush2.msra.mxu0 %v12934_v19  ;;  %2381 = vmatpush2.msra.mxu1 %v12935_v41  ;;  %v12941_v19 = vld [vmem:[#allocation94_spill] sm:$0xff] }
 0x177   :  { %2235 = vmatprep.subr.mxu0 %v12936_v12  ;;  %2383 = vmatprep.subr.mxu1 %v12937_v3  ;;  %v12942_v12 = vld [vmem:[#allocation95_spill] sm:$0xff] }
 0x178   :  { %2238 = vmatpush2.msra.mxu0 %v9534_v45  ;;  %2385 = vmatpush2.msra.mxu1 %v12938_v38  ;;  %v12943_v45 = vld [vmem:[#allocation84_spill] sm:$0xff] }
 0x179   :  { %2241 = vmatprep.subr.mxu0 %v9590_v16  ;;  %2387 = vmatprep.subr.mxu1 %v12939_v9  ;;  %v12944_v16 = vld [vmem:[#allocation105_spill] sm:$0xff] }
 0x17a   :  { %2244 = vmatpush2.msra.mxu0 %v9561_v0  ;;  %2389 = vmatpush2.msra.mxu1 %v12940_v31  ;;  %v12945_v0 = vld [vmem:[#allocation115_spill] sm:$0xff] }
 0x17b   :  { %2247 = vmatprep.subr.mxu0 %v9612_v28  ;;  %2391 = vmatprep.subr.mxu1 %v12941_v19  ;;  %v12946_v28 = vld [vmem:[#allocation113_spill] sm:$0xff] }
 0x17c   :  { %2250 = vmatpush2.msra.mxu0 %v9597_v51  ;;  %2393 = vmatpush2.msra.mxu1 %v12942_v12  ;;  %v12947_v51 = vld [vmem:[#allocation117_spill] sm:$0xff] }
 0x17d   :  { %2253 = vmatprep.subr.mxu0 %v9629_v44  ;;  %2395 = vmatprep.subr.mxu1 %v12943_v45  ;;  %v12948_v12 = vld [vmem:[#allocation89_spill] sm:$0xff]  ;;  %v12949_v45 = vld [vmem:[#allocation116_spill] sm:$0xff] }
 0x17e   :  { %2256 = vmatpush2.msra.mxu0 %v9620_v1  ;;  %2397 = vmatpush2.msra.mxu1 %v12944_v16  ;;  %v12950_v1 = vld [vmem:[#allocation64_spill] sm:$0xff] }
 0x17f   :  { %2259 = vmatprep.subr.mxu0 %v9647_v14  ;;  %2399 = vmatprep.subr.mxu1 %v12945_v0  ;;  %v12951_v14 = vld [vmem:[#allocation122_spill] sm:$0xff] }
 0x180   :  { %2262 = vmatpush2.msra.mxu0 %v9634_v54  ;;  %2401 = vmatpush2.msra.mxu1 %v12946_v28 }
 0x181   :  { %2265 = vmatprep.subr.mxu0 %v9664_v36  ;;  %2403 = vmatprep.subr.mxu1 %v12947_v51 }
 0x182   :  { %1676 = vmatprep.mubr.f32.mxu0 %v12948_v12  ;;  %2268 = vmatpush2.msra.mxu0 %v9668_v53  ;;  %v12952_v12 = vld [vmem:[#allocation98_spill] sm:$0xff] }
 0x183   :  { %2405 = vmatpush2.msra.mxu1 %v12949_v45  ;;  %1682 = vmatmul.mubr.f32.gmra.mxu0 %v12950_v1  ;;  %v12953_v45 = vld [vmem:[#allocation11_spill] sm:$0xff] }
 0x184   :  { %2271 = vmatprep.subr.mxu0 %v9682_v39  ;;  %2407 = vmatprep.subr.mxu1 %v12951_v14  ;;  %v12954_v1 = vld [vmem:[#allocation99_spill] sm:$0xff] }
 0x185   :  { %2274 = vmatpush2.msra.mxu0 %v9686_v37  ;;  %2409 = vmatpush2.msra.mxu1 %v9551_v60  ;;  %v12955_v37 = vand.u32 4294901760, %v8840_v11  ;;  %v12956_v60 = vld [vmem:[#allocation29_spill] sm:$0xff]  ;;  %v12961_v11 = vld [vmem:[#allocation107_spill] sm:$0xff] }
 0x186   :  { %2277 = vmatprep.subr.mxu0 %v9698_v18  ;;  %2411 = vmatprep.subr.mxu1 %v9587_v59  ;;  %v12957_v18 = vand.u32 4294901760, %v8846_v17  ;;  %v12962_v17 = vand.u32 4294901760, %v8883_v49  ;;  %v12968_v49 = vand.u32 4294901760, %v12871_v30  ;;  %v12976_v30 = vld [vmem:[#allocation109_spill] sm:$0xff] }
 0x187   :  { %2280 = vmatpush2.msra.mxu0 %v9702_v58  ;;  %2283 = vmatprep.mubr.f32.mxu0 %v12952_v12  ;;  %v12958_v12 = vand.u32 4294901760, %v8859_v25  ;;  %v12963_v25 = vand.u32 4294901760, %v8880_v22  ;;  %v12969_v22 = vand.u32 4294901760, %v12873_v43  ;;  %v12979_v43 = vld [vmem:[#allocation17_spill] sm:$0xff] }
 0x188   :  { %2413 = vmatpush2.msra.mxu1 %v9578_v63  ;;  %2081 = vmatprep.mubr.f32.mxu1 %v12953_v45  ;;  %v12959_v45 = vld [vmem:[#allocation106_spill] sm:$0xff] }
 0x189   :  { %2286 = vmatmul.mubr.f32.vlgmr.msra.gmra.mxu0 %v12954_v1  ;;  %2415 = vmatprep.subr.mxu1 %v9608_v46  ;;  %v12960_v1 = vand.u32 4294901760, %v8865_v35  ;;  %v12965_v35 = vld [vmem:[#allocation101_spill] sm:$0xff] }
 0x18a   :  { %2458 = vmatprep.subr.mxu0 %v12955_v37  ;;  %2083 = vmatmul.mubr.f32.gmra.mxu1 %v12956_v60  ;;  %v12964_v37 = vand.u32 4294901760, %v8903_v42  ;;  %v12970_v42 = vld [vmem:[#allocation15_spill] sm:$0xff] }
 0x18b   :  { %2462 = vmatpush1.msra.mxu0 %v12957_v18  ;;  %2417 = vmatpush2.msra.mxu1 %v9604_v33  ;;  %v12967_v18 = vld [vmem:[#allocation102_spill] sm:$0xff] }
 0x18c   :  { %2466 = vmatprep.subr.mxu0 %v12958_v12  ;;  %2419 = vmatprep.subr.mxu1 %v9625_v8  ;;  %v12971_v12 = vand.u32 4294901760, %v12970_v42  ;;  %v12988_v42 = vld [vmem:[#allocation47_spill] sm:$0xff] }
 0x18d   :  { %2293 = vmatprep.mubr.f32.mxu0 %v12959_v45  ;;  %2421 = vmatpush2.msra.mxu1 %v9636_v6  ;;  %v12966_v45 = vand.u32 4294901760, %v12869_v57  ;;  %v12973_v57 = vld [vmem:[#allocation37_spill] sm:$0xff] }
 0x18e   :  { %2470 = vmatpush1.msra.mxu0 %v12960_v1  ;;  %2423 = vmatprep.subr.mxu1 %v9643_v5  ;;  %v12972_v1 = vld [vmem:[#allocation108_spill] sm:$0xff] }
 0x18f   :  { %2296 = vmatmul.mubr.f32.gmra.mxu0 %v12961_v11  ;;  %2474 = vmatprep.subr.mxu0 %v12962_v17  ;;  %v12974_v11 = vand.u32 4294901760, %v12973_v57  ;;  %v12975_v17 = vld [vmem:[#allocation74_spill] sm:$0xff]  ;;  %v12992_v57 = vld [vmem:[#allocation51_spill] sm:$0xff] }
 0x190   :  { %2425 = vmatpush2.msra.mxu1 %v9653_v27  ;;  %2478 = vmatpush1.msra.mxu0 %v12963_v25 }
 0x191   :  { %2427 = vmatprep.subr.mxu1 %v9660_v47  ;;  %2482 = vmatprep.subr.mxu0 %v12964_v37  ;;  %v12981_v37 = vld [vmem:[#allocation78_spill] sm:$0xff] }
 0x192   :  { %2429 = vmatpush2.msra.mxu1 %v9673_v40  ;;  %2433 = vmatprep.mubr.f32.mxu1 %v12965_v35 }
 0x193   :  { %2486 = vmatpush1.msra.mxu0 %v12966_v45  ;;  %2437 = vmatmul.mubr.f32.vlgmr.msra.gmra.mxu1 %v12967_v18  ;;  %v12984_v45 = vld [vmem:[#allocation80_spill] sm:$0xff]  ;;  %v12985_v18 = vld [vmem:[#allocation19_spill] sm:$0xff] }
 0x194   :  { %2490 = vmatprep.subr.mxu0 %v12968_v49  ;;  %2729 = vmatprep.subr.mxu1 %v12872_v62  ;;  %v12977_v62 = vld [vmem:[#allocation39_spill] sm:$0xff]  ;;  %v12986_v49 = vand.u32 4294901760, %v12985_v18 }
 0x195   :  { %2494 = vmatpush1.msra.mxu0 %v12969_v22  ;;  %2731 = vmatpush1.msra.mxu1 %v12874_v61  ;;  %v12978_v25 = vand.u32 4294901760, %v12977_v62  ;;  %v12980_v61 = vand.u32 4294901760, %v12979_v43  ;;  %v12987_v22 = vld [vmem:[#allocation82_spill] sm:$0xff]  ;;  %v12998_v43 = vld [vmem:[#allocation25_spill] sm:$0xff] }
 0x196   :  { %2498 = vmatprep.subr.mxu0 %v12971_v12  ;;  %2733 = vmatprep.subr.mxu1 %v12876_v29  ;;  %v12982_v29 = vld [vmem:[#allocation43_spill] sm:$0xff]  ;;  %v12989_v12 = vand.u32 4294901760, %v12988_v42 }
 0x197   :  { %2445 = vmatprep.mubr.f32.mxu1 %v12972_v1  ;;  %2502 = vmatpush1.msra.mxu0 %v12974_v11  ;;  %v12983_v35 = vand.u32 4294901760, %v12982_v29  ;;  %v12991_v1 = vld [vmem:[#allocation90_spill] sm:$0xff]  ;;  %v12993_v11 = vand.u32 4294901760, %v12992_v57  ;;  %v13003_v29 = vld [vmem:[#allocation61_spill] sm:$0xff] }
 0x198   :  { %2735 = vmatpush1.msra.mxu1 %v12975_v17  ;;  %2506 = vmatprep.subr.mxu0 %v12978_v25  ;;  %v12994_v17 = vld [vmem:[#allocation12_spill] sm:$0xff]  ;;  %v12997_v25 = vld [vmem:[#allocation31_spill] sm:$0xff] }
 0x199   :  { %2449 = vmatmul.mubr.f32.gmra.mxu1 %v12976_v30  ;;  %2737 = vmatprep.subr.mxu1 %v12880_v34  ;;  %v12990_v34 = vand.u32 4294901760, %v12888_v4  ;;  %v12995_v30 = vld [vmem:[#allocation23_spill] sm:$0xff] }
 0x19a   :  { %2510 = vmatpush1.msra.mxu0 %v12980_v61  ;;  %2739 = vmatpush1.msra.mxu1 %v12981_v37  ;;  %v12996_v62 = vand.u32 4294901760, %v12995_v30  ;;  %v12999_v61 = vand.u32 4294901760, %v12998_v43  ;;  %v13002_v37 = vld [vmem:[#allocation35_spill] sm:$0xff]  ;;  %v13017_v30 = vld [vmem:[#allocation20_spill] sm:$0xff] }
 0x19b   :  { %2514 = vmatprep.subr.mxu0 %v12983_v35  ;;  %2741 = vmatprep.subr.mxu1 %v12984_v45  ;;  %v13004_v35 = vand.u32 4294901760, %v13003_v29  ;;  %v13005_v45 = vld [vmem:[#allocation59_spill] sm:$0xff] }
 0x19c   :  { %2518 = vmatpush1.msra.mxu0 %v12986_v49  ;;  %2743 = vmatpush1.msra.mxu1 %v12987_v22  ;;  %v13006_v18 = vand.u32 4294901760, %v13005_v45  ;;  %v13007_v49 = vld [vmem:[#allocation16_spill] sm:$0xff]  ;;  %v13008_v22 = vld [vmem:[#allocation65_spill] sm:$0xff] }
 0x19d   :  { %2522 = vmatprep.subr.mxu0 %v12989_v12  ;;  %2745 = vmatprep.subr.mxu1 %v12887_v48  ;;  %v13000_v48 = vld [vmem:[#allocation55_spill] sm:$0xff]  ;;  %v13009_v42 = vand.u32 4294901760, %v13008_v22  ;;  %v13027_v45 = vld [vmem:[#allocation53_spill] sm:$0xff] }
 0x19e   :  { %2526 = vmatpush1.msra.mxu0 %v12990_v34  ;;  %2747 = vmatpush1.msra.mxu1 %v12991_v1  ;;  %v13001_v4 = vand.u32 4294901760, %v13000_v48  ;;  %v9956_v34 = vpop.f32.mrf.mxu0  ;;  %v13012_v1 = vld [vmem:[#allocation36_spill] sm:$0xff]  ;;  %v13023_v48 = vld [vmem:[#allocation79_spill] sm:$0xff] }
 0x19f   :  { %2530 = vmatprep.subr.mxu0 %v12993_v11  ;;  %2749 = vmatprep.subr.mxu1 %v12994_v17  ;;  %v13013_v57 = vand.u32 4294901760, %v13012_v1  ;;  %v13015_v11 = vld [vmem:[#allocation67_spill] sm:$0xff] }
 0x1a0   :  { %2534 = vmatpush1.msra.mxu0 %v12996_v62  ;;  %2751 = vmatpush1.msra.mxu1 %v12997_v25  ;;  %v13016_v17 = vand.u32 4294901760, %v13015_v11  ;;  %v13018_v62 = vld [vmem:[#allocation71_spill] sm:$0xff] }
 0x1a1   :  { %2538 = vmatprep.subr.mxu0 %v12999_v61  ;;  %2753 = vmatprep.subr.mxu1 %v12894_v56  ;;  %v13010_v56 = vld [vmem:[#allocation63_spill] sm:$0xff]  ;;  %v13019_v25 = vand.u32 4294901760, %v13018_v62  ;;  %v9970_v61 = vpop.f32.mrf.mxu0  ;;  %v13042_v62 = vld [vmem:[#allocation32_spill] sm:$0xff] }
 0x1a2   :  { %2542 = vmatpush1.msra.mxu0 %v13001_v4  ;;  %2755 = vmatpush1.msra.mxu1 %v13002_v37  ;;  %v13011_v12 = vand.u32 4294901760, %v13010_v56  ;;  %v13024_v4 = vand.u32 4294901760, %v13023_v48  ;;  %v13025_v37 = vld [vmem:[#allocation40_spill] sm:$0xff]  ;;  %v13047_v48 = vld [vmem:[#allocation34_spill] sm:$0xff] }
 0x1a3   :  { %2546 = vmatprep.subr.mxu0 %v13004_v35  ;;  %2757 = vmatprep.subr.mxu1 %v8957_v13  ;;  %v13014_v13 = vld [vmem:[#allocation45_spill] sm:$0xff]  ;;  %v13026_v29 = vand.u32 4294901760, %v13025_v37  ;;  %v9978_v35 = vpop.f32.mrf.mxu0 }
 0x1a4   :  { %2550 = vmatpush1.msra.mxu0 %v13006_v18  ;;  %2759 = vmatpush1.msra.mxu1 %v13007_v49  ;;  %v13030_v49 = vld [vmem:[#allocation44_spill] sm:$0xff] }
 0x1a5   :  { %2554 = vmatprep.subr.mxu0 %v13009_v42  ;;  %2761 = vmatprep.subr.mxu1 %v12900_v52  ;;  %v13020_v52 = vld [vmem:[#allocation38_spill] sm:$0xff]  ;;  %v13031_v22 = vand.u32 4294901760, %v13030_v49  ;;  %v13032_v42 = vld [vmem:[#allocation52_spill] sm:$0xff] }
 0x1a6   :  { %2558 = vmatpush1.msra.mxu0 %v13011_v12  ;;  %2763 = vmatpush1.msra.mxu1 %v12902_v24  ;;  %v13021_v43 = vand.u32 4294901760, %v13020_v52  ;;  %v13022_v24 = vld [vmem:[#allocation22_spill] sm:$0xff]  ;;  %v13033_v56 = vand.u32 4294901760, %v13032_v42  ;;  %v13035_v12 = vld [vmem:[#allocation48_spill] sm:$0xff]  ;;  %v13055_v42 = vld [vmem:[#allocation77_spill] sm:$0xff] }
 0x1a7   :  { %2562 = vmatprep.subr.mxu0 %v13013_v57  ;;  %2765 = vmatprep.subr.mxu1 %v13014_v13  ;;  %v13036_v1 = vand.u32 4294901760, %v13035_v12  ;;  %v9992_v57 = vpop.f32.mrf.mxu0  ;;  %v13037_v13 = vld [vmem:[#allocation87_spill] sm:$0xff]  ;;  %v13053_v49 = vld [vmem:[#allocation110_spill] sm:$0xff] }
 0x1a8   :  { %2566 = vmatpush1.msra.mxu0 %v13016_v17  ;;  %2767 = vmatpush1.msra.mxu1 %v13017_v30  ;;  %v13038_v11 = vand.u32 4294901760, %v13037_v13  ;;  %v13039_v17 = vld [vmem:[#allocation30_spill] sm:$0xff] }
 0x1a9   :  { %2570 = vmatprep.subr.mxu0 %v13019_v25  ;;  %2769 = vmatprep.subr.mxu1 %v12906_v7  ;;  %v13028_v7 = vld [vmem:[#allocation81_spill] sm:$0xff]  ;;  %v13040_v30 = vld [vmem:[#allocation86_spill] sm:$0xff] }
 0x1aa   :  { %2574 = vmatpush1.msra.mxu0 %v13021_v43  ;;  %2771 = vmatpush1.msra.mxu1 %v13022_v24  ;;  %v13029_v18 = vand.u32 4294901760, %v13028_v7  ;;  %v13043_v25 = vld [vmem:[#allocation93_spill] sm:$0xff]  ;;  %v13045_v43 = vld [vmem:[#allocation56_spill] sm:$0xff] }
 0x1ab   :  { %2578 = vmatprep.subr.mxu0 %v13024_v4  ;;  %2773 = vmatprep.subr.mxu1 %v12909_v2  ;;  %v13034_v2 = vld [vmem:[#allocation28_spill] sm:$0xff]  ;;  %v13044_v52 = vand.u32 4294901760, %v13043_v25  ;;  %v13046_v24 = vand.u32 4294901760, %v13045_v43  ;;  %v13048_v4 = vld [vmem:[#allocation70_spill] sm:$0xff] }
 0x1ac   :  { %2582 = vmatpush1.msra.mxu0 %v13026_v29  ;;  %2775 = vmatpush1.msra.mxu1 %v13027_v45  ;;  %v13049_v37 = vand.u32 4294901760, %v13048_v4  ;;  %v13050_v45 = vld [vmem:[#allocation62_spill] sm:$0xff] }
 0x1ad   :  { %2586 = vmatprep.subr.mxu0 %v13029_v18  ;;  %2777 = vmatprep.subr.mxu1 %v12912_v20  ;;  %v730_v20 = vpop.f32.mrf.mxu1  ;;  %v13051_v7 = vand.u32 4294901760, %v13050_v45  ;;  %v13052_v18 = vld [vmem:[#allocation73_spill] sm:$0xff]  ;;  %v13074_v45 = vld [vmem:[#allocation126_spill] sm:$0xff] }
 0x1ae   :  { %2590 = vmatpush2.msra.mxu0 %v13031_v22  ;;  %2779 = vmatpush1.msra.mxu1 %v12914_v15  ;;  %v13041_v15 = vand.u32 4294901760, %v13040_v30  ;;  %v13054_v22 = vand.u32 4294901760, %v13053_v49 }
 0x1af   :  { %2594 = vmatprep.subr.mxu0 %v13033_v56  ;;  %2781 = vmatprep.subr.mxu1 %v13034_v2  ;;  %v732_v29 = vpop.f32.mrf.mxu1  ;;  %v13056_v56 = vld [vmem:[#allocation100_spill] sm:$0xff] }
 0x1b0   :  { %2598 = vmatpush2.msra.mxu0 %v13036_v1  ;;  %2783 = vmatpush1.msra.mxu1 %v12917_v50  ;;  %v941_v50 = vpop.f32.mrf.mxu0  ;;  %v13057_v2 = vand.u32 4294901760, %v13056_v56  ;;  %v13058_v1 = vld [vmem:[#allocation112_spill] sm:$0xff]  ;;  %v13081_v56 = vld [vmem:[#allocation127_spill] sm:$0xff] }
 0x1b1   :  { %2602 = vmatprep.subr.mxu0 %v13038_v11  ;;  %2785 = vmatprep.subr.mxu1 %v13039_v17  ;;  %v13059_v13 = vand.u32 4294901760, %v13058_v1  ;;  %v13062_v17 = vld [vmem:[#allocation118_spill] sm:$0xff] }
 0x1b2   :  { %2606 = vmatpush2.msra.mxu0 %v13041_v15  ;;  %2787 = vmatpush1.msra.mxu1 %v13042_v62  ;;  %v943_v12 = vpop.f32.mrf.mxu0  ;;  %v13063_v30 = vand.u32 4294901760, %v13062_v17  ;;  %v13064_v62 = vld [vmem:[#allocation114_spill] sm:$0xff]  ;;  %v13085_v17 = vand.u32 4294901760, %v9634_v54 }
 0x1b3   :  { %2610 = vmatprep.subr.mxu0 %v13044_v52  ;;  %2789 = vmatprep.subr.mxu1 %v12921_v55  ;;  %v738_v55 = vpop.f32.mrf.mxu1  ;;  %v13065_v25 = vand.u32 4294901760, %v13064_v62  ;;  %v13066_v52 = vld [vmem:[#allocation123_spill] sm:$0xff] }
 0x1b4   :  { %2614 = vmatpush2.msra.mxu0 %v13046_v24  ;;  %2791 = vmatpush1.msra.mxu1 %v13047_v48  ;;  %v13067_v43 = vand.u32 4294901760, %v13066_v52  ;;  %v13068_v24 = vld [vmem:[#allocation119_spill] sm:$0xff]  ;;  %v13070_v48 = vld [vmem:[#allocation124_spill] sm:$0xff] }
 0x1b5   :  { %2618 = vmatprep.subr.mxu0 %v13049_v37  ;;  %2793 = vmatprep.subr.mxu1 %v12924_v32  ;;  %v13060_v32 = vld [vmem:[#allocation111_spill] sm:$0xff]  ;;  %v740_v15 = vpop.f32.mrf.mxu1  ;;  %v13071_v4 = vand.u32 4294901760, %v13070_v48 }
 0x1b6   :  { %2622 = vmatpush2.msra.mxu0 %v13051_v7  ;;  %2795 = vmatpush2.msra.mxu1 %v13052_v18  ;;  %v13061_v11 = vand.u32 4294901760, %v13060_v32  ;;  %v13075_v7 = vand.u32 4294901760, %v13074_v45  ;;  %v13076_v18 = vld [vmem:[#allocation125_spill] sm:$0xff] }
 0x1b7   :  { %2626 = vmatprep.subr.mxu0 %v13054_v22  ;;  %2797 = vmatprep.subr.mxu1 %v13055_v42  ;;  %v13077_v49 = vand.u32 4294901760, %v13076_v18  ;;  %v13079_v22 = vand.u32 4294901760, %v9629_v44  ;;  %v13080_v42 = vld [vmem:[#allocation84_spill] sm:$0xff]  ;;  %v2874_v44 = vld [vmem:[%s11769_s1 + $0x8] sm:$0xff] }
 0x1b8   :  { %2630 = vmatpush2.msra.mxu0 %v13057_v2  ;;  %2799 = vmatpush2.msra.mxu1 %v12929_v21  ;;  %v951_v21 = vpop.f32.mrf.mxu0  ;;  %v13082_v2 = vand.u32 4294901760, %v13081_v56  ;;  %v2882_v54 = vsel %vm2877_vm0, %v2874_v44, 0 }
 0x1b9   :  { %2634 = vmatprep.subr.mxu0 %v13059_v13  ;;  %2801 = vmatprep.subr.mxu1 %v12930_v23  ;;  %v1092_v23 = vpop.f32.mrf.mxu1  ;;  %v731_v13 = vadd.f32 %v730_v20, %v9956_v34  ;;  %v10095_v48 = vand.u32 4294901760, %v2882_v54 }
 0x1ba   :  { %2638 = vmatpush2.msra.mxu0 %v13061_v11  ;;  %2803 = vmatpush2.msra.mxu1 %v12932_v26  ;;  %v13069_v26 = vand.u32 4294901760, %v13068_v24 }
 0x1bb   :  { %2642 = vmatprep.subr.mxu0 %v13063_v30  ;;  %2805 = vmatprep.subr.mxu1 %v12933_v10  ;;  %v13072_v10 = vld [vmem:[#allocation121_spill] sm:$0xff]  ;;  %v733_v30 = vadd.f32 %v732_v29, %v9970_v61  ;;  %v942_v62 = vadd.f32 %v941_v50, %v731_v13  ;;  %v13088_v50 = vld [vmem:[#allocation116_spill] sm:$0xff]  ;;  %v12193_v13 = vmov 0.0  }
 0x1bc   :  { %2646 = vmatpush2.msra.mxu0 %v13065_v25  ;;  %2807 = vmatpush2.msra.mxu1 %v12935_v41  ;;  %v13073_v37 = vand.u32 4294901760, %v13072_v10  ;;  %v953_v41 = vpop.f32.mrf.mxu0  ;;  %v739_v25 = vadd.f32 %v738_v55, %v9978_v35  ;;  %v741_v35 = vadd.f32 %v740_v15, %v9992_v57  ;;  %v13096_v10 = vld [vmem:[#allocation96_spill] sm:$0xff] }
 0x1bd   :  { %2650 = vmatprep.subr.mxu0 %v13067_v43  ;;  %2809 = vmatprep.subr.mxu1 %v12937_v3  ;;  %v2873_v3 = vld [vmem:[%s11769_s1] sm:$0xff]  ;;  %v944_v52 = vadd.f32 %v943_v12, %v733_v30  ;;  %v1093_v61 = vadd.f32 %v1092_v23, %v942_v62  ;;  %v13092_v12 = vld [vmem:[#allocation120_spill] sm:$0xff] }
 0x1be   :  { %2654 = vmatpush2.msra.mxu0 %v13069_v26  ;;  %2811 = vmatpush2.msra.mxu1 %v12938_v38  ;;  %v1094_v38 = vpop.f32.mrf.mxu1  ;;  %v2879_v1 = vsel %vm2877_vm0, %v2873_v3, 0  ;;  %v13093_v43 = vld [vmem:[#allocation130_spill] sm:$0xff]  ;;  %v952_v57 = vadd.f32 %v951_v21, %v739_v25 }
 0x1bf   :  { %2658 = vmatprep.subr.mxu0 %v13071_v4  ;;  %2813 = vmatprep.subr.mxu1 %v12939_v9  ;;  %v13078_v9 = vld [vmem:[#allocation95_spill] sm:$0xff]  ;;  %v10072_v20 = vand.u32 4294901760, %v2879_v1  ;;  %v1095_v55 = vadd.f32 %v1094_v38, %v944_v52  ;;  %v13094_v23 = vand.u32 4294901760, %v13093_v43  ;;  %v13097_v38 = vld [vmem:[#allocation97_spill] sm:$0xff] }
 0x1c0   :  { %2662 = vmatpush2.msra.mxu0 %v13073_v37  ;;  %2815 = vmatpush2.msra.mxu1 %v12940_v31  ;;  %v1369_v31 = vpop.f32.mrf.mxu0  ;;  %v1104_v11 = vpop.f32.mrf.mxu1 }
 0x1c1   :  { %2666 = vmatprep.subr.mxu0 %v13075_v7  ;;  %2817 = vmatprep.subr.mxu1 %v12941_v19  ;;  %v13083_v19 = vld [vmem:[#allocation128_spill] sm:$0xff]  ;;  %v10093_v26 = vsub.f32 %v2879_v1, %v10072_v20  ;;  %v954_v7 = vadd.f32 %v953_v41, %v741_v35  ;;  %v1105_v3 = vadd.f32 %v1104_v11, %v952_v57 }
 0x1c2   :  { %2670 = vmatpush2.msra.mxu0 %v13077_v49  ;;  %2819 = vmatpush2.msra.mxu1 %v13078_v9  ;;  %v13084_v32 = vand.u32 4294901760, %v13083_v19  ;;  %v1371_v34 = vpop.f32.mrf.mxu0  ;;  %v1106_v29 = vpop.f32.mrf.mxu1  ;;  %v10114_v41 = vsub.f32 %v2882_v54, %v10095_v48 }
 0x1c3   :  { %2674 = vmatprep.subr.mxu0 %v13079_v22  ;;  %2821 = vmatprep.subr.mxu1 %v13080_v42  ;;  %v1372_v37 = vadd.f32 %v1371_v34, %v1095_v55 }
 0x1c4   :  { %2678 = vmatpush2.msra.mxu0 %v13082_v2  ;;  %2823 = vmatpush2.msra.mxu1 %v12944_v16  ;;  %v13086_v16 = vand.u32 4294901760, %v9664_v36  ;;  %v2875_v36 = vld [vmem:[%s11769_s1 + $0x10] sm:$0xff]  ;;  %v1377_v24 = vpop.f32.mrf.mxu0  ;;  %v10133_v19 = vand.u32 4294901760, %v10114_v41 }
 0x1c5   :  { %2682 = vmatprep.subr.mxu0 %v13084_v32  ;;  %2825 = vmatprep.subr.mxu1 %v12945_v0  ;;  %v13087_v0 = vand.u32 4294901760, %v9668_v53  ;;  %v2885_v4 = vsel %vm2877_vm0, %v2875_v36, 0  ;;  %v1378_v22 = vadd.f32 %v1377_v24, %v1105_v3 }
 0x1c6   :  { %2686 = vmatpush2.msra.mxu0 %v13085_v17  ;;  %2827 = vmatpush2.msra.mxu1 %v12946_v28  ;;  %v13089_v28 = vand.u32 4294901760, %v9682_v39  ;;  %v1370_v39 = vadd.f32 %v1369_v31, %v1093_v61  ;;  %v1514_v15 = vpop.f32.mrf.mxu1  ;;  %v1379_v18 = vpop.f32.mrf.mxu0  ;;  %v10116_v9 = vand.u32 4294901760, %v2885_v4 }
 0x1c7   :  { %2690 = vmatprep.subr.mxu0 %v13086_v16  ;;  %2829 = vmatprep.subr.mxu1 %v12947_v51  ;;  %v13090_v51 = vld [vmem:[#allocation129_spill] sm:$0xff]  ;;  %v2973_v16 = vsub.f32 %v10114_v41, %v10133_v19 }
 0x1c8   :  { %2694 = vmatpush2.msra.mxu0 %v13087_v0  ;;  %2831 = vmatpush2.msra.mxu1 %v13088_v50  ;;  %v13091_v53 = vand.u32 4294901760, %v13090_v51  ;;  %v1515_v45 = vadd.f32 %v1514_v15, %v1370_v39  ;;  %v1516_v21 = vpop.f32.mrf.mxu1  ;;  %v10136_v32 = vsub.f32 %v2885_v4, %v10116_v9 }
 0x1c9   :  { %2698 = vmatprep.subr.mxu0 %v13089_v28  ;;  %2833 = vmatprep.subr.mxu1 %v12951_v14  ;;  %v13095_v14 = vand.u32 4294901760, %v9702_v58  ;;  %v13098_v58 = vld [vmem:[#allocation11_spill] sm:$0xff]  ;;  %v1517_v49 = vadd.f32 %v1516_v21, %v1372_v37  ;;  %v10169_v28 = vand.u32 4294901760, %v2973_v16 }
 0x1ca   :  { %2702 = vmatpush2.msra.mxu0 %v13091_v53  ;;  %2835 = vmatpush2.msra.mxu1 %v13092_v12  ;;  %v10158_v34 = vand.u32 4294901760, %v10136_v32 }
 0x1cb   :  { %2706 = vmatprep.subr.mxu0 %v13094_v23  ;;  %2837 = vmatprep.subr.mxu1 %v9587_v59  ;;  %v2876_v59 = vld [vmem:[%s11769_s1 + $0x18] sm:$0xff]  ;;  %v10123_v31 = vand.u32 4294901760, %v1517_v49  ;;  %v1522_v42 = vpop.f32.mrf.mxu1 }
 0x1cc   :  { %2710 = vmatpush2.msra.mxu0 %v13095_v14  ;;  %2712 = vmatprep.mubr.f32.mxu0 %v13096_v10  ;;  %v2888_v56 = vsel %vm2877_vm0, %v2876_v59, 0  ;;  %v1523_v1 = vadd.f32 %v1522_v42, %v1378_v22 }
 0x1cd   :  { %2839 = vmatpush2.msra.mxu1 %v9578_v63  ;;  %2714 = vmatmul.mubr.f32.vlgmr.msra.gmra.mxu0 %v13097_v38  ;;  %v10111_v63 = vand.u32 4294901760, %v10093_v26  ;;  %v10144_v11 = vand.u32 4294901760, %v2888_v56 }
 0x1ce   :  { %2841 = vmatprep.subr.mxu1 %v9608_v46  ;;  %2720 = vmatprep.mubr.f32.mxu0 %v13098_v58  ;;  %v1107_v46 = vadd.f32 %v1106_v29, %v954_v7  ;;  %v10142_v44 = vand.u32 4294901760, %v1523_v1  ;;  %v2984_v29 = vsub.f32 %v10136_v32, %v10158_v34 }
 0x1cf   :  { %2843 = vmatpush2.msra.mxu1 %v9604_v33  ;;  %2857 = vmatprep.mubr.f32.mxu1 %v13096_v10  ;;  %v10121_v33 = vand.u32 4294901760, %v1515_v45  ;;  %v10162_v54 = vsub.f32 %v2888_v56, %v10144_v11 }
 0x1d0   :  { %2845 = vmatprep.subr.mxu1 %v9625_v8  ;;  %v1380_v2 = vadd.f32 %v1379_v18, %v1107_v46  ;;  %v1524_v8 = vpop.f32.mrf.mxu1  ;;  %v3038_v30 = vsub.f32 %v1523_v1, %v10142_v44  ;;  %v10184_v43 = vand.u32 4294901760, %v2984_v29 }
 0x1d1   :  { %2847 = vmatpush2.msra.mxu1 %v9636_v6  ;;  %2722 = vmatmul.mubr.f32.gmra.mxu0 %v12956_v60  ;;  %v2962_v6 = vsub.f32 %v10093_v26, %v10111_v63  ;;  %v10148_v17 = vsub.f32 %v1515_v45, %v10121_v33 }
 0x1d2   :  { %2849 = vmatprep.subr.mxu1 %v9643_v5  ;;  %2958 = vmatprep.mubr.f32.mxu0 %v12193_v13  ;;  %v10140_v5 = vsub.f32 %v1517_v49, %v10123_v31  ;;  %v3039_v25 = vand.u32 4294901760, %v3038_v30 }
 0x1d3   :  { %2851 = vmatpush2.msra.mxu1 %v9653_v27  ;;  %v1525_v27 = vadd.f32 %v1524_v8, %v1380_v2  ;;  %v3051_v52 = vand.u32 4294901760, %v10148_v17 }
 0x1d4   :  { %2853 = vmatprep.subr.mxu1 %v9660_v47  ;;  %v10153_v47 = vand.u32 4294901760, %v2962_v6  ;;  %v3045_v0 = vand.u32 4294901760, %v10140_v5  ;;  %v3040_v50 = vsub.f32 %v3038_v30, %v3039_v25 }
 0x1d5   :  { %2855 = vmatpush2.msra.mxu1 %v9673_v40  ;;  %v2918_v62 = vand.u32 4294901760, %v1525_v27  ;;  %v3052_v51 = vsub.f32 %v10148_v17, %v3051_v52 }
 0x1d6   :  { %2859 = vmatmul.mubr.f32.vlgmr.msra.gmra.mxu1 %v13097_v38  ;;  %v3046_v35 = vsub.f32 %v10140_v5, %v3045_v0  ;;  %v3041_v55 = vand.u32 4294901760, %v3040_v50 }
 0x1d7   :  { %2865 = vmatprep.mubr.f32.mxu1 %v13098_v58  ;;  %v3032_v40 = vsub.f32 %v1525_v27, %v2918_v62  ;;  %2919 = vmatprep.subr.mxu0 %v2918_v62  ;;  %v3053_v39 = vand.u32 4294901760, %v3052_v51 }
 0x1d8   :  { %2921 = vmatpush1.msra.mxu0 %v10142_v44  ;;  %v3047_v12 = vand.u32 4294901760, %v3046_v35 }
 0x1d9   :  { %2923 = vmatprep.subr.mxu0 %v10123_v31  ;;  %v3033_v61 = vand.u32 4294901760, %v3032_v40 }
 0x1da   :  { %2867 = vmatmul.mubr.f32.gmra.mxu1 %v12956_v60  ;;  %2925 = vmatpush1.msra.mxu0 %v10121_v33  ;;  %v10177_v60 = vand.u32 4294901760, %v10162_v54 }
 0x1db   :  { %3087 = vmatprep.mubr.f32.mxu1 %v12193_v13  ;;  %2964 = vmatmul.mubr.f32.vlgmr.msra.gmra.mxu0 %v10153_v47  ;;  %v3034_v36 = vsub.f32 %v3032_v40, %v3033_v61 }
 0x1dc   :  { %3146 = vmatprep.subr.mxu0 %v3032_v40  ;;  %2969 = vmatprep.mubr.f32.mxu0 %v12193_v13  ;;  %v2995_v23 = vsub.f32 %v10162_v54, %v10177_v60 }
 0x1dd   :  { %3149 = vmatpush1.msra.mxu0 %v3038_v30  ;;  %v3035_v53 = vand.u32 4294901760, %v3034_v36 }
 0x1de   :  { %3152 = vmatprep.subr.mxu0 %v10140_v5  ;;  %v10191_v24 = vand.u32 4294901760, %v2995_v23 }
 0x1df   :  { %3155 = vmatpush1.msra.mxu0 %v10148_v17  ;;  %3036 = vmatprep.subr.mxu1 %v3035_v53 }
 0x1e0   :  { %2975 = vmatmul.mubr.f32.gmra.mxu0 %v10169_v28  ;;  %3357 = vmatprep.subr.mxu0 %v3033_v61 }
 0x1e1   :  { %3042 = vmatpush1.msra.mxu1 %v3041_v55  ;;  %2980 = vmatprep.mubr.f32.mxu0 %v12193_v13 }
 0x1e2   :  { %3048 = vmatprep.subr.mxu1 %v3047_v12 }
 0x1e3   :  { %3054 = vmatpush1.msra.mxu1 %v3053_v39 }
 0x1e4   :  { %2986 = vmatmul.mubr.f32.gmra.mxu0 %v10184_v43  ;;  %3089 = vmatmul.mubr.f32.vlgmr.msra.gmra.mxu1 %v10072_v20 }
 0x1e5   :  { %3250 = vmatprep.subr.mxu1 %v2918_v62  ;;  %2991 = vmatprep.mubr.f32.mxu0 %v12193_v13 }
 0x1e6   :  { %3252 = vmatpush1.msra.mxu1 %v10142_v44  ;;  %3094 = vmatprep.mubr.f32.mxu1 %v12193_v13 }
 0x1e7   :  { %3254 = vmatprep.subr.mxu1 %v10123_v31 }
 0x1e8   :  { %3256 = vmatpush1.msra.mxu1 %v10121_v33  ;;  %2997 = vmatmul.mubr.f32.gmra.mxu0 %v10191_v24 }
 0x1e9   :  { %3096 = vmatmul.mubr.f32.gmra.mxu1 %v10095_v48  ;;  %3460 = vmatprep.subr.mxu1 %v2918_v62 }
 0x1ea   :  { %3101 = vmatprep.mubr.f32.mxu1 %v12193_v13  ;;  %3188 = vmatprep.mubr.f32.mxu0 %v12193_v13 }
 0x1ec   :  { %3191 = vmatmul.mubr.f32.vlgmr.msra.gmra.mxu0 %v10093_v26 }
 0x1ed   :  { %3103 = vmatmul.mubr.f32.gmra.mxu1 %v10116_v9  ;;  %3361 = vmatpush1.msra.mxu0 %v3039_v25 }
 0x1ee   :  { %3365 = vmatprep.subr.mxu0 %v3045_v0  ;;  %3108 = vmatprep.mubr.f32.mxu1 %v12193_v13 }
 0x1ef   :  { %3369 = vmatpush1.msra.mxu0 %v3051_v52  ;;  %3196 = vmatprep.mubr.f32.mxu0 %v12193_v13 }
 0x1f0   :  { %3199 = vmatmul.mubr.f32.gmra.mxu0 %v10114_v41 }
 0x1f1   :  { %3110 = vmatmul.mubr.f32.gmra.mxu1 %v10144_v11  ;;  %3204 = vmatprep.mubr.f32.mxu0 %v12193_v13 }
 0x1f2   :  { %3289 = vmatprep.mubr.f32.mxu1 %v12193_v13 }
 0x1f4   :  { %3207 = vmatmul.mubr.f32.gmra.mxu0 %v10136_v32 }
 0x1f5   :  { %3293 = vmatmul.mubr.f32.vlgmr.msra.gmra.mxu1 %v10111_v63  ;;  %3212 = vmatprep.mubr.f32.mxu0 %v12193_v13 }
 0x1f6   :  { %3462 = vmatpush1.msra.mxu1 %v10142_v44  ;;  %3298 = vmatprep.mubr.f32.mxu1 %v12193_v13 }
 0x1f7   :  { %3464 = vmatprep.subr.mxu1 %v10123_v31 }
 0x1f8   :  { %3466 = vmatpush1.msra.mxu1 %v10121_v33  ;;  %3215 = vmatmul.mubr.f32.gmra.mxu0 %v10162_v54 }
 0x1f9   :  { %3302 = vmatmul.mubr.f32.gmra.mxu1 %v10133_v19  ;;  %3402 = vmatprep.mubr.f32.mxu0 %v12193_v13 }
 0x1fa   :  { %3307 = vmatprep.mubr.f32.mxu1 %v12193_v13 }
 0x1fc   :  { %3404 = vmatmul.mubr.f32.vlgmr.msra.gmra.mxu0 %v10072_v20 }
 0x1fd   :  { %3311 = vmatmul.mubr.f32.gmra.mxu1 %v10158_v34  ;;  %3409 = vmatprep.mubr.f32.mxu0 %v12193_v13 }
 0x1fe   :  { %3316 = vmatprep.mubr.f32.mxu1 %v12193_v13 }
 0x200   :  { %3411 = vmatmul.mubr.f32.gmra.mxu0 %v10095_v48 }
 0x201   :  { %3320 = vmatmul.mubr.f32.gmra.mxu1 %v10177_v60  ;;  %3416 = vmatprep.mubr.f32.mxu0 %v12193_v13 }
 0x202   :  { %3499 = vmatprep.mubr.f32.mxu1 %v12193_v13 }
 0x204   :  { %3418 = vmatmul.mubr.f32.gmra.mxu0 %v10116_v9 }
 0x205   :  { %3501 = vmatmul.mubr.f32.vlgmr.msra.gmra.mxu1 %v10072_v20  ;;  %3423 = vmatprep.mubr.f32.mxu0 %v12193_v13 }
 0x206   :  { %3506 = vmatprep.mubr.f32.mxu1 %v12193_v13  ;;  %v1667_v57 = vpop.f32.mrf.mxu0 }
 0x208   :  { %3425 = vmatmul.mubr.f32.gmra.mxu0 %v10144_v11  ;;  %v1669_v14 = vpop.f32.mrf.mxu0 }
 0x209   :  { %3508 = vmatmul.mubr.f32.gmra.mxu1 %v10095_v48  ;;  %3596 = vmatprep.mubr.f32.mxu0 %v12193_v13 }
 0x20a   :  { %3513 = vmatprep.mubr.f32.mxu1 %v12193_v13 }
 0x20d   :  { %3515 = vmatmul.mubr.f32.gmra.mxu1 %v10116_v9 }
 0x20e   :  { %3520 = vmatprep.mubr.f32.mxu1 %v12193_v13  ;;  %v2076_v4 = vpop.f32.mrf.mxu1 }
 0x20f   :  { %v2077_v46 = vadd.f32 %v2076_v4, %v1667_v57 }
 0x210   :  { %v2078_v37 = vpop.f32.mrf.mxu1 }
 0x211   :  { %3522 = vmatmul.mubr.f32.gmra.mxu1 %v10144_v11  ;;  %v2079_v31 = vadd.f32 %v2078_v37, %v1669_v14 }
 0x212   :  { %3725 = vmatprep.mubr.f32.mxu1 %v12193_v13 }
 0x243   :  { %v1683_v15 = vpop.f32.mrf.mxu0 }
 0x245   :  { %v1685_v10 = vpop.f32.mrf.mxu0 }
 0x249   :  { %v2287_v45 = vpop.f32.mrf.mxu0 }
 0x24a   :  { %v2084_v7 = vpop.f32.mrf.mxu1  ;;  %v2288_v42 = vadd.f32 %v2287_v45, %v2077_v46 }
 0x24b   :  { %v2289_v3 = vpop.f32.mrf.mxu0  ;;  %v2085_v56 = vadd.f32 %v2084_v7, %v1683_v15 }
 0x24c   :  { %v2086_v38 = vpop.f32.mrf.mxu1  ;;  %v2290_v2 = vadd.f32 %v2289_v3, %v2079_v31 }
 0x24d   :  { %v2087_v1 = vadd.f32 %v2086_v38, %v1685_v10 }
 0x24f   :  { %v2297_v21 = vpop.f32.mrf.mxu0 }
 0x250   :  { %v2298_v44 = vadd.f32 %v2297_v21, %v2085_v56 }
 0x251   :  { %v2299_v58 = vpop.f32.mrf.mxu0 }
 0x252   :  { %v2300_v62 = vadd.f32 %v2299_v58, %v2087_v1 }
 0x253   :  { %v2438_v59 = vpop.f32.mrf.mxu1 }
 0x254   :  { %v2439_v8 = vadd.f32 %v2438_v59, %v2288_v42 }
 0x255   :  { %v2440_v18 = vpop.f32.mrf.mxu1 }
 0x256   :  { %v2441_v27 = vadd.f32 %v2440_v18, %v2290_v2 }
 0x259   :  { %v2450_v22 = vpop.f32.mrf.mxu1 }
 0x25a   :  { %v2451_v16 = vadd.f32 %v2450_v22, %v2298_v44 }
 0x25b   :  { %v2452_v6 = vpop.f32.mrf.mxu1 }
 0x25c   :  { %v2453_v61 = vadd.f32 %v2452_v6, %v2300_v62 }
 0x28d   :  { %v2715_v49 = vpop.f32.mrf.mxu0 }
 0x28e   :  { %v2716_v17 = vadd.f32 %v2715_v49, %v2439_v8 }
 0x28f   :  { %v2717_v33 = vpop.f32.mrf.mxu0 }
 0x290   :  { %v2718_v25 = vadd.f32 %v2717_v33, %v2441_v27 }
 0x291   :  { %v2723_v5 = vpop.f32.mrf.mxu0 }
 0x292   :  { %v2724_v50 = vadd.f32 %v2723_v5, %v2451_v16 }
 0x293   :  { %v2725_v0 = vpop.f32.mrf.mxu0 }
 0x294   :  { %v2726_v51 = vadd.f32 %v2725_v0, %v2453_v61 }
 0x296   :  { %v2860_v30 = vpop.f32.mrf.mxu1 }
 0x297   :  { %v2861_v40 = vadd.f32 %v2860_v30, %v2716_v17 }
 0x298   :  { %v2862_v52 = vpop.f32.mrf.mxu1 }
 0x299   :  { %v2863_v36 = vadd.f32 %v2862_v52, %v2718_v25  ;;  %v10241_v35 = vand.u32 4294901760, %v2861_v40 }
 0x29a   :  { %v2868_v29 = vpop.f32.mrf.mxu1 }
 0x29b   :  { %v10243_v53 = vand.u32 4294901760, %v2863_v36  ;;  %v2869_v55 = vadd.f32 %v2868_v29, %v2724_v50  ;;  %v10245_v23 = vpop.f32.mrf.mxu0  ;;  %v10253_v15 = vsub.f32 %v2861_v40, %v10241_v35 }
 0x29c   :  { %v2870_v12 = vpop.f32.mrf.mxu1 }
 0x29d   :  { %v10248_v39 = vsub.f32 %v2863_v36, %v10243_v53  ;;  %v10250_v57 = vand.u32 4294901760, %v2869_v55  ;;  %v2871_v14 = vadd.f32 %v2870_v12, %v2726_v51  ;;  %v10255_v4 = vpop.f32.mrf.mxu0  ;;  %v3689_v21 = vand.u32 4294901760, %v10253_v15 }
 0x29f   :  { %v10258_v10 = vsub.f32 %v2869_v55, %v10250_v57  ;;  %v3556_v37 = vand.u32 4294901760, %v2871_v14  ;;  %v3683_v38 = vand.u32 4294901760, %v10248_v39  ;;  %v3690_v31 = vsub.f32 %v10253_v15, %v3689_v21 }
 0x2a0   :  { %v10260_v45 = vpop.f32.mrf.mxu0 }
 0x2a1   :  { %v3677_v7 = vand.u32 4294901760, %v10258_v10  ;;  %v3670_v3 = vsub.f32 %v2871_v14, %v3556_v37  ;;  %3557 = vmatprep.subr.mxu0 %v3556_v37  ;;  %v3684_v33 = vsub.f32 %v10248_v39, %v3683_v38  ;;  %v3691_v5 = vand.u32 4294901760, %v3690_v31 }
 0x2a2   :  { %3559 = vmatpush1.msra.mxu0 %v10250_v57  ;;  %v10266_v59 = vpop.f32.mrf.mxu0 }
 0x2a3   :  { %3561 = vmatprep.subr.mxu0 %v10243_v53  ;;  %v3671_v58 = vand.u32 4294901760, %v3670_v3  ;;  %v3678_v18 = vsub.f32 %v10258_v10, %v3677_v7  ;;  %v3685_v8 = vand.u32 4294901760, %v3684_v33 }
 0x2a4   :  { %3563 = vmatpush1.msra.mxu0 %v10241_v35  ;;  %v10273_v49 = vpop.f32.mrf.mxu1  ;;  %v10275_v46 = vpop.f32.mrf.mxu0 }
 0x2a5   :  { %3602 = vmatmul.mubr.f32.vlgmr.msra.gmra.mxu0 %v10153_v47  ;;  %3784 = vmatprep.subr.mxu0 %v3670_v3  ;;  %v3672_v22 = vsub.f32 %v3670_v3, %v3671_v58  ;;  %v3679_v47 = vand.u32 4294901760, %v3678_v18  ;;  %v3091_v55 = vadd.f32 %v10273_v49, %v10245_v23 }
 0x2a6   :  { %3787 = vmatpush1.msra.mxu0 %v10258_v10  ;;  %3607 = vmatprep.mubr.f32.mxu0 %v12193_v13  ;;  %v3092_v42 = vpop.f32.mrf.mxu1  ;;  %v10284_v56 = vpop.f32.mrf.mxu0 }
 0x2a7   :  { %3790 = vmatprep.subr.mxu0 %v10248_v39  ;;  %v3673_v2 = vand.u32 4294901760, %v3672_v22  ;;  %v3093_v36 = vadd.f32 %v3092_v42, %v10255_v4 }
 0x2a8   :  { %3793 = vmatpush1.msra.mxu0 %v10253_v15  ;;  %v10288_v1 = vpop.f32.mrf.mxu0 }
 0x2a9   :  { %3613 = vmatmul.mubr.f32.gmra.mxu0 %v10169_v28  ;;  %3674 = vmatprep.subr.mxu1 %v3673_v2  ;;  %v3097_v6 = vpop.f32.mrf.mxu1 }
 0x2aa   :  { %3995 = vmatprep.subr.mxu0 %v3671_v58  ;;  %3680 = vmatpush1.msra.mxu1 %v3679_v47  ;;  %v10291_v44 = vpop.f32.mrf.mxu0  ;;  %v3098_v29 = vadd.f32 %v3097_v6, %v10260_v45 }
 0x2ab   :  { %3686 = vmatprep.subr.mxu1 %v3685_v8  ;;  %3618 = vmatprep.mubr.f32.mxu0 %v12193_v13  ;;  %v3099_v27 = vpop.f32.mrf.mxu1 }
 0x2ac   :  { %3692 = vmatpush1.msra.mxu1 %v3691_v5  ;;  %v3192_v17 = vpop.f32.mrf.mxu0  ;;  %v3100_v39 = vadd.f32 %v3099_v27, %v10266_v59 }
 0x2ad   :  { %3624 = vmatmul.mubr.f32.gmra.mxu0 %v10184_v43  ;;  %3727 = vmatmul.mubr.f32.vlgmr.msra.gmra.mxu1 %v10072_v20  ;;  %v3104_v30 = vpop.f32.mrf.mxu1 }
 0x2ae   :  { %3888 = vmatprep.subr.mxu1 %v3556_v37  ;;  %3629 = vmatprep.mubr.f32.mxu0 %v12193_v13  ;;  %v3194_v28 = vpop.f32.mrf.mxu0  ;;  %v3105_v23 = vadd.f32 %v3104_v30, %v10275_v46 }
 0x2af   :  { %3890 = vmatpush1.msra.mxu1 %v10250_v57  ;;  %3732 = vmatprep.mubr.f32.mxu1 %v12193_v13  ;;  %v3106_v62 = vpop.f32.mrf.mxu1  ;;  %v3195_v15 = vadd.f32 %v3194_v28, %v3093_v36 }
 0x2b0   :  { %3892 = vmatprep.subr.mxu1 %v10243_v53  ;;  %v3200_v16 = vpop.f32.mrf.mxu0 }
 0x2b1   :  { %3894 = vmatpush1.msra.mxu1 %v10241_v35  ;;  %3635 = vmatmul.mubr.f32.gmra.mxu0 %v10191_v24  ;;  %v3111_v43 = vpop.f32.mrf.mxu1  ;;  %v3201_v4 = vadd.f32 %v3200_v16, %v3098_v29  ;;  %v4198_v16 = vld [vmem:[%s11771_s3] sm:$0xff]  ;;  %s7595_s3 = smov [#allocation7]  }
 0x2b2   :  { %3734 = vmatmul.mubr.f32.gmra.mxu1 %v10095_v48  ;;  %4098 = vmatprep.subr.mxu1 %v3556_v37  ;;  %v3202_v25 = vpop.f32.mrf.mxu0  ;;  %v3193_v37 = vadd.f32 %v3192_v17, %v3091_v55  ;;  %s7084_s21 = sshll.u32 %s7595_s3, 4  ;;  %s7085_s21 = int_to_ptr.vmem [resolvable:$true] %s7084_s21 }
 0x2b3   :  { %3739 = vmatprep.mubr.f32.mxu1 %v12193_v13  ;;  %3826 = vmatprep.mubr.f32.mxu0 %v12193_v13  ;;  %v3113_v40 = vpop.f32.mrf.mxu1  ;;  %s7562_s22 = scalar_lea.vmem %s7085_s21, 128  ;;  %p7567_p11 = scmp.lt.s32.totalorder %s7085_s21, %s7085_s21 }
 0x2b4   :  { %v3208_v0 = vpop.f32.mrf.mxu0  ;;  %p7563_p10 = scmp.ne.s32.totalorder %s7085_s21, %s7562_s22  ;;  %p7568_p12 = scmp.lt.s32.totalorder %s7562_s22, %s7562_s22 }
 0x2b5   :  { %3829 = vmatmul.mubr.f32.vlgmr.msra.gmra.mxu0 %v10093_v26  ;;  %v3294_v52 = vpop.f32.mrf.mxu1  ;;  %v3209_v58 = vadd.f32 %v3208_v0, %v3105_v23 }
 0x2b6   :  { %3741 = vmatmul.mubr.f32.gmra.mxu1 %v10116_v9  ;;  %3999 = vmatpush1.msra.mxu0 %v3677_v7  ;;  %v3210_v24 = vpop.f32.mrf.mxu0  ;;  %v3203_v7 = vadd.f32 %v3202_v25, %v3100_v39  ;;  %p7569_p13 = por %p7568_p12, %p7567_p11 }
 0x2b7   :  { %4003 = vmatprep.subr.mxu0 %v3683_v38  ;;  %3746 = vmatprep.mubr.f32.mxu1 %v12193_v13  ;;  %v3296_v61 = vpop.f32.mrf.mxu1 }
 0x2b8   :  { %4007 = vmatpush1.msra.mxu0 %v3689_v21  ;;  %3834 = vmatprep.mubr.f32.mxu0 %v12193_v13  ;;  %v3216_v50 = vpop.f32.mrf.mxu0  ;;  %v3297_v38 = vadd.f32 %v3296_v61, %v3195_v15  ;;  %p7570_p0 = pnand %p7569_p13, %p7563_p10 }
 0x2b9   :  { %3837 = vmatmul.mubr.f32.gmra.mxu0 %v10114_v41  ;;  %v3303_v26 = vpop.f32.mrf.mxu1 }
 0x2ba   :  { %3748 = vmatmul.mubr.f32.gmra.mxu1 %v10144_v11  ;;  %3842 = vmatprep.mubr.f32.mxu0 %v12193_v13  ;;  %v3218_v51 = vpop.f32.mrf.mxu0  ;;  %v3304_v21 = vadd.f32 %v3303_v26, %v3201_v4  ;;  %v4201_v26 = vsel %vm4199_vm1, %v4198_v16, 0 }
 0x2bb   :  { %3927 = vmatprep.mubr.f32.mxu1 %v12193_v13  ;;  %v3305_v12 = vpop.f32.mrf.mxu1 }
 0x2bc   :  { %v3405_v14 = vpop.f32.mrf.mxu0 }
 0x2bd   :  { %3845 = vmatmul.mubr.f32.gmra.mxu0 %v10136_v32  ;;  %v3312_v41 = vpop.f32.mrf.mxu1 }
 0x2be   :  { %3931 = vmatmul.mubr.f32.vlgmr.msra.gmra.mxu1 %v10111_v63  ;;  %3850 = vmatprep.mubr.f32.mxu0 %v12193_v13  ;;  %v3407_v10 = vpop.f32.mrf.mxu0  ;;  %v3107_v63 = vadd.f32 %v3106_v62, %v10284_v56  ;;  %v3313_v56 = vadd.f32 %v3312_v41, %v3209_v58 }
 0x2bf   :  { %4100 = vmatpush1.msra.mxu1 %v10250_v57  ;;  %3936 = vmatprep.mubr.f32.mxu1 %v12193_v13  ;;  %v3314_v45 = vpop.f32.mrf.mxu1  ;;  %v3112_v57 = vadd.f32 %v3111_v43, %v10288_v1  ;;  %v3408_v33 = vadd.f32 %v3407_v10, %v3297_v38 }
 0x2c0   :  { %4102 = vmatprep.subr.mxu1 %v10243_v53  ;;  %v3412_v32 = vpop.f32.mrf.mxu0  ;;  %v3295_v53 = vadd.f32 %v3294_v52, %v3193_v37  ;;  %v3211_v46 = vadd.f32 %v3210_v24, %v3107_v63 }
 0x2c1   :  { %4104 = vmatpush1.msra.mxu1 %v10241_v35  ;;  %3853 = vmatmul.mubr.f32.gmra.mxu0 %v10162_v54  ;;  %v3321_v3 = vpop.f32.mrf.mxu1  ;;  %v3114_v35 = vadd.f32 %v3113_v40, %v10291_v44  ;;  %v3306_v54 = vadd.f32 %v3305_v12, %v3203_v7  ;;  %v3217_v22 = vadd.f32 %v3216_v50, %v3112_v57 }
 0x2c2   :  { %3940 = vmatmul.mubr.f32.gmra.mxu1 %v10133_v19  ;;  %4040 = vmatprep.mubr.f32.mxu0 %v12193_v13  ;;  %v3414_v59 = vpop.f32.mrf.mxu0  ;;  %v3413_v31 = vadd.f32 %v3412_v32, %v3304_v21  ;;  %v3406_v2 = vadd.f32 %v3405_v14, %v3295_v53  ;;  %v3315_v6 = vadd.f32 %v3314_v45, %v3211_v46 }
 0x2c3   :  { %3945 = vmatprep.mubr.f32.mxu1 %v12193_v13  ;;  %v3323_v18 = vpop.f32.mrf.mxu1  ;;  %v3219_v1 = vadd.f32 %v3218_v51, %v3114_v35  ;;  %v3415_v8 = vadd.f32 %v3414_v59, %v3306_v54 }
 0x2c4   :  { %v3419_v49 = vpop.f32.mrf.mxu0 }
 0x2c5   :  { %4042 = vmatmul.mubr.f32.vlgmr.msra.gmra.mxu0 %v10072_v20  ;;  %v3502_v19 = vpop.f32.mrf.mxu1  ;;  %v3420_v28 = vadd.f32 %v3419_v49, %v3313_v56  ;;  %v3324_v43 = vadd.f32 %v3323_v18, %v3219_v1 }
 0x2c6   :  { %3949 = vmatmul.mubr.f32.gmra.mxu1 %v10158_v34  ;;  %4047 = vmatprep.mubr.f32.mxu0 %v12193_v13  ;;  %v3421_v42 = vpop.f32.mrf.mxu0  ;;  %v3322_v34 = vadd.f32 %v3321_v3, %v3217_v22  ;;  %v3503_v30 = vadd.f32 %v3502_v19, %v3406_v2 }
 0x2c7   :  { %3954 = vmatprep.mubr.f32.mxu1 %v12193_v13  ;;  %v3504_v47 = vpop.f32.mrf.mxu1  ;;  %v3422_v40 = vadd.f32 %v3421_v42, %v3315_v6 }
 0x2c8   :  { %v3426_v44 = vpop.f32.mrf.mxu0  ;;  %v3505_v27 = vadd.f32 %v3504_v47, %v3408_v33  ;;  %v4166_v36 = vmul.f32 0.01, %v3503_v30 }
 0x2c9   :  { %4049 = vmatmul.mubr.f32.gmra.mxu0 %v10095_v48  ;;  %v3509_v5 = vpop.f32.mrf.mxu1  ;;  %v3427_v50 = vadd.f32 %v3426_v44, %v3322_v34 }
 0x2ca   :  { %3958 = vmatmul.mubr.f32.gmra.mxu1 %v10177_v60  ;;  %4054 = vmatprep.mubr.f32.mxu0 %v12193_v13  ;;  %v3510_v17 = vadd.f32 %v3509_v5, %v3413_v31  ;;  %v3428_v52 = vpop.f32.mrf.mxu0  ;;  %v4167_v24 = vmul.f32 0.01, %v3505_v27  ;;  %v4182_v23 = vmax.f32 %v3503_v30, %v4166_v36 }
 0x2cb   :  { %4137 = vmatprep.mubr.f32.mxu1 %v12193_v13  ;;  %v3511_v62 = vpop.f32.mrf.mxu1  ;;  %v3429_v12 = vadd.f32 %v3428_v52, %v3324_v43 }
 0x2cc   :  { %v3512_v25 = vadd.f32 %v3511_v62, %v3415_v8  ;;  %v4170_v60 = vmul.f32 0.01, %v3510_v17  ;;  %v4183_v4 = vmax.f32 %v3505_v27, %v4167_v24  ;;  %v10371_v18 = vand.u32 4294901760, %v4182_v23 }
 0x2cd   :  { %4056 = vmatmul.mubr.f32.gmra.mxu0 %v10116_v9  ;;  %v3516_v0 = vpop.f32.mrf.mxu1 }
 0x2ce   :  { %4139 = vmatmul.mubr.f32.vlgmr.msra.gmra.mxu1 %v10072_v20  ;;  %4061 = vmatprep.mubr.f32.mxu0 %v12193_v13  ;;  %v4171_v61 = vmul.f32 0.01, %v3512_v25  ;;  %v3517_v29 = vadd.f32 %v3516_v0, %v3420_v28  ;;  %v4186_v39 = vmax.f32 %v3510_v17, %v4170_v60  ;;  %v10353_v20 = vand.u32 4294901760, %v4201_v26 }
 0x2cf   :  { %4144 = vmatprep.mubr.f32.mxu1 %v12193_v13  ;;  %v3518_v51 = vpop.f32.mrf.mxu1  ;;  %v10368_v59 = vand.u32 4294901760, %v4183_v4  ;;  %v10402_v2 = vsub.f32 %v4182_v23, %v10371_v18 }
 0x2d0   :  { %v4187_v55 = vmax.f32 %v3512_v25, %v4171_v61  ;;  %v4174_v14 = vmul.f32 0.01, %v3517_v29  ;;  %v3519_v41 = vadd.f32 %v3518_v51, %v3422_v40  ;;  %v10360_v57 = vand.u32 4294901760, %v4186_v39 }
 0x2d1   :  { %4063 = vmatmul.mubr.f32.gmra.mxu0 %v10144_v11  ;;  %v3523_v15 = vpop.f32.mrf.mxu1  ;;  %v10394_v31 = vsub.f32 %v4183_v4, %v10368_v59  ;;  %v4355_v28 = vand.u32 4294901760, %v10402_v2 }
 0x2d2   :  { %4146 = vmatmul.mubr.f32.gmra.mxu1 %v10095_v48  ;;  %v3524_v10 = vadd.f32 %v3523_v15, %v3427_v50  ;;  %4275 = vmatprep.mubr.f32.mxu0 %v12193_v13  ;;  %v4190_v37 = vmax.f32 %v3517_v29, %v4174_v14  ;;  %v4175_v45 = vmul.f32 0.01, %v3519_v41  ;;  %v10358_v32 = vand.u32 4294901760, %v4187_v55 }
 0x2d3   :  { %4151 = vmatprep.mubr.f32.mxu1 %v12193_v13  ;;  %v3525_v7 = vpop.f32.mrf.mxu1  ;;  %v10365_v48 = vsub.f32 %v4201_v26, %v10353_v20  ;;  %v4349_v30 = vand.u32 4294901760, %v10394_v31  ;;  %v4356_v50 = vsub.f32 %v10402_v2, %v4355_v28 }
 0x2d4   :  { %v4178_v63 = vmul.f32 0.01, %v3524_v10  ;;  %v3526_v3 = vadd.f32 %v3525_v7, %v3429_v12  ;;  %v10362_v38 = vand.u32 4294901760, %v4190_v37  ;;  %v4191_v21 = vmax.f32 %v3519_v41, %v4175_v45 }
 0x2d5   :  { %v10379_v49 = vsub.f32 %v4187_v55, %v10358_v32  ;;  %v10390_v33 = vand.u32 4294901760, %v10365_v48  ;;  %v4350_v24 = vsub.f32 %v10394_v31, %v4349_v30  ;;  %v4357_v51 = vand.u32 4294901760, %v4356_v50 }
 0x2d6   :  { %4153 = vmatmul.mubr.f32.gmra.mxu1 %v10116_v9  ;;  %v4194_v53 = vmax.f32 %v3524_v10, %v4178_v63  ;;  %v4179_v58 = vmul.f32 0.01, %v3526_v3  ;;  %v10374_v35 = vsub.f32 %v4190_v37, %v10362_v38  ;;  %v10376_v54 = vand.u32 4294901760, %v4191_v21 }
 0x2d7   :  { %4158 = vmatprep.mubr.f32.mxu1 %v12193_v13  ;;  %v10384_v9 = vsub.f32 %v4186_v39, %v10360_v57  ;;  %v4337_v6 = vand.u32 4294901760, %v10379_v49  ;;  %v4279_v44 = vsub.f32 %v10365_v48, %v10390_v33  ;;  %v4351_v29 = vand.u32 4294901760, %v4350_v24 }
 0x2d8   :  { %v10381_v46 = vand.u32 4294901760, %v4194_v53  ;;  %v4195_v19 = vmax.f32 %v3526_v3, %v4179_v58  ;;  %v10387_v22 = vsub.f32 %v4191_v21, %v10376_v54  ;;  %v4331_v47 = vand.u32 4294901760, %v10374_v35 }
 0x2d9   :  { %v4343_v5 = vand.u32 4294901760, %v10384_v9  ;;  %v4338_v43 = vsub.f32 %v10379_v49, %v4337_v6  ;;  %v10434_v40 = vand.u32 4294901760, %v4279_v44 }
 0x2da   :  { %4160 = vmatmul.mubr.f32.gmra.mxu1 %v10144_v11  ;;  %v10397_v42 = vsub.f32 %v4194_v53, %v10381_v46  ;;  %v10399_v56 = vand.u32 4294901760, %v4195_v19  ;;  %v4325_v1 = vand.u32 4294901760, %v10387_v22  ;;  %v4332_v62 = vsub.f32 %v10374_v35, %v4331_v47 }
 0x2db   :  { %4391 = vmatprep.mubr.f32.mxu1 %v12193_v13  ;;  %v4344_v60 = vsub.f32 %v10384_v9, %v4343_v5  ;;  %v4339_v26 = vand.u32 4294901760, %v4338_v43 }
 0x2dc   :  { %v4319_v8 = vand.u32 4294901760, %v10397_v42  ;;  %v4312_v11 = vsub.f32 %v4195_v19, %v10399_v56  ;;  %4228 = vmatprep.subr.mxu0 %v10399_v56  ;;  %v4326_v17 = vsub.f32 %v10387_v22, %v4325_v1  ;;  %v4333_v61 = vand.u32 4294901760, %v4332_v62 }
 0x2dd   :  { %4230 = vmatpush1.msra.mxu0 %v10381_v46  ;;  %v4345_v36 = vand.u32 4294901760, %v4344_v60 }
 0x2de   :  { %4232 = vmatprep.subr.mxu0 %v10376_v54  ;;  %v4313_v34 = vand.u32 4294901760, %v4312_v11  ;;  %v4320_v27 = vsub.f32 %v10397_v42, %v4319_v8  ;;  %v4327_v52 = vand.u32 4294901760, %v4326_v17 }
 0x2df   :  { %4234 = vmatpush1.msra.mxu0 %v10362_v38 }
 0x2e0   :  { %v4314_v16 = vsub.f32 %v4312_v11, %v4313_v34  ;;  %4236 = vmatprep.subr.mxu0 %v10358_v32  ;;  %v4321_v25 = vand.u32 4294901760, %v4320_v27 }
 0x2e1   :  { %4238 = vmatpush1.msra.mxu0 %v10360_v57 }
 0x2e2   :  { %v4315_v0 = vand.u32 4294901760, %v4314_v16  ;;  %4240 = vmatprep.subr.mxu0 %v10368_v59 }
 0x2e3   :  { %4242 = vmatpush1.msra.mxu0 %v10371_v18 }
 0x2e4   :  { %4316 = vmatprep.subr.mxu1 %v4315_v0  ;;  %4425 = vmatprep.subr.mxu0 %v4312_v11 }
 0x2e5   :  { %4322 = vmatpush1.msra.mxu1 %v4321_v25  ;;  %4281 = vmatmul.mubr.f32.vlgmr.msra.gmra.mxu0 %v10434_v40 }
 0x2e6   :  { %4328 = vmatprep.subr.mxu1 %v4327_v52  ;;  %4428 = vmatpush1.msra.mxu0 %v10397_v42 }
 0x2e7   :  { %4334 = vmatpush1.msra.mxu1 %v4333_v61  ;;  %4431 = vmatprep.subr.mxu0 %v10387_v22 }
 0x2e8   :  { %4340 = vmatprep.subr.mxu1 %v4339_v26  ;;  %4434 = vmatpush1.msra.mxu0 %v10374_v35 }
 0x2e9   :  { %4346 = vmatpush1.msra.mxu1 %v4345_v36  ;;  %4437 = vmatprep.subr.mxu0 %v10379_v49 }
 0x2ea   :  { %4352 = vmatprep.subr.mxu1 %v4351_v29  ;;  %4440 = vmatpush1.msra.mxu0 %v10384_v9 }
 0x2eb   :  { %4358 = vmatpush1.msra.mxu1 %v4357_v51  ;;  %4443 = vmatprep.subr.mxu0 %v10394_v31 }
 0x2ec   :  { %4513 = vmatprep.subr.mxu1 %v10399_v56  ;;  %4393 = vmatmul.mubr.f32.vlgmr.msra.gmra.mxu1 %v10353_v20 }
 0x2ed   :  { %4515 = vmatpush1.msra.mxu1 %v10381_v46  ;;  %4446 = vmatpush1.msra.mxu0 %v10402_v2 }
 0x2ee   :  { %4517 = vmatprep.subr.mxu1 %v10376_v54  ;;  %4479 = vmatprep.mubr.f32.mxu0 %v12193_v13 }
 0x2ef   :  { %4519 = vmatpush1.msra.mxu1 %v10362_v38  ;;  %4597 = vmatprep.subr.mxu0 %v4313_v34 }
 0x2f0   :  { %4521 = vmatprep.subr.mxu1 %v10358_v32  ;;  %4482 = vmatmul.mubr.f32.vlgmr.msra.gmra.mxu0 %v10365_v48 }
 0x2f1   :  { %4523 = vmatpush1.msra.mxu1 %v10360_v57  ;;  %4601 = vmatpush1.msra.mxu0 %v4319_v8 }
 0x2f2   :  { %4525 = vmatprep.subr.mxu1 %v10368_v59  ;;  %4560 = vmatprep.mubr.f32.mxu1 %v12193_v13 }
 0x2f3   :  { %4527 = vmatpush1.msra.mxu1 %v10371_v18  ;;  %4605 = vmatprep.subr.mxu0 %v4325_v1 }
 0x2f4   :  { %4691 = vmatprep.subr.mxu1 %v10399_v56  ;;  %4564 = vmatmul.mubr.f32.vlgmr.msra.gmra.mxu1 %v10390_v33 }
 0x2f5   :  { %4609 = vmatpush1.msra.mxu0 %v4331_v47  ;;  %4693 = vmatpush1.msra.mxu1 %v10381_v46 }
 0x2f6   :  { %4613 = vmatprep.subr.mxu0 %v4337_v6  ;;  %4695 = vmatprep.subr.mxu1 %v10376_v54 }
 0x2f7   :  { %4617 = vmatpush1.msra.mxu0 %v4343_v5  ;;  %4697 = vmatpush1.msra.mxu1 %v10362_v38 }
 0x2f8   :  { %4621 = vmatprep.subr.mxu0 %v4349_v30  ;;  %4699 = vmatprep.subr.mxu1 %v10358_v32 }
 0x2f9   :  { %4625 = vmatpush1.msra.mxu0 %v4355_v28  ;;  %4658 = vmatprep.mubr.f32.mxu0 %v12193_v13 }
 0x2fa   :  { %4701 = vmatpush1.msra.mxu1 %v10360_v57  ;;  %4660 = vmatmul.mubr.f32.vlgmr.msra.gmra.mxu0 %v10353_v20 }
 0x2fb   :  { %4703 = vmatprep.subr.mxu1 %v10368_v59  ;;  %4738 = vmatprep.mubr.f32.mxu1 %v12193_v13 }
 0x2fc   :  { %4705 = vmatpush1.msra.mxu1 %v10371_v18  ;;  %4818 = vmatprep.mubr.f32.mxu0 %v12193_v13 }
 0x2fd   :  { %4740 = vmatmul.mubr.f32.vlgmr.msra.gmra.mxu1 %v10353_v20 }
 0x2fe   :  { %4934 = vmatprep.mubr.f32.mxu1 %v12193_v13 }
 0x365   :  { %v3603_v55 = vpop.f32.mrf.mxu0 }
 0x367   :  { %v3605_v12 = vpop.f32.mrf.mxu0 }
 0x369   :  { %v3614_v39 = vpop.f32.mrf.mxu0 }
 0x36b   :  { %v3616_v14 = vpop.f32.mrf.mxu0 }
 0x36d   :  { %v3625_v41 = vpop.f32.mrf.mxu0  ;;  %v3728_v15 = vpop.f32.mrf.mxu1 }
 0x36e   :  { %v3729_v34 = vadd.f32 %v3728_v15, %v3603_v55 }
 0x36f   :  { %v3627_v4 = vpop.f32.mrf.mxu0  ;;  %v3730_v10 = vpop.f32.mrf.mxu1 }
 0x370   :  { %v3731_v6 = vadd.f32 %v3730_v10, %v3605_v12 }
 0x371   :  { %v3636_v23 = vpop.f32.mrf.mxu0 }
 0x372   :  { %v3735_v37 = vpop.f32.mrf.mxu1 }
 0x373   :  { %v3638_v45 = vpop.f32.mrf.mxu0  ;;  %v3736_v8 = vadd.f32 %v3735_v37, %v3614_v39 }
 0x374   :  { %v3737_v7 = vpop.f32.mrf.mxu1 }
 0x375   :  { %v3830_v32 = vpop.f32.mrf.mxu0  ;;  %v3738_v5 = vadd.f32 %v3737_v7, %v3616_v14 }
 0x376   :  { %v3742_v63 = vpop.f32.mrf.mxu1  ;;  %v3831_v16 = vadd.f32 %v3830_v32, %v3729_v34 }
 0x377   :  { %v3832_v3 = vpop.f32.mrf.mxu0  ;;  %v3743_v62 = vadd.f32 %v3742_v63, %v3625_v41 }
 0x378   :  { %v3744_v57 = vpop.f32.mrf.mxu1  ;;  %v3833_v30 = vadd.f32 %v3832_v3, %v3731_v6 }
 0x379   :  { %v3838_v38 = vpop.f32.mrf.mxu0  ;;  %v3745_v24 = vadd.f32 %v3744_v57, %v3627_v4 }
 0x37a   :  { %v3749_v21 = vpop.f32.mrf.mxu1  ;;  %v3839_v27 = vadd.f32 %v3838_v38, %v3736_v8 }
 0x37b   :  { %v3840_v59 = vpop.f32.mrf.mxu0  ;;  %v3750_v29 = vadd.f32 %v3749_v21, %v3636_v23 }
 0x37c   :  { %v3751_v53 = vpop.f32.mrf.mxu1  ;;  %v3841_v28 = vadd.f32 %v3840_v59, %v3738_v5 }
 0x37d   :  { %v3846_v58 = vpop.f32.mrf.mxu0  ;;  %v3752_v37 = vadd.f32 %v3751_v53, %v3638_v45 }
 0x37e   :  { %v3932_v18 = vpop.f32.mrf.mxu1  ;;  %v3847_v61 = vadd.f32 %v3846_v58, %v3743_v62 }
 0x37f   :  { %v3848_v35 = vpop.f32.mrf.mxu0  ;;  %v3933_v50 = vadd.f32 %v3932_v18, %v3831_v16 }
 0x380   :  { %v3934_v54 = vpop.f32.mrf.mxu1  ;;  %v3849_v55 = vadd.f32 %v3848_v35, %v3745_v24 }
 0x381   :  { %v3854_v49 = vpop.f32.mrf.mxu0  ;;  %v3935_v0 = vadd.f32 %v3934_v54, %v3833_v30 }
 0x382   :  { %v3941_v46 = vpop.f32.mrf.mxu1  ;;  %v3855_v7 = vadd.f32 %v3854_v49, %v3750_v29 }
 0x383   :  { %v3856_v19 = vpop.f32.mrf.mxu0  ;;  %v3942_v43 = vadd.f32 %v3941_v46, %v3839_v27 }
 0x384   :  { %v3943_v9 = vpop.f32.mrf.mxu1  ;;  %v3857_v59 = vadd.f32 %v3856_v19, %v3752_v37 }
 0x385   :  { %v4043_v22 = vpop.f32.mrf.mxu0  ;;  %v3944_v52 = vadd.f32 %v3943_v9, %v3841_v28 }
 0x386   :  { %v3950_v31 = vpop.f32.mrf.mxu1  ;;  %v4044_v14 = vadd.f32 %v4043_v22, %v3933_v50 }
 0x387   :  { %v4045_v42 = vpop.f32.mrf.mxu0  ;;  %v3951_v39 = vadd.f32 %v3950_v31, %v3847_v61 }
 0x388   :  { %v3952_v56 = vpop.f32.mrf.mxu1  ;;  %v4046_v51 = vadd.f32 %v4045_v42, %v3935_v0 }
 0x389   :  { %v4050_v2 = vpop.f32.mrf.mxu0  ;;  %v3953_v3 = vadd.f32 %v3952_v56, %v3849_v55 }
 0x38a   :  { %v3959_v47 = vpop.f32.mrf.mxu1  ;;  %v4051_v26 = vadd.f32 %v4050_v2, %v3942_v43 }
 0x38b   :  { %v4052_v1 = vpop.f32.mrf.mxu0  ;;  %v3960_v58 = vadd.f32 %v3959_v47, %v3855_v7  ;;  %v5304_v7 = vld [vmem:[#allocation5 + $0x78] sm:$0xff] }
 0x38c   :  { %v3961_v11 = vpop.f32.mrf.mxu1  ;;  %v4053_v12 = vadd.f32 %v4052_v1, %v3944_v52 }
 0x38d   :  { %v4057_v44 = vpop.f32.mrf.mxu0  ;;  %v3962_v9 = vadd.f32 %v3961_v11, %v3857_v59 }
 0x38e   :  { %v4140_v17 = vpop.f32.mrf.mxu1  ;;  %v4058_v38 = vadd.f32 %v4057_v44, %v3951_v39 }
 0x38f   :  { %v4059_v25 = vpop.f32.mrf.mxu0  ;;  %v4141_v4 = vadd.f32 %v4140_v17, %v4044_v14 }
 0x390   :  { %v4142_v60 = vpop.f32.mrf.mxu1  ;;  %v4060_v23 = vadd.f32 %v4059_v25, %v3953_v3  ;;  %v5319_v3 = vld [vmem:[#allocation5 + $0xf0] sm:$0xff] }
 0x391   :  { %v4064_v15 = vpop.f32.mrf.mxu0  ;;  %v4143_v32 = vadd.f32 %v4142_v60, %v4046_v51  ;;  %v4168_v42 = vmul.f32 0.01, %v4141_v4 }
 0x392   :  { %v4147_v36 = vpop.f32.mrf.mxu1  ;;  %v4065_v31 = vadd.f32 %v4064_v15, %v3960_v58 }
 0x393   :  { %v4148_v10 = vadd.f32 %v4147_v36, %v4051_v26  ;;  %v4066_v54 = vpop.f32.mrf.mxu0  ;;  %v4169_v22 = vmul.f32 0.01, %v4143_v32  ;;  %v4184_v27 = vmax.f32 %v4141_v4, %v4168_v42 }
 0x394   :  { %v4149_v41 = vpop.f32.mrf.mxu1  ;;  %v4067_v2 = vadd.f32 %v4066_v54, %v3962_v9 }
 0x395   :  { %v4150_v63 = vadd.f32 %v4149_v41, %v4053_v12  ;;  %v4172_v21 = vmul.f32 0.01, %v4148_v10  ;;  %v4185_v5 = vmax.f32 %v4143_v32, %v4169_v22  ;;  %v10495_v52 = vand.u32 4294901760, %v4184_v27 }
 0x396   :  { %v4154_v57 = vpop.f32.mrf.mxu1 }
 0x397   :  { %v4173_v18 = vmul.f32 0.01, %v4150_v63  ;;  %v4155_v35 = vadd.f32 %v4154_v57, %v4058_v38  ;;  %v4188_v8 = vmax.f32 %v4148_v10, %v4172_v21  ;;  %v10491_v25 = vand.u32 4294901760, %v4185_v5  ;;  %v5320_v10 = vld [vmem:[#allocation5 + $0xf8] sm:$0xff]  ;;  %v5303_v21 = vld [vmem:[#allocation5 + $0x70] sm:$0xff] }
 0x398   :  { %v4156_v46 = vpop.f32.mrf.mxu1  ;;  %v10524_v14 = vsub.f32 %v4184_v27, %v10495_v52  ;;  %v10544_v59 = vand.u32 4294901760, %v5320_v10  ;;  %v5317_v27 = vld [vmem:[#allocation5 + $0xe0] sm:$0xff] }
 0x399   :  { %v4176_v45 = vmul.f32 0.01, %v4155_v35  ;;  %v4157_v53 = vadd.f32 %v4156_v46, %v4060_v23  ;;  %v4189_v56 = vmax.f32 %v4150_v63, %v4173_v18  ;;  %v10487_v16 = vand.u32 4294901760, %v4188_v8 }
 0x39a   :  { %v4161_v49 = vpop.f32.mrf.mxu1  ;;  %v10515_v51 = vsub.f32 %v4185_v5, %v10491_v25  ;;  %v4898_v58 = vand.u32 4294901760, %v10524_v14  ;;  %v10551_v23 = vand.u32 4294901760, %v5304_v7  ;;  %v10557_v46 = vand.u32 4294901760, %v5319_v3 }
 0x39b   :  { %v4162_v1 = vadd.f32 %v4161_v49, %v4065_v31  ;;  %v4192_v6 = vmax.f32 %v4155_v35, %v4176_v45  ;;  %v4177_v19 = vmul.f32 0.01, %v4157_v53  ;;  %v10485_v30 = vand.u32 4294901760, %v4189_v56  ;;  %v5318_v31 = vld [vmem:[#allocation5 + $0xe8] sm:$0xff] }
 0x39c   :  { %v4163_v47 = vpop.f32.mrf.mxu1  ;;  %v10512_v29 = vsub.f32 %v4188_v8, %v10487_v16  ;;  %v4892_v57 = vand.u32 4294901760, %v10515_v51  ;;  %v10570_v49 = vand.u32 4294901760, %v5303_v21 }
 0x39d   :  { %v4180_v44 = vmul.f32 0.01, %v4162_v1  ;;  %v4164_v34 = vadd.f32 %v4163_v47, %v4067_v2  ;;  %v10483_v17 = vand.u32 4294901760, %v4192_v6  ;;  %v4193_v11 = vmax.f32 %v4157_v53, %v4177_v19  ;;  %v5302_v47 = vld [vmem:[#allocation5 + $0x68] sm:$0xff] }
 0x39e   :  { %v10504_v50 = vsub.f32 %v4189_v56, %v10485_v30  ;;  %v4886_v32 = vand.u32 4294901760, %v10512_v29  ;;  %v4893_v45 = vsub.f32 %v10515_v51, %v4892_v57  ;;  %v10568_v53 = vsub.f32 %v5320_v10, %v10544_v59  ;;  %v5301_v10 = vld [vmem:[#allocation5 + $0x60] sm:$0xff] }
 0x39f   :  { %v4196_v28 = vmax.f32 %v4162_v1, %v4180_v44  ;;  %v4181_v62 = vmul.f32 0.01, %v4164_v34  ;;  %v10489_v43 = vand.u32 4294901760, %v4193_v11  ;;  %v10498_v24 = vsub.f32 %v4192_v6, %v10483_v17 }
 0x3a0   :  { %v4880_v37 = vand.u32 4294901760, %v10504_v50  ;;  %v4887_v22 = vsub.f32 %v10512_v29, %v4886_v32  ;;  %v4899_v56 = vsub.f32 %v10524_v14, %v4898_v58  ;;  %v10577_v1 = vsub.f32 %v5304_v7, %v10551_v23 }
 0x3a1   :  { %v10493_v60 = vand.u32 4294901760, %v4196_v28  ;;  %v4197_v0 = vmax.f32 %v4164_v34, %v4181_v62  ;;  %v10501_v61 = vsub.f32 %v4193_v11, %v10489_v43  ;;  %v4874_v15 = vand.u32 4294901760, %v10498_v24 }
 0x3a2   :  { %v4881_v35 = vsub.f32 %v10504_v50, %v4880_v37  ;;  %v10580_v6 = vand.u32 4294901760, %v5318_v31  ;;  %v10583_v19 = vsub.f32 %v5319_v3, %v10557_v46  ;;  %v4894_v5 = vand.u32 4294901760, %v4893_v45  ;;  %v5316_v3 = vld [vmem:[#allocation5 + $0xd8] sm:$0xff] }
 0x3a3   :  { %v10507_v26 = vsub.f32 %v4196_v28, %v10493_v60  ;;  %v10509_v36 = vand.u32 4294901760, %v4197_v0  ;;  %v4868_v39 = vand.u32 4294901760, %v10501_v61  ;;  %v4875_v18 = vsub.f32 %v10498_v24, %v4874_v15 }
 0x3a4   :  { %v4882_v8 = vand.u32 4294901760, %v4881_v35  ;;  %v12191_v44 = vand.u32 4294901760, %v10568_v53  ;;  %v10589_v34 = vsub.f32 %v5303_v21, %v10570_v49  ;;  %v4900_v28 = vand.u32 4294901760, %v4899_v56 }
 0x3a5   :  { %v4862_v12 = vand.u32 4294901760, %v10507_v26  ;;  %v10519_v55 = vsub.f32 %v4197_v0, %v10509_v36  ;;  %4771 = vmatprep.subr.mxu0 %v10509_v36  ;;  %v4869_v4 = vsub.f32 %v10501_v61, %v4868_v39  ;;  %v4876_v2 = vand.u32 4294901760, %v4875_v18  ;;  %v10591_v11 = vpop.f32.mrf.mxu0 }
 0x3a6   :  { %4773 = vmatpush1.msra.mxu0 %v10493_v60  ;;  %v12189_v62 = vand.u32 4294901760, %v10577_v1  ;;  %v10595_v0 = vand.u32 4294901760, %v5302_v47  ;;  %v12188_v7 = vand.u32 4294901760, %v10583_v19  ;;  %v10610_v18 = vsub.f32 %v10568_v53, %v12191_v44 }
 0x3a7   :  { %4775 = vmatprep.subr.mxu0 %v10489_v43  ;;  %v4856_v41 = vand.u32 4294901760, %v10519_v55  ;;  %v4863_v63 = vsub.f32 %v10507_v26, %v4862_v12  ;;  %v4870_v42 = vand.u32 4294901760, %v4869_v4  ;;  %v5300_v4 = vld [vmem:[#allocation5 + $0x58] sm:$0xff]  ;;  %v12190_v21 = vand.u32 4294901760, %v10589_v34  ;;  %v4284_v35 = vpop.f32.mrf.mxu0 }
 0x3a8   :  { %4777 = vmatpush1.msra.mxu0 %v10483_v17  ;;  %v10626_v45 = vand.u32 4294901760, %v5316_v3  ;;  %v10636_v56 = vand.u32 4294901760, %v5300_v4 }
 0x3a9   :  { %4779 = vmatprep.subr.mxu0 %v10485_v30  ;;  %v4857_v38 = vsub.f32 %v10519_v55, %v4856_v41  ;;  %v4864_v9 = vand.u32 4294901760, %v4863_v63  ;;  %v10600_v63 = vsub.f32 %v5318_v31, %v10580_v6  ;;  %v10621_v31 = vsub.f32 %v10577_v1, %v12189_v62  ;;  %v5313_v62 = vld [vmem:[#allocation5 + $0xc0] sm:$0xff] }
 0x3aa   :  { %4781 = vmatpush1.msra.mxu0 %v10487_v16 }
 0x3ab   :  { %4783 = vmatprep.subr.mxu0 %v10491_v25  ;;  %v4858_v54 = vand.u32 4294901760, %v4857_v38  ;;  %v10603_v38 = vand.u32 4294901760, %v5317_v27 }
 0x3ac   :  { %4785 = vmatpush1.msra.mxu0 %v10495_v52 }
 0x3ad   :  { %4859 = vmatprep.subr.mxu1 %v4858_v54  ;;  %4968 = vmatprep.subr.mxu0 %v10519_v55  ;;  %v10613_v54 = vand.u32 4294901760, %v5301_v10  ;;  %v10633_v55 = vsub.f32 %v10583_v19, %v12188_v7 }
 0x3ae   :  { %4824 = vmatmul.mubr.f32.vlgmr.msra.gmra.mxu0 %v10434_v40  ;;  %4865 = vmatpush1.msra.mxu1 %v4864_v9  ;;  %v4888_v40 = vand.u32 4294901760, %v4887_v22  ;;  %v4394_v9 = vpop.f32.mrf.mxu1  ;;  %v5315_v22 = vld [vmem:[#allocation5 + $0xd0] sm:$0xff] }
 0x3af   :  { %4971 = vmatpush1.msra.mxu0 %v10507_v26  ;;  %4871 = vmatprep.subr.mxu1 %v4870_v42  ;;  %13099 = vst [vmem:[#allocation103_spill] sm:$0xff] %v10613_v54  ;;  %v10624_v42 = vsub.f32 %v5302_v47, %v10595_v0  ;;  %v10642_v47 = vsub.f32 %v5317_v27, %v10603_v38 }
 0x3b0   :  { %4974 = vmatprep.subr.mxu0 %v10501_v61  ;;  %4877 = vmatpush1.msra.mxu1 %v4876_v2  ;;  %v5299_v2 = vld [vmem:[#allocation5 + $0x50] sm:$0xff]  ;;  %v10656_v26 = vsub.f32 %v5301_v10, %v10613_v54  ;;  %v4483_v27 = vpop.f32.mrf.mxu0  ;;  %v5297_v10 = vld [vmem:[#allocation5 + $0x40] sm:$0xff]  ;;  %v10691_v61 = vand.u32 4294901760, %v5313_v62 }
 0x3b1   :  { %4977 = vmatpush1.msra.mxu0 %v10498_v24  ;;  %4883 = vmatprep.subr.mxu1 %v4882_v8  ;;  %13100 = vst [vmem:[#allocation104_spill] sm:$0xff] %v10624_v42  ;;  %v5314_v8 = vld [vmem:[#allocation5 + $0xc8] sm:$0xff]  ;;  %13101 = vst [vmem:[#allocation92_spill] sm:$0xff] %v10642_v47  ;;  %v10658_v7 = vand.u32 4294901760, %v5299_v2 }
 0x3b2   :  { %4980 = vmatprep.subr.mxu0 %v10504_v50  ;;  %4889 = vmatpush1.msra.mxu1 %v4888_v40  ;;  %v10644_v40 = vand.u32 4294901760, %v5315_v22  ;;  %v10668_v44 = vand.u32 4294901760, %v5314_v8  ;;  %v10735_v50 = vsub.f32 %v5313_v62, %v10691_v61 }
 0x3b3   :  { %4983 = vmatpush1.msra.mxu0 %v10512_v29  ;;  %4895 = vmatprep.subr.mxu1 %v4894_v5  ;;  %13103 = vst [vmem:[#allocation66_spill] sm:$0xff] %v10658_v7  ;;  %v13112_v29 = vmov 0.0  }
 0x3b4   :  { %4986 = vmatprep.subr.mxu0 %v10515_v51  ;;  %4901 = vmatpush1.msra.mxu1 %v4900_v28  ;;  %13102 = vst [vmem:[#allocation14_spill] sm:$0xff] %v10644_v40  ;;  %v10653_v28 = vsub.f32 %v10589_v34, %v12190_v21  ;;  %v10666_v21 = vsub.f32 %v5316_v3, %v10626_v45  ;;  %13105 = vst [vmem:[#allocation68_spill] sm:$0xff] %v10668_v44 }
 0x3b5   :  { %4989 = vmatpush1.msra.mxu0 %v10524_v14  ;;  %5022 = vmatprep.mubr.f32.mxu0 %v12193_v13  ;;  %v10689_v5 = vsub.f32 %v5315_v22, %v10644_v40  ;;  %v5296_v13 = vld [vmem:[#allocation5 + $0x38] sm:$0xff]  ;;  %v10701_v22 = vand.u32 4294901760, %v5297_v10  ;;  %13116 = vst [vmem:[#allocation24_spill] sm:$0xff] %v10735_v50 }
 0x3b6   :  { %5056 = vmatprep.subr.mxu1 %v10509_v36  ;;  %5140 = vmatprep.subr.mxu0 %v4856_v41  ;;  %v12192_v41 = vand.u32 4294901760, %v10600_v63  ;;  %13104 = vst [vmem:[#allocation13_spill] sm:$0xff] %v10666_v21  ;;  %v13119_v62 = vand.u32 4294901760, %v10666_v21 }
 0x3b7   :  { %4936 = vmatmul.mubr.f32.vlgmr.msra.gmra.mxu1 %v10353_v20  ;;  %5025 = vmatmul.mubr.f32.vlgmr.msra.gmra.mxu0 %v10365_v48  ;;  %v5298_v48 = vld [vmem:[#allocation5 + $0x48] sm:$0xff]  ;;  %13108 = vst [vmem:[#allocation88_spill] sm:$0xff] %v10689_v5  ;;  %13110 = vst [vmem:[#allocation33_spill] sm:$0xff] %v10701_v22 }
 0x3b8   :  { %5058 = vmatpush1.msra.mxu1 %v10493_v60  ;;  %5144 = vmatpush1.msra.mxu0 %v4862_v12  ;;  %v4396_v12 = vpop.f32.mrf.mxu1  ;;  %v10677_v24 = vsub.f32 %v10600_v63, %v12192_v41  ;;  %v10682_v3 = vand.u32 4294901760, %v5298_v48  ;;  %v5312_v41 = vld [vmem:[#allocation5 + $0xb8] sm:$0xff] }
 0x3b9   :  { %5060 = vmatprep.subr.mxu1 %v10489_v43  ;;  %5148 = vmatprep.subr.mxu0 %v4868_v39  ;;  %v12195_v39 = vand.u32 4294901760, %v10624_v42 }
 0x3ba   :  { %5062 = vmatpush1.msra.mxu1 %v10483_v17  ;;  %5152 = vmatpush1.msra.mxu0 %v4874_v15  ;;  %v10680_v15 = vsub.f32 %v5300_v4, %v10636_v56  ;;  %13107 = vst [vmem:[#allocation76_spill] sm:$0xff] %v10682_v3  ;;  %v10720_v14 = vsub.f32 %v5298_v48, %v10682_v3 }
 0x3bb   :  { %5064 = vmatprep.subr.mxu1 %v10485_v30  ;;  %5156 = vmatprep.subr.mxu0 %v4880_v37  ;;  %v4397_v37 = vadd.f32 %v4396_v12, %v4284_v35  ;;  %v4485_v35 = vpop.f32.mrf.mxu0  ;;  %v4565_v12 = vpop.f32.mrf.mxu1  ;;  %v10709_v51 = vsub.f32 %v10624_v42, %v12195_v39  ;;  %v10724_v39 = vand.u32 4294901760, %v5296_v13 }
 0x3bc   :  { %13106 = vst [vmem:[#allocation72_spill] sm:$0xff] %v10680_v15  ;;  %5066 = vmatpush1.msra.mxu1 %v10487_v16  ;;  %5160 = vmatpush1.msra.mxu0 %v4886_v32  ;;  %v10699_v32 = vsub.f32 %v5299_v2, %v10658_v7  ;;  %v10714_v2 = vsub.f32 %v5314_v8, %v10668_v44  ;;  %13113 = vst [vmem:[#allocation18_spill] sm:$0xff] %v10720_v14 }
 0x3bd   :  { %5068 = vmatprep.subr.mxu1 %v10491_v25  ;;  %5164 = vmatprep.subr.mxu0 %v4892_v57  ;;  %v4395_v57 = vadd.f32 %v4394_v9, %v10591_v11  ;;  %v13115_v11 = vand.u32 4294901760, %v10642_v47  ;;  %v4486_v8 = vadd.f32 %v4485_v35, %v4397_v37  ;;  %v10746_v42 = vpop.f32.mrf.mxu0  ;;  %v10749_v37 = vsub.f32 %v5297_v10, %v10701_v22 }
 0x3be   :  { %13109 = vst [vmem:[#allocation21_spill] sm:$0xff] %v10699_v32  ;;  %5070 = vmatpush1.msra.mxu1 %v10495_v52  ;;  %5168 = vmatpush1.msra.mxu0 %v4898_v58  ;;  %13111 = vst [vmem:[#allocation41_spill] sm:$0xff] %v10714_v2  ;;  %v10722_v58 = vand.u32 4294901760, %v5312_v41  ;;  %v10757_v35 = vsub.f32 %v10666_v21, %v13119_v62  ;;  %v13120_v10 = vand.u32 4294901760, %v10680_v15 }
 0x3bf   :  { %5103 = vmatprep.mubr.f32.mxu1 %v13112_v29  ;;  %5234 = vmatprep.subr.mxu1 %v10509_v36  ;;  %v10731_v9 = vsub.f32 %v10642_v47, %v13115_v11  ;;  %v12200_v36 = vand.u32 4294901760, %v10689_v5  ;;  %v4567_v47 = vpop.f32.mrf.mxu1  ;;  %13118 = vst [vmem:[#allocation57_spill] sm:$0xff] %v10749_v37  ;;  %v5311_v11 = vld [vmem:[#allocation5 + $0xb0] sm:$0xff] }
 0x3c0   :  { %13114 = vst [vmem:[#allocation49_spill] sm:$0xff] %v10722_v58  ;;  %5107 = vmatmul.mubr.f32.vlgmr.msra.gmra.mxu1 %v10390_v33  ;;  %5201 = vmatprep.mubr.f32.mxu0 %v13112_v29  ;;  %v13117_v33 = vand.u32 4294901760, %v10656_v26  ;;  %v10772_v62 = vsub.f32 %v5312_v41, %v10722_v58 }
 0x3c1   :  { %5236 = vmatpush1.msra.mxu1 %v10493_v60  ;;  %5203 = vmatmul.mubr.f32.vlgmr.msra.gmra.mxu0 %v10353_v20  ;;  %v10769_v60 = vsub.f32 %v5296_v13, %v10724_v39  ;;  %v10791_v48 = vpop.f32.mrf.mxu1  ;;  %v13124_v13 = vand.u32 4294901760, %v10714_v2 }
 0x3c2   :  { %v10743_v4 = vsub.f32 %v10656_v26, %v13117_v33  ;;  %5238 = vmatprep.subr.mxu1 %v10489_v43  ;;  %5281 = vmatprep.mubr.f32.mxu1 %v13112_v29  ;;  %v4484_v33 = vadd.f32 %v4483_v27, %v4395_v57  ;;  %v10765_v43 = vsub.f32 %v10680_v15, %v13120_v10  ;;  %v5295_v27 = vld [vmem:[#allocation5 + $0x30] sm:$0xff] }
 0x3c3   :  { %5240 = vmatpush1.msra.mxu1 %v10483_v17  ;;  %7094 = vmatprep.subr.mxu0 %v10544_v59  ;;  %13121 = vst [vmem:[#allocation26_spill] sm:$0xff] %v10769_v60  ;;  %13122 = vst [vmem:[#allocation27_spill] sm:$0xff] %v10772_v62  ;;  %v10780_v57 = vsub.f32 %v10689_v5, %v12200_v36  ;;  %v4568_v10 = vadd.f32 %v4567_v47, %v4486_v8  ;;  %v4663_v17 = vpop.f32.mrf.mxu0  ;;  %v10794_v5 = vand.u32 4294901760, %v5311_v11  ;;  %v5310_v47 = vld [vmem:[#allocation5 + $0xa8] sm:$0xff] }
 0x3c4   :  { %5242 = vmatprep.subr.mxu1 %v10485_v30  ;;  %7095 = vmatpush3.msra.mxu0 %v10551_v23  ;;  %v13123_v30 = vand.u32 4294901760, %v10699_v32  ;;  %v4566_v8 = vadd.f32 %v4565_v12, %v4484_v33  ;;  %v10804_v29 = vand.u32 4294901760, %v5295_v27  ;;  %v13128_v12 = vand.u32 4294901760, %v10621_v31  ;;  %v5307_v31 = vld [vmem:[#allocation5 + $0x90] sm:$0xff] }
 0x3c5   :  { %5244 = vmatpush1.msra.mxu1 %v10487_v16  ;;  %7096 = vmatprep.subr.mxu0 %v10557_v46  ;;  %v13126_v16 = vand.u32 4294901760, %v10610_v18  ;;  %v4664_v21 = vadd.f32 %v4663_v17, %v4568_v10  ;;  %v13129_v18 = vand.u32 4294901760, %v10749_v37  ;;  %v5308_v10 = vld [vmem:[#allocation5 + $0x98] sm:$0xff]  ;;  %v13131_v33 = vand.u32 4294901760, %v10633_v55 }
 0x3c6   :  { %v10789_v41 = vsub.f32 %v10699_v32, %v13123_v30  ;;  %5246 = vmatprep.subr.mxu1 %v10491_v25  ;;  %7097 = vmatpush3.msra.mxu0 %v10570_v49  ;;  %v10802_v30 = vsub.f32 %v10714_v2, %v13124_v13  ;;  %v5294_v32 = vld [vmem:[#allocation5 + $0x28] sm:$0xff]  ;;  %v13125_v25 = vand.u32 4294901760, %v10720_v14  ;;  %v5309_v13 = vld [vmem:[#allocation5 + $0xa0] sm:$0xff]  ;;  %v13127_v2 = vand.u32 4294901760, %v10735_v50 }
 0x3c7   :  { %5248 = vmatpush1.msra.mxu1 %v10495_v52  ;;  %7098 = vmatprep.subr.mxu0 %v10580_v6  ;;  %v4743_v52 = vpop.f32.mrf.mxu1  ;;  %v10839_v17 = vand.u32 4294901760, %v5294_v32 }
 0x3c8   :  { %v10812_v15 = vsub.f32 %v10720_v14, %v13125_v25  ;;  %5283 = vmatmul.mubr.f32.vlgmr.msra.gmra.mxu1 %v10353_v20  ;;  %7129 = vmatprep.subr.mxu1 %v13126_v16  ;;  %v10823_v36 = vsub.f32 %v10735_v50, %v13127_v2  ;;  %v10825_v25 = vand.u32 4294901760, %v5310_v47  ;;  %v5293_v14 = vld [vmem:[#allocation5 + $0x20] sm:$0xff]  ;;  %v10834_v16 = vsub.f32 %v10749_v37, %v13129_v18  ;;  %v5292_v37 = vld [vmem:[#allocation5 + $0x18] sm:$0xff] }
 0x3c9   :  { %7130 = vmatpush3.msra.mxu1 %v13128_v12  ;;  %7099 = vmatpush3.msra.mxu0 %v10595_v0  ;;  %v10837_v2 = vsub.f32 %v5311_v11, %v10794_v5  ;;  %v4662_v12 = vadd.f32 %v10746_v42, %v4566_v8  ;;  %v10847_v20 = vsub.f32 %v5295_v27, %v10804_v29  ;;  %v10849_v18 = vand.u32 4294901760, %v5309_v13 }
 0x3ca   :  { %7131 = vmatprep.subr.mxu1 %v13131_v33  ;;  %7100 = vmatprep.subr.mxu0 %v10603_v38  ;;  %v13133_v11 = vand.u32 4294901760, %v10653_v28  ;;  %v13134_v33 = vand.u32 4294901760, %v10772_v62  ;;  %v13135_v42 = vand.u32 4294901760, %v10769_v60  ;;  %v10865_v8 = vand.u32 4294901760, %v5293_v14 }
 0x3cb   :  { %13130 = vst [vmem:[#allocation69_spill] sm:$0xff] %v10837_v2  ;;  %13132 = vst [vmem:[#allocation75_spill] sm:$0xff] %v10847_v20  ;;  %7101 = vmatpush3.msra.mxu0 %v10613_v54  ;;  %v13136_v28 = vand.u32 4294901760, %v10677_v24  ;;  %v4744_v55 = vadd.f32 %v4743_v52, %v4664_v21  ;;  %v10872_v54 = vsub.f32 %v5310_v47, %v10825_v25  ;;  %v5306_v21 = vld [vmem:[#allocation5 + $0x88] sm:$0xff]  ;;  %v13138_v47 = vand.u32 4294901760, %v10731_v9 }
 0x3cc   :  { %7132 = vmatpush3.msra.mxu1 %v13133_v11  ;;  %v10858_v50 = vsub.f32 %v10772_v62, %v13134_v33  ;;  %v10863_v27 = vsub.f32 %v10769_v60, %v13135_v42  ;;  %7102 = vmatprep.subr.mxu0 %v10626_v45  ;;  %v10874_v33 = vand.u32 4294901760, %v5308_v10  ;;  %v5291_v62 = vld [vmem:[#allocation5 + $0x10] sm:$0xff]  ;;  %v13137_v42 = vand.u32 4294901760, %v10709_v51  ;;  %v5290_v24 = vld [vmem:[#allocation5 + $0x8] sm:$0xff] }
 0x3cd   :  { %7133 = vmatprep.subr.mxu1 %v13136_v28  ;;  %7103 = vmatpush3.msra.mxu0 %v10636_v56  ;;  %v5519_v60 = vand.u32 4294901760, %v10834_v16  ;;  %v10882_v28 = vsub.f32 %v5294_v32, %v10839_v17  ;;  %v10884_v11 = vand.u32 4294901760, %v5292_v37  ;;  %v4742_v51 = vadd.f32 %v10791_v48, %v4662_v12  ;;  %v5305_v12 = vld [vmem:[#allocation5 + $0x80] sm:$0xff] }
 0x3ce   :  { %7134 = vmatpush3.msra.mxu1 %v13137_v42  ;;  %7104 = vmatprep.subr.mxu0 %v10644_v40  ;;  %v10892_v42 = vsub.f32 %v5309_v13, %v10849_v18  ;;  %v10894_v16 = vand.u32 4294901760, %v5307_v31  ;;  %v13139_v32 = vand.u32 4294901760, %v10743_v4  ;;  %v5638_v9 = vand.u32 4294901760, %v10858_v50 }
 0x3cf   :  { %7135 = vmatprep.subr.mxu1 %v13138_v47  ;;  %7105 = vmatpush3.msra.mxu0 %v10658_v7  ;;  %v5526_v47 = vand.u32 4294901760, %v10863_v27  ;;  %v10902_v40 = vsub.f32 %v5293_v14, %v10865_v8  ;;  %v10904_v48 = vand.u32 4294901760, %v5291_v62  ;;  %v13141_v13 = vand.u32 4294901760, %v10757_v35  ;;  %v5289_v27 = vld [vmem:[#allocation5] sm:$0xff] }
 0x3d0   :  { %7136 = vmatpush3.msra.mxu1 %v13139_v32  ;;  %7106 = vmatprep.subr.mxu0 %v10668_v44  ;;  %v10909_v52 = vand.u32 4294901760, %v4744_v55  ;;  %v10913_v32 = vsub.f32 %v5308_v10, %v10874_v33  ;;  %v10915_v50 = vand.u32 4294901760, %v5306_v21  ;;  %v13144_v14 = vand.u32 4294901760, %v10765_v43 }
 0x3d1   :  { %13140 = vst [vmem:[#allocation42_spill] sm:$0xff] %v10904_v48  ;;  %7137 = vmatprep.subr.mxu1 %v13141_v13  ;;  %7107 = vmatpush3.msra.mxu0 %v10682_v3  ;;  %v13145_v35 = vand.u32 4294901760, %v10837_v2  ;;  %v10925_v7 = vsub.f32 %v5292_v37, %v10884_v11  ;;  %v10927_v4 = vand.u32 4294901760, %v5290_v24  ;;  %v13146_v10 = vand.u32 4294901760, %v10780_v57 }
 0x3d2   :  { %13142 = vst [vmem:[#allocation83_spill] sm:$0xff] %v10909_v52  ;;  %13143 = vst [vmem:[#allocation46_spill] sm:$0xff] %v10915_v50  ;;  %7138 = vmatpush3.msra.mxu1 %v13144_v14  ;;  %7108 = vmatprep.subr.mxu0 %v10691_v61  ;;  %v10932_v43 = vand.u32 4294901760, %v4742_v51  ;;  %v10936_v3 = vsub.f32 %v5307_v31, %v10894_v16  ;;  %v13149_v44 = vand.u32 4294901760, %v10789_v41  ;;  %v13150_v37 = vand.u32 4294901760, %v10847_v20 }
 0x3d3   :  { %v5644_v13 = vsub.f32 %v10837_v2, %v13145_v35  ;;  %7139 = vmatprep.subr.mxu1 %v13146_v10  ;;  %v10938_v35 = vand.u32 4294901760, %v5305_v12  ;;  %7109 = vmatpush3.msra.mxu0 %v10701_v22  ;;  %v10948_v2 = vsub.f32 %v5291_v62, %v10904_v48  ;;  %v10950_v14 = vand.u32 4294901760, %v5289_v27 }
 0x3d4   :  { %13147 = vst [vmem:[#allocation85_spill] sm:$0xff] %v10932_v43  ;;  %7140 = vmatpush3.msra.mxu1 %v13149_v44  ;;  %v5532_v57 = vsub.f32 %v10847_v20, %v13150_v37  ;;  %v13151_v31 = vand.u32 4294901760, %v10802_v30  ;;  %7110 = vmatprep.subr.mxu0 %v10722_v58  ;;  %v10956_v44 = vsub.f32 %v4744_v55, %v10909_v52  ;;  %v13152_v41 = vand.u32 4294901760, %v10872_v54 }
 0x3d5   :  { %13148 = vst [vmem:[#allocation50_spill] sm:$0xff] %v10938_v35  ;;  %v12239_v37 = vand.u32 4294901760, %v10913_v32  ;;  %v10963_v10 = vsub.f32 %v5306_v21, %v10915_v50  ;;  %v13154_v62 = vand.u32 4294901760, %v10812_v15  ;;  %7111 = vmatpush3.msra.mxu0 %v10724_v39  ;;  %v5645_v30 = vand.u32 4294901760, %v5644_v13  ;;  %5690 = vmatprep.mubr.f32.mxu1 %v10909_v52  ;;  %v13184_v52 = vld [vmem:[#allocation69_spill] sm:$0xff] }
 0x3d6   :  { %7141 = vmatprep.subr.mxu1 %v13151_v31  ;;  %v5651_v22 = vsub.f32 %v10872_v54, %v13152_v41  ;;  %v13155_v31 = vand.u32 4294901760, %v10882_v28  ;;  %v10973_v58 = vsub.f32 %v5290_v24, %v10927_v4  ;;  %v13156_v41 = vand.u32 4294901760, %v10823_v36  ;;  %7112 = vmatprep.subr.mxu0 %v10794_v5 }
 0x3d7   :  { %13153 = vst [vmem:[#allocation58_spill] sm:$0xff] %v10963_v10  ;;  %7142 = vmatpush3.msra.mxu1 %v13154_v62  ;;  %v10978_v21 = vsub.f32 %v4742_v51, %v10932_v43  ;;  %v13157_v15 = vand.u32 4294901760, %v10892_v42  ;;  %v12240_v62 = vand.u32 4294901760, %v10936_v3  ;;  %7113 = vmatpush3.msra.mxu0 %v10804_v29  ;;  %v5533_v24 = vand.u32 4294901760, %v5532_v57 }
 0x3d8   :  { %v5539_v55 = vsub.f32 %v10882_v28, %v13155_v31  ;;  %7143 = vmatprep.subr.mxu1 %v13156_v41  ;;  %v10986_v31 = vsub.f32 %v5305_v12, %v10938_v35  ;;  %v13158_v36 = vand.u32 4294901760, %v10902_v40  ;;  %v10994_v20 = vsub.f32 %v5289_v27, %v10950_v14  ;;  %7114 = vmatprep.subr.mxu0 %v10825_v25 }
 0x3d9   :  { %v5658_v13 = vsub.f32 %v10892_v42, %v13157_v15  ;;  %7144 = vmatpush3.msra.mxu1 %v5519_v60  ;;  %v5652_v15 = vand.u32 4294901760, %v5651_v22  ;;  %v5665_v60 = vsub.f32 %v10913_v32, %v12239_v37  ;;  %v12241_v12 = vand.u32 4294901760, %v10963_v10  ;;  %7115 = vmatpush3.msra.mxu0 %v10839_v17 }
 0x3da   :  { %v5546_v51 = vsub.f32 %v10902_v40, %v13158_v36  ;;  %13159 = vst [vmem:[#allocation54_spill] sm:$0xff] %v10994_v20  ;;  %7145 = vmatprep.subr.mxu1 %v5638_v9  ;;  %v5540_v36 = vand.u32 4294901760, %v5539_v55  ;;  %v13160_v41 = vand.u32 4294901760, %v10925_v7  ;;  %7116 = vmatprep.subr.mxu0 %v10849_v18  ;;  %v5672_v57 = vsub.f32 %v10936_v3, %v12240_v62 }
 0x3db   :  { %7146 = vmatpush3.msra.mxu1 %v5526_v47  ;;  %v5659_v37 = vand.u32 4294901760, %v5658_v13  ;;  %v12242_v47 = vand.u32 4294901760, %v10986_v31  ;;  %7117 = vmatpush3.msra.mxu0 %v10865_v8  ;;  %v5679_v13 = vsub.f32 %v10963_v10, %v12241_v12  ;;  %v13162_v62 = vand.u32 4294901760, %v10956_v44 }
 0x3dc   :  { %v5553_v27 = vsub.f32 %v10925_v7, %v13160_v41  ;;  %7147 = vmatprep.subr.mxu1 %v5645_v30  ;;  %v5547_v55 = vand.u32 4294901760, %v5546_v51  ;;  %v13161_v41 = vand.u32 4294901760, %v10948_v2  ;;  %7118 = vmatprep.subr.mxu0 %v10874_v33  ;;  %v5666_v30 = vand.u32 4294901760, %v5665_v60 }
 0x3dd   :  { %7148 = vmatpush3.msra.mxu1 %v5533_v24  ;;  %v5452_v24 = vsub.f32 %v10956_v44, %v13162_v62  ;;  %7119 = vmatpush3.msra.mxu0 %v10884_v11  ;;  %v5673_v12 = vand.u32 4294901760, %v5672_v57  ;;  %v5686_v62 = vsub.f32 %v10986_v31, %v12242_v47 }
 0x3de   :  { %v5560_v9 = vsub.f32 %v10948_v2, %v13161_v41  ;;  %7149 = vmatprep.subr.mxu1 %v5652_v15  ;;  %v5554_v51 = vand.u32 4294901760, %v5553_v27  ;;  %v13163_v41 = vand.u32 4294901760, %v10973_v58  ;;  %v13164_v15 = vand.u32 4294901760, %v10978_v21  ;;  %7120 = vmatprep.subr.mxu0 %v10894_v16 }
 0x3df   :  { %7150 = vmatpush3.msra.mxu1 %v5540_v36  ;;  %7121 = vmatpush3.msra.mxu0 %v10904_v48  ;;  %v13165_v27 = vand.u32 4294901760, %v10994_v20 }
 0x3e0   :  { %v5567_v22 = vsub.f32 %v10973_v58, %v13163_v41  ;;  %v5458_v60 = vsub.f32 %v10978_v21, %v13164_v15  ;;  %7151 = vmatprep.subr.mxu1 %v5659_v37  ;;  %v5561_v36 = vand.u32 4294901760, %v5560_v9  ;;  %7122 = vmatprep.subr.mxu0 %v10915_v50  ;;  %v5680_v15 = vand.u32 4294901760, %v5679_v13  ;;  %v13170_v13 = vld [vmem:[#allocation103_spill] sm:$0xff] }
 0x3e1   :  { %7152 = vmatpush3.msra.mxu1 %v5547_v55  ;;  %v5574_v41 = vsub.f32 %v10994_v20, %v13165_v27  ;;  %v5453_v37 = vand.u32 4294901760, %v5452_v24  ;;  %7123 = vmatpush3.msra.mxu0 %v10927_v4  ;;  %v5687_v55 = vand.u32 4294901760, %v5686_v62  ;;  %v13171_v24 = vld [vmem:[#allocation88_spill] sm:$0xff]  ;;  %v13174_v62 = vld [vmem:[#allocation14_spill] sm:$0xff] }
 0x3e2   :  { %7153 = vmatprep.subr.mxu1 %v5666_v30  ;;  %v5568_v57 = vand.u32 4294901760, %v5567_v22  ;;  %7124 = vmatprep.subr.mxu0 %v10938_v35  ;;  %v5459_v47 = vand.u32 4294901760, %v5458_v60  ;;  %v13167_v22 = vld [vmem:[#allocation92_spill] sm:$0xff]  ;;  %v13173_v60 = vld [vmem:[#allocation41_spill] sm:$0xff]  ;;  %v13176_v27 = vld [vmem:[#allocation66_spill] sm:$0xff] }
 0x3e3   :  { %7154 = vmatpush3.msra.mxu1 %v5554_v51  ;;  %7125 = vmatpush3.msra.mxu0 %v10950_v14  ;;  %v5575_v9 = vand.u32 4294901760, %v5574_v41  ;;  %v13169_v30 = vld [vmem:[#allocation72_spill] sm:$0xff]  ;;  %v13172_v51 = vld [vmem:[#allocation21_spill] sm:$0xff] }
 0x3e4   :  { %7155 = vmatprep.subr.mxu1 %v5673_v12  ;;  %5454 = vmatprep.mubr.f32.mxu0 %v5453_v37  ;;  %v13166_v12 = vld [vmem:[#allocation104_spill] sm:$0xff]  ;;  %v13179_v37 = vld [vmem:[#allocation57_spill] sm:$0xff] }
 0x3e5   :  { %7156 = vmatpush3.msra.mxu1 %v5561_v36  ;;  %7164 = vmatprep.subr.mxu0 %v10568_v53  ;;  %v13175_v36 = vld [vmem:[#allocation18_spill] sm:$0xff]  ;;  %v13177_v41 = vld [vmem:[#allocation24_spill] sm:$0xff] }
 0x3e6   :  { %7157 = vmatprep.subr.mxu1 %v5680_v15  ;;  %5460 = vmatmul.mubr.f32.vlgmr.msra.gmra.mxu0 %v5459_v47  ;;  %v13168_v47 = vld [vmem:[#allocation13_spill] sm:$0xff]  ;;  %v13178_v15 = vld [vmem:[#allocation68_spill] sm:$0xff] }
 0x3e7   :  { %7158 = vmatpush3.msra.mxu1 %v5568_v57  ;;  %7165 = vmatpush3.msra.mxu0 %v10577_v1  ;;  %v13180_v57 = vld [vmem:[#allocation76_spill] sm:$0xff] }
 0x3e8   :  { %7159 = vmatprep.subr.mxu1 %v5687_v55  ;;  %7166 = vmatprep.subr.mxu0 %v10583_v19  ;;  %v13181_v55 = vld [vmem:[#allocation27_spill] sm:$0xff] }
 0x3e9   :  { %7160 = vmatpush3.msra.mxu1 %v5575_v9  ;;  %7167 = vmatpush3.msra.mxu0 %v10589_v34  ;;  %v13182_v9 = vld [vmem:[#allocation26_spill] sm:$0xff] }
 0x3ea   :  { %7199 = vmatprep.subr.mxu1 %v10544_v59  ;;  %5692 = vmatmul.mubr.f32.vlgmr.msra.gmra.mxu1 %v10932_v43  ;;  %v13183_v43 = vld [vmem:[#allocation33_spill] sm:$0xff] }
 0x3eb   :  { %7200 = vmatpush3.msra.mxu1 %v10551_v23  ;;  %7168 = vmatprep.subr.mxu0 %v10600_v63 }
 0x3ec   :  { %7201 = vmatprep.subr.mxu1 %v10557_v46  ;;  %7169 = vmatpush3.msra.mxu0 %v13166_v12 }
 0x3ed   :  { %7202 = vmatpush3.msra.mxu1 %v10570_v49  ;;  %7170 = vmatprep.subr.mxu0 %v13167_v22 }
 0x3ee   :  { %7203 = vmatprep.subr.mxu1 %v10580_v6  ;;  %7171 = vmatpush3.msra.mxu0 %v10656_v26 }
 0x3ef   :  { %7204 = vmatpush3.msra.mxu1 %v10595_v0  ;;  %7172 = vmatprep.subr.mxu0 %v13168_v47 }
 0x3f0   :  { %7205 = vmatprep.subr.mxu1 %v10603_v38  ;;  %7173 = vmatpush3.msra.mxu0 %v13169_v30 }
 0x3f1   :  { %7206 = vmatpush3.msra.mxu1 %v13170_v13  ;;  %7174 = vmatprep.subr.mxu0 %v13171_v24 }
 0x3f2   :  { %7207 = vmatprep.subr.mxu1 %v10626_v45  ;;  %7175 = vmatpush3.msra.mxu0 %v13172_v51 }
 0x3f3   :  { %7208 = vmatpush3.msra.mxu1 %v10636_v56  ;;  %7176 = vmatprep.subr.mxu0 %v13173_v60 }
 0x3f4   :  { %7209 = vmatprep.subr.mxu1 %v13174_v62  ;;  %7177 = vmatpush3.msra.mxu0 %v13175_v36  ;;  %v13185_v36 = vld [vmem:[#allocation49_spill] sm:$0xff] }
 0x3f5   :  { %7210 = vmatpush3.msra.mxu1 %v13176_v27  ;;  %7178 = vmatprep.subr.mxu0 %v13177_v41  ;;  %v13186_v27 = vld [vmem:[#allocation75_spill] sm:$0xff] }
 0x3f6   :  { %7211 = vmatprep.subr.mxu1 %v13178_v15  ;;  %7179 = vmatpush3.msra.mxu0 %v13179_v37 }
 0x3f7   :  { %7212 = vmatpush3.msra.mxu1 %v13180_v57  ;;  %7180 = vmatprep.subr.mxu0 %v13181_v55 }
 0x3f8   :  { %7213 = vmatprep.subr.mxu1 %v10691_v61  ;;  %7181 = vmatpush3.msra.mxu0 %v13182_v9 }
 0x3f9   :  { %7214 = vmatpush3.msra.mxu1 %v13183_v43  ;;  %7182 = vmatprep.subr.mxu0 %v13184_v52 }
 0x3fa   :  { %7215 = vmatprep.subr.mxu1 %v13185_v36  ;;  %7183 = vmatpush3.msra.mxu0 %v13186_v27 }
 0x3fb   :  { %7216 = vmatpush3.msra.mxu1 %v10724_v39  ;;  %7184 = vmatprep.subr.mxu0 %v10872_v54 }
 0x3fc   :  { %7217 = vmatprep.subr.mxu1 %v10794_v5  ;;  %7185 = vmatpush3.msra.mxu0 %v10882_v28 }
 0x3fd   :  { %7218 = vmatpush3.msra.mxu1 %v10804_v29  ;;  %7186 = vmatprep.subr.mxu0 %v10892_v42 }
 0x3fe   :  { %7219 = vmatprep.subr.mxu1 %v10825_v25  ;;  %7187 = vmatpush3.msra.mxu0 %v10902_v40 }
 0x3ff   :  { %7220 = vmatpush3.msra.mxu1 %v10839_v17  ;;  %7188 = vmatprep.subr.mxu0 %v10913_v32 }
 0x400   :  { %7221 = vmatprep.subr.mxu1 %v10849_v18  ;;  %7189 = vmatpush3.msra.mxu0 %v10925_v7 }
 0x401   :  { %7222 = vmatpush3.msra.mxu1 %v10865_v8  ;;  %7190 = vmatprep.subr.mxu0 %v10936_v3 }
 0x402   :  { %7223 = vmatprep.subr.mxu1 %v10874_v33  ;;  %7191 = vmatpush3.msra.mxu0 %v10948_v2 }
 0x403   :  { %7224 = vmatpush3.msra.mxu1 %v10884_v11  ;;  %7192 = vmatprep.subr.mxu0 %v10963_v10  ;;  %v13187_v10 = vand.u32 4294901760, %v10568_v53  ;;  %v13192_v53 = vand.u32 4294901760, %v10589_v34  ;;  %v13197_v34 = vand.u32 4294901760, %v13168_v47 }
 0x404   :  { %7225 = vmatprep.subr.mxu1 %v10894_v16  ;;  %7193 = vmatpush3.msra.mxu0 %v10973_v58 }
 0x405   :  { %7226 = vmatpush3.msra.mxu1 %v10904_v48  ;;  %7194 = vmatprep.subr.mxu0 %v10986_v31  ;;  %v13188_v48 = vand.u32 4294901760, %v10577_v1  ;;  %v13194_v1 = vand.u32 4294901760, %v13166_v12  ;;  %v5334_v12 = vld [vmem:[#allocation5 + $0x168] sm:$0xff] }
 0x406   :  { %7227 = vmatprep.subr.mxu1 %v10915_v50  ;;  %7195 = vmatpush3.msra.mxu0 %v10994_v20  ;;  %v13189_v50 = vand.u32 4294901760, %v10956_v44  ;;  %v13190_v20 = vand.u32 4294901760, %v10583_v19  ;;  %v13196_v19 = vand.u32 4294901760, %v10656_v26  ;;  %v13200_v26 = vand.u32 4294901760, %v13172_v51  ;;  %v5333_v51 = vld [vmem:[#allocation5 + $0x160] sm:$0xff] }
 0x407   :  { %7228 = vmatpush3.msra.mxu1 %v10927_v4  ;;  %5827 = vmatprep.mubr.f32.mxu0 %v10956_v44 }
 0x408   :  { %7229 = vmatprep.subr.mxu1 %v10938_v35  ;;  %7234 = vmatprep.subr.mxu0 %v13187_v10  ;;  %v13191_v35 = vand.u32 4294901760, %v10978_v21  ;;  %v13193_v10 = vand.u32 4294901760, %v10600_v63  ;;  %v13199_v63 = vand.u32 4294901760, %v13171_v24 }
 0x409   :  { %5830 = vmatmul.mubr.f32.vlgmr.msra.gmra.mxu0 %v10978_v21  ;;  %7230 = vmatpush3.msra.mxu1 %v10950_v14 }
 0x40a   :  { %7235 = vmatpush3.msra.mxu0 %v13188_v48  ;;  %5934 = vmatprep.mubr.f32.mxu1 %v13189_v50  ;;  %v5350_v50 = vld [vmem:[#allocation5 + $0x1e8] sm:$0xff] }
 0x40b   :  { %7236 = vmatprep.subr.mxu0 %v13190_v20  ;;  %7269 = vmatprep.subr.mxu1 %v10544_v59  ;;  %v13195_v59 = vand.u32 4294901760, %v13167_v22  ;;  %v13201_v20 = vand.u32 4294901760, %v13173_v60  ;;  %v13205_v22 = vand.u32 4294901760, %v13177_v41  ;;  %v11173_v24 = vand.u32 4294901760, %v5350_v50 }
 0x40c   :  { %5938 = vmatmul.mubr.f32.vlgmr.msra.gmra.mxu1 %v13191_v35  ;;  %7237 = vmatpush3.msra.mxu0 %v13192_v53  ;;  %v13202_v35 = vld [vmem:[#allocation18_spill] sm:$0xff]  ;;  %v13208_v60 = vand.u32 4294901760, %v13181_v55  ;;  %v11181_v41 = vand.u32 4294901760, %v5334_v12  ;;  %v13209_v53 = vand.u32 4294901760, %v13182_v9  ;;  %v5332_v55 = vld [vmem:[#allocation5 + $0x158] sm:$0xff]  ;;  %v11198_v9 = vand.u32 4294901760, %v5333_v51 }
 0x40d   :  { %7270 = vmatpush3.msra.mxu1 %v10551_v23  ;;  %7238 = vmatprep.subr.mxu0 %v13193_v10  ;;  %v5352_v23 = vld [vmem:[#allocation5 + $0x1f8] sm:$0xff]  ;;  %v13203_v44 = vand.u32 4294901760, %v13202_v35  ;;  %v13210_v10 = vand.u32 4294901760, %v13184_v52  ;;  %v13220_v35 = vand.u32 4294901760, %v10902_v40 }
 0x40e   :  { %7271 = vmatprep.subr.mxu1 %v10557_v46  ;;  %7239 = vmatpush3.msra.mxu0 %v13194_v1  ;;  %v13198_v46 = vand.u32 4294901760, %v13169_v30  ;;  %v5349_v30 = vld [vmem:[#allocation5 + $0x1e0] sm:$0xff] }
 0x40f   :  { %7272 = vmatpush3.msra.mxu1 %v10570_v49  ;;  %7240 = vmatprep.subr.mxu0 %v13195_v59  ;;  %v5336_v49 = vld [vmem:[#allocation5 + $0x178] sm:$0xff]  ;;  %v5347_v59 = vld [vmem:[#allocation5 + $0x1d0] sm:$0xff] }
 0x410   :  { %7273 = vmatprep.subr.mxu1 %v10580_v6  ;;  %7241 = vmatpush3.msra.mxu0 %v13196_v19  ;;  %v11147_v6 = vand.u32 4294901760, %v5352_v23  ;;  %v11155_v48 = vand.u32 4294901760, %v5336_v49  ;;  %v11204_v19 = vsub.f32 %v5350_v50, %v11173_v24  ;;  %v5345_v50 = vld [vmem:[#allocation5 + $0x1c0] sm:$0xff] }
 0x411   :  { %7274 = vmatpush3.msra.mxu1 %v10595_v0  ;;  %7242 = vmatprep.subr.mxu0 %v13197_v34  ;;  %v5351_v0 = vld [vmem:[#allocation5 + $0x1f0] sm:$0xff] }
 0x412   :  { %7275 = vmatprep.subr.mxu1 %v10603_v38  ;;  %7243 = vmatpush3.msra.mxu0 %v13198_v46  ;;  %v5335_v38 = vld [vmem:[#allocation5 + $0x170] sm:$0xff]  ;;  %v11160_v21 = vand.u32 4294901760, %v5351_v0  ;;  %13212 = vst [vmem:[#allocation91_spill] sm:$0xff] %v11204_v19  ;;  %v11213_v46 = vsub.f32 %v5334_v12, %v11181_v41 }
 0x413   :  { %7276 = vmatpush3.msra.mxu1 %v13170_v13  ;;  %7244 = vmatprep.subr.mxu0 %v13199_v63  ;;  %v11168_v47 = vand.u32 4294901760, %v5335_v38  ;;  %v13207_v13 = vand.u32 4294901760, %v13179_v37 }
 0x414   :  { %7277 = vmatprep.subr.mxu1 %v10626_v45  ;;  %7245 = vmatpush3.msra.mxu0 %v13200_v26  ;;  %v13204_v45 = vld [vmem:[#allocation66_spill] sm:$0xff]  ;;  %v11187_v37 = vsub.f32 %v5351_v0, %v11160_v21  ;;  %13214 = vst [vmem:[#allocation94_spill] sm:$0xff] %v11213_v46  ;;  %v11224_v0 = vand.u32 4294901760, %v5347_v59  ;;  %v13217_v26 = vand.u32 4294901760, %v10892_v42  ;;  %v12254_v40 = vand.u32 4294901760, %v11213_v46 }
 0x415   :  { %7278 = vmatpush3.msra.mxu1 %v10636_v56  ;;  %7246 = vmatprep.subr.mxu0 %v13201_v20  ;;  %v11166_v56 = vsub.f32 %v5352_v23, %v11147_v6  ;;  %v11196_v1 = vsub.f32 %v5335_v38, %v11168_v47  ;;  %v5331_v23 = vld [vmem:[#allocation5 + $0x150] sm:$0xff]  ;;  %v11236_v38 = vsub.f32 %v5333_v51, %v11198_v9 }
 0x416   :  { %7279 = vmatprep.subr.mxu1 %v13174_v62  ;;  %7247 = vmatpush3.msra.mxu0 %v13203_v44  ;;  %v11179_v62 = vsub.f32 %v5336_v49, %v11155_v48  ;;  %v5346_v49 = vld [vmem:[#allocation5 + $0x1c8] sm:$0xff]  ;;  %v12259_v63 = vand.u32 4294901760, %v11187_v37  ;;  %v11238_v20 = vand.u32 4294901760, %v5331_v23  ;;  %v11273_v51 = vsub.f32 %v5347_v59, %v11224_v0 }
 0x417   :  { %7280 = vmatpush3.msra.mxu1 %v13204_v45  ;;  %7248 = vmatprep.subr.mxu0 %v13205_v22  ;;  %13206 = vst [vmem:[#allocation60_spill] sm:$0xff] %v11166_v56  ;;  %13218 = vst [vmem:[#allocation115_spill] sm:$0xff] %v11236_v38  ;;  %v11247_v44 = vand.u32 4294901760, %v5346_v49  ;;  %v13222_v45 = vand.u32 4294901760, %v10913_v32 }
 0x418   :  { %7281 = vmatprep.subr.mxu1 %v13178_v15  ;;  %7249 = vmatpush3.msra.mxu0 %v13207_v13  ;;  %v5348_v15 = vld [vmem:[#allocation5 + $0x1d8] sm:$0xff]  ;;  %v12260_v34 = vand.u32 4294901760, %v11179_v62  ;;  %13219 = vst [vmem:[#allocation113_spill] sm:$0xff] %v11238_v20  ;;  %v13224_v13 = vand.u32 4294901760, %v10925_v7  ;;  %13225 = vst [vmem:[#allocation64_spill] sm:$0xff] %v11273_v51 }
 0x419   :  { %7282 = vmatpush3.msra.mxu1 %v13180_v57  ;;  %7250 = vmatprep.subr.mxu0 %v13208_v60  ;;  %v11189_v57 = vand.u32 4294901760, %v5349_v30  ;;  %v11206_v52 = vand.u32 4294901760, %v5348_v15  ;;  %v11275_v60 = vand.u32 4294901760, %v5345_v50  ;;  %v11300_v59 = vsub.f32 %v5346_v49, %v11247_v44 }
 0x41a   :  { %7283 = vmatprep.subr.mxu1 %v10691_v61  ;;  %7251 = vmatpush3.msra.mxu0 %v13209_v53  ;;  %v12262_v61 = vand.u32 4294901760, %v11166_v56  ;;  %v11255_v12 = vsub.f32 %v11179_v62, %v12260_v34  ;;  %v12253_v53 = vand.u32 4294901760, %v11236_v38 }
 0x41b   :  { %7284 = vmatpush3.msra.mxu1 %v13183_v43  ;;  %7252 = vmatprep.subr.mxu0 %v13210_v10  ;;  %v13211_v43 = vand.u32 4294901760, %v13186_v27  ;;  %v11215_v27 = vand.u32 4294901760, %v5332_v55  ;;  %v11245_v42 = vsub.f32 %v5348_v15, %v11206_v52  ;;  %v13226_v15 = vand.u32 4294901760, %v10936_v3  ;;  %13229 = vst [vmem:[#allocation98_spill] sm:$0xff] %v11300_v59 }
 0x41c   :  { %7285 = vmatprep.subr.mxu1 %v13185_v36  ;;  %v13213_v36 = vand.u32 4294901760, %v10872_v54  ;;  %v11222_v54 = vsub.f32 %v5349_v30, %v11189_v57  ;;  %v5329_v30 = vld [vmem:[#allocation5 + $0x140] sm:$0xff]  ;;  %v13228_v10 = vand.u32 4294901760, %v10948_v2  ;;  %v6332_v2 = vand.u32 4294901760, %v11255_v12 }
 0x41d   :  { %7253 = vmatpush3.msra.mxu0 %v13211_v43  ;;  %7286 = vmatpush3.msra.mxu1 %v10724_v39  ;;  %v13215_v39 = vand.u32 4294901760, %v10882_v28  ;;  %v11232_v28 = vsub.f32 %v11166_v56, %v12262_v61  ;;  %13221 = vst [vmem:[#allocation117_spill] sm:$0xff] %v11245_v42  ;;  %v11302_v43 = vand.u32 4294901760, %v5329_v30  ;;  %v12261_v12 = vand.u32 4294901760, %v11273_v51 }
 0x41e   :  { %7254 = vmatprep.subr.mxu0 %v13213_v36  ;;  %7287 = vmatprep.subr.mxu1 %v10794_v5  ;;  %13216 = vst [vmem:[#allocation105_spill] sm:$0xff] %v11222_v54  ;;  %v5330_v5 = vld [vmem:[#allocation5 + $0x148] sm:$0xff]  ;;  %v12252_v32 = vand.u32 4294901760, %v11222_v54  ;;  %v5344_v36 = vld [vmem:[#allocation5 + $0x1b8] sm:$0xff] }
 0x41f   :  { %7255 = vmatpush3.msra.mxu0 %v13215_v39  ;;  %7288 = vmatpush3.msra.mxu1 %v10804_v29  ;;  %v12257_v29 = vand.u32 4294901760, %v11196_v1  ;;  %v11261_v22 = vand.u32 4294901760, %v5330_v5  ;;  %v6444_v7 = vand.u32 4294901760, %v11232_v28  ;;  %v13233_v28 = vand.u32 4294901760, %v10973_v58  ;;  %v13237_v58 = vld [vmem:[#allocation46_spill] sm:$0xff] }
 0x420   :  { %7256 = vmatprep.subr.mxu0 %v13217_v26  ;;  %7289 = vmatprep.subr.mxu1 %v10825_v25  ;;  %v12256_v25 = vand.u32 4294901760, %v11204_v19 }
 0x421   :  { %7257 = vmatpush3.msra.mxu0 %v13220_v35  ;;  %7290 = vmatpush3.msra.mxu1 %v10839_v17  ;;  %v11259_v17 = vsub.f32 %v5332_v55, %v11215_v27  ;;  %v11288_v55 = vsub.f32 %v5331_v23, %v11238_v20  ;;  %v13230_v23 = vld [vmem:[#allocation58_spill] sm:$0xff]  ;;  %v11315_v49 = vsub.f32 %v5330_v5, %v11261_v22  ;;  %v13236_v5 = vand.u32 4294901760, %v10986_v31 }
 0x422   :  { %7258 = vmatprep.subr.mxu0 %v13222_v45  ;;  %7291 = vmatprep.subr.mxu1 %v10849_v18  ;;  %v11269_v18 = vsub.f32 %v11187_v37, %v12259_v63  ;;  %v11296_v3 = vsub.f32 %v11204_v19, %v12256_v25  ;;  %v13231_v39 = vand.u32 4294901760, %v13230_v23  ;;  %v13234_v35 = vld [vmem:[#allocation42_spill] sm:$0xff]  ;;  %v5342_v25 = vld [vmem:[#allocation5 + $0x1a8] sm:$0xff] }
 0x423   :  { %13223 = vst [vmem:[#allocation89_spill] sm:$0xff] %v11259_v17  ;;  %7259 = vmatpush3.msra.mxu0 %v13224_v13  ;;  %7292 = vmatpush3.msra.mxu1 %v10865_v8  ;;  %v11284_v8 = vsub.f32 %v11196_v1, %v12257_v29  ;;  %13227 = vst [vmem:[#allocation122_spill] sm:$0xff] %v11288_v55  ;;  %v12258_v26 = vand.u32 4294901760, %v11259_v17  ;;  %v11328_v13 = vsub.f32 %v5345_v50, %v11275_v60  ;;  %v13238_v50 = vld [vmem:[#allocation54_spill] sm:$0xff]  ;;  %v5326_v63 = vld [vmem:[#allocation5 + $0x128] sm:$0xff] }
 0x424   :  { %7260 = vmatprep.subr.mxu0 %v13226_v15  ;;  %7293 = vmatprep.subr.mxu1 %v10874_v33  ;;  %v12255_v33 = vand.u32 4294901760, %v11245_v42  ;;  %13232 = vst [vmem:[#allocation99_spill] sm:$0xff] %v11315_v49  ;;  %v6451_v45 = vand.u32 4294901760, %v11269_v18  ;;  %v5328_v15 = vld [vmem:[#allocation5 + $0x138] sm:$0xff]  ;;  %v11337_v18 = vsub.f32 %v11236_v38, %v12253_v53  ;;  %v12263_v23 = vand.u32 4294901760, %v11288_v55  ;;  %v5327_v53 = vld [vmem:[#allocation5 + $0x130] sm:$0xff] }
 0x425   :  { %7261 = vmatpush3.msra.mxu0 %v13228_v10  ;;  %7294 = vmatpush3.msra.mxu1 %v10884_v11  ;;  %v11311_v11 = vsub.f32 %v11213_v46, %v12254_v40  ;;  %13235 = vst [vmem:[#allocation29_spill] sm:$0xff] %v11328_v13  ;;  %v6339_v10 = vand.u32 4294901760, %v11284_v8  ;;  %v6458_v31 = vand.u32 4294901760, %v11296_v3  ;;  %v13242_v40 = vld [vmem:[#allocation85_spill] sm:$0xff]  ;;  %v11361_v3 = vsub.f32 %v11259_v17, %v12258_v26  ;;  %v13243_v29 = vld [vmem:[#allocation50_spill] sm:$0xff] }
 0x426   :  { %7262 = vmatprep.subr.mxu0 %v13231_v39  ;;  %7295 = vmatprep.subr.mxu1 %v10894_v16  ;;  %v11324_v16 = vsub.f32 %v11222_v54, %v12252_v32  ;;  %v11340_v39 = vand.u32 4294901760, %v5344_v36  ;;  %v13240_v32 = vld [vmem:[#allocation83_spill] sm:$0xff]  ;;  %v11349_v8 = vsub.f32 %v11245_v42, %v12255_v33  ;;  %v11364_v33 = vand.u32 4294901760, %v5328_v15 }
 0x427   :  { %7263 = vmatpush3.msra.mxu0 %v13233_v28  ;;  %7296 = vmatpush3.msra.mxu1 %v13234_v35  ;;  %v5343_v28 = vld [vmem:[#allocation5 + $0x1b0] sm:$0xff]  ;;  %v13239_v35 = vand.u32 4294901760, %v13238_v50  ;;  %v6346_v50 = vand.u32 4294901760, %v11311_v11  ;;  %v6353_v34 = vand.u32 4294901760, %v11337_v18  ;;  %v5325_v11 = vld [vmem:[#allocation5 + $0x120] sm:$0xff]  ;;  %v13246_v61 = vand.u32 4294901760, %v11328_v13 }
 0x428   :  { %7264 = vmatprep.subr.mxu0 %v13236_v5  ;;  %7297 = vmatprep.subr.mxu1 %v13237_v58  ;;  %v12264_v5 = vand.u32 4294901760, %v11300_v59  ;;  %v11353_v58 = vsub.f32 %v5329_v30, %v11302_v43  ;;  %v11372_v30 = vsub.f32 %v11273_v51, %v12261_v12  ;;  %v11375_v26 = vand.u32 4294901760, %v5343_v28  ;;  %v5341_v12 = vld [vmem:[#allocation5 + $0x1a0] sm:$0xff] }
 0x429   :  { %7265 = vmatpush3.msra.mxu0 %v13239_v35  ;;  %6104 = vmatprep.mubr.f32.mxu0 %v13240_v32  ;;  %v12267_v35 = vand.u32 4294901760, %v11315_v49 }
 0x42a   :  { %13241 = vst [vmem:[#allocation106_spill] sm:$0xff] %v11353_v58  ;;  %7298 = vmatpush3.msra.mxu1 %v10927_v4  ;;  %6106 = vmatmul.mubr.f32.vlgmr.msra.gmra.mxu0 %v13242_v40  ;;  %v6465_v4 = vand.u32 4294901760, %v11324_v16  ;;  %v11388_v16 = vand.u32 4294901760, %v5327_v53  ;;  %v11395_v18 = vsub.f32 %v11300_v59, %v12264_v5  ;;  %v5340_v5 = vld [vmem:[#allocation5 + $0x198] sm:$0xff]  ;;  %v11420_v59 = vsub.f32 %v5343_v28, %v11375_v26 }
 0x42b   :  { %7299 = vmatprep.subr.mxu1 %v13243_v29  ;;  %6208 = vmatprep.mubr.f32.mxu1 %v13240_v32  ;;  %v11383_v29 = vsub.f32 %v11288_v55, %v12263_v23  ;;  %v11386_v32 = vsub.f32 %v5344_v36, %v11340_v39  ;;  %v11398_v23 = vand.u32 4294901760, %v5342_v25  ;;  %v6360_v36 = vand.u32 4294901760, %v11361_v3 }
 0x42c   :  { %7300 = vmatpush3.msra.mxu1 %v10950_v14  ;;  %7304 = vmatprep.subr.mxu0 %v11147_v6  ;;  %v6472_v14 = vand.u32 4294901760, %v11349_v8  ;;  %v11410_v8 = vand.u32 4294901760, %v5326_v63  ;;  %v11417_v3 = vsub.f32 %v11328_v13, %v13246_v61  ;;  %13247 = vst [vmem:[#allocation102_spill] sm:$0xff] %v11420_v59  ;;  %v11430_v55 = vand.u32 4294901760, %v5325_v11  ;;  %v5339_v61 = vld [vmem:[#allocation5 + $0x190] sm:$0xff] }
 0x42d   :  { %13244 = vst [vmem:[#allocation107_spill] sm:$0xff] %v11386_v32  ;;  %6210 = vmatmul.mubr.f32.vlgmr.msra.gmra.mxu1 %v13242_v40  ;;  %7339 = vmatprep.subr.mxu1 %v6444_v7  ;;  %v11405_v40 = vsub.f32 %v11315_v49, %v12267_v35  ;;  %v11408_v7 = vsub.f32 %v5328_v15, %v11364_v33  ;;  %v11422_v35 = vand.u32 4294901760, %v5341_v12  ;;  %v5324_v15 = vld [vmem:[#allocation5 + $0x118] sm:$0xff]  ;;  %v6486_v28 = vand.u32 4294901760, %v11395_v18 }
 0x42e   :  { %7340 = vmatpush3.msra.mxu1 %v6332_v2  ;;  %7305 = vmatpush3.msra.mxu0 %v11155_v48  ;;  %v6479_v2 = vand.u32 4294901760, %v11372_v30  ;;  %v11428_v30 = vsub.f32 %v5327_v53, %v11388_v16  ;;  %v13248_v13 = vand.u32 4294901760, %v11353_v58  ;;  %v11442_v49 = vand.u32 4294901760, %v5340_v5  ;;  %v5323_v53 = vld [vmem:[#allocation5 + $0x110] sm:$0xff] }
 0x42f   :  { %13245 = vst [vmem:[#allocation101_spill] sm:$0xff] %v11408_v7  ;;  %7341 = vmatprep.subr.mxu1 %v6451_v45  ;;  %7306 = vmatprep.subr.mxu0 %v11160_v21  ;;  %v6367_v45 = vand.u32 4294901760, %v11383_v29  ;;  %v11440_v29 = vsub.f32 %v5342_v25, %v11398_v23  ;;  %v11448_v18 = vsub.f32 %v5326_v63, %v11410_v8  ;;  %v11450_v17 = vand.u32 4294901760, %v5324_v15 }
 0x430   :  { %7342 = vmatpush3.msra.mxu1 %v6339_v10  ;;  %7307 = vmatpush3.msra.mxu0 %v11168_v47  ;;  %v11437_v10 = vsub.f32 %v11353_v58, %v13248_v13  ;;  %v5338_v13 = vld [vmem:[#allocation5 + $0x188] sm:$0xff]  ;;  %v6493_v25 = vand.u32 4294901760, %v11417_v3  ;;  %v11458_v42 = vand.u32 4294901760, %v5339_v61  ;;  %v13249_v63 = vand.u32 4294901760, %v11386_v32  ;;  %v5337_v58 = vld [vmem:[#allocation5 + $0x180] sm:$0xff] }
 0x431   :  { %7343 = vmatprep.subr.mxu1 %v6458_v31  ;;  %7308 = vmatprep.subr.mxu0 %v11173_v24  ;;  %v6374_v31 = vand.u32 4294901760, %v11405_v40  ;;  %v5322_v40 = vld [vmem:[#allocation5 + $0x108] sm:$0xff]  ;;  %v11466_v38 = vsub.f32 %v5325_v11, %v11430_v55  ;;  %v11468_v3 = vand.u32 4294901760, %v5323_v53  ;;  %v11474_v54 = vsub.f32 %v5340_v5, %v11442_v49 }
 0x432   :  { %7344 = vmatpush3.msra.mxu1 %v6346_v50  ;;  %7309 = vmatpush3.msra.mxu0 %v11181_v41  ;;  %v11456_v50 = vsub.f32 %v5341_v12, %v11422_v35  ;;  %v6499_v51 = vsub.f32 %v11386_v32, %v13249_v63  ;;  %v6381_v12 = vand.u32 4294901760, %v11437_v10  ;;  %v11476_v46 = vand.u32 4294901760, %v5338_v13  ;;  %v5321_v63 = vld [vmem:[#allocation5 + $0x100] sm:$0xff] }
 0x433   :  { %7345 = vmatprep.subr.mxu1 %v6465_v4  ;;  %7310 = vmatprep.subr.mxu0 %v11189_v57  ;;  %v13250_v11 = vand.u32 4294901760, %v11408_v7  ;;  %v11484_v10 = vsub.f32 %v5324_v15, %v11450_v17  ;;  %v11486_v32 = vand.u32 4294901760, %v5322_v40  ;;  %v13251_v5 = vand.u32 4294901760, %v11420_v59 }
 0x434   :  { %7346 = vmatpush3.msra.mxu1 %v6353_v34  ;;  %7311 = vmatpush3.msra.mxu0 %v11198_v9  ;;  %v11494_v19 = vsub.f32 %v5339_v61, %v11458_v42  ;;  %v13253_v15 = vand.u32 4294901760, %v11428_v30  ;;  %v6500_v34 = vand.u32 4294901760, %v6499_v51  ;;  %v13255_v61 = vand.u32 4294901760, %v11440_v29 }
 0x435   :  { %7347 = vmatprep.subr.mxu1 %v6472_v14  ;;  %7312 = vmatprep.subr.mxu0 %v11206_v52  ;;  %v6387_v4 = vsub.f32 %v11408_v7, %v13250_v11  ;;  %v11496_v11 = vand.u32 4294901760, %v5337_v58  ;;  %v11504_v7 = vsub.f32 %v5323_v53, %v11468_v3  ;;  %v13257_v53 = vand.u32 4294901760, %v11448_v18 }
 0x436   :  { %7348 = vmatpush3.msra.mxu1 %v6360_v36  ;;  %7313 = vmatpush3.msra.mxu0 %v11215_v27  ;;  %v6506_v36 = vsub.f32 %v11420_v59, %v13251_v5  ;;  %13252 = vst [vmem:[#allocation15_spill] sm:$0xff] %v11494_v19  ;;  %v11506_v5 = vand.u32 4294901760, %v5321_v63  ;;  %v11522_v14 = vsub.f32 %v5322_v40, %v11486_v32  ;;  %v13261_v40 = vand.u32 4294901760, %v11466_v38 }
 0x437   :  { %7349 = vmatprep.subr.mxu1 %v6479_v2  ;;  %7314 = vmatprep.subr.mxu0 %v11224_v0  ;;  %v6394_v2 = vsub.f32 %v11428_v30, %v13253_v15  ;;  %13254 = vst [vmem:[#allocation108_spill] sm:$0xff] %v11504_v7  ;;  %v6388_v15 = vand.u32 4294901760, %v6387_v4  ;;  %v11530_v59 = vsub.f32 %v5337_v58, %v11496_v11  ;;  %v13263_v58 = vand.u32 4294901760, %v11474_v54 }
 0x438   :  { %7350 = vmatpush3.msra.mxu1 %v6367_v45  ;;  %7315 = vmatpush3.msra.mxu0 %v11238_v20  ;;  %v6513_v45 = vsub.f32 %v11440_v29, %v13255_v61  ;;  %v11514_v20 = vsub.f32 %v5338_v13, %v11476_v46  ;;  %13258 = vst [vmem:[#allocation74_spill] sm:$0xff] %v11522_v14  ;;  %v6507_v61 = vand.u32 4294901760, %v6506_v36  ;;  %v13259_v13 = vand.u32 4294901760, %v11456_v50 }
 0x439   :  { %7351 = vmatprep.subr.mxu1 %v6486_v28  ;;  %7316 = vmatprep.subr.mxu0 %v11247_v44  ;;  %v6401_v28 = vsub.f32 %v11448_v18, %v13257_v53  ;;  %13260 = vst [vmem:[#allocation109_spill] sm:$0xff] %v11530_v59  ;;  %v6395_v53 = vand.u32 4294901760, %v6394_v2  ;;  %v11538_v51 = vsub.f32 %v5321_v63, %v11506_v5 }
 0x43a   :  { %13256 = vst [vmem:[#allocation37_spill] sm:$0xff] %v11514_v20  ;;  %7352 = vmatpush3.msra.mxu1 %v6374_v31  ;;  %7317 = vmatpush3.msra.mxu0 %v11261_v22  ;;  %v6520_v31 = vsub.f32 %v11456_v50, %v13259_v13  ;;  %v6514_v13 = vand.u32 4294901760, %v6513_v45  ;;  %v13265_v45 = vand.u32 4294901760, %v11494_v19 }
 0x43b   :  { %7353 = vmatprep.subr.mxu1 %v6493_v25  ;;  %7318 = vmatprep.subr.mxu0 %v11275_v60  ;;  %v6408_v25 = vsub.f32 %v11466_v38, %v13261_v40  ;;  %13262 = vst [vmem:[#allocation39_spill] sm:$0xff] %v11538_v51  ;;  %v6402_v4 = vand.u32 4294901760, %v6401_v28  ;;  %v13264_v40 = vand.u32 4294901760, %v11484_v10  ;;  %v13266_v28 = vand.u32 4294901760, %v11504_v7 }
 0x43c   :  { %7354 = vmatpush3.msra.mxu1 %v6381_v12  ;;  %7319 = vmatpush3.msra.mxu0 %v11302_v43  ;;  %v6527_v12 = vsub.f32 %v11474_v54, %v13263_v58  ;;  %v6534_v58 = vsub.f32 %v11494_v19, %v13265_v45 }
 0x43d   :  { %7355 = vmatprep.subr.mxu1 %v6500_v34  ;;  %7320 = vmatprep.subr.mxu0 %v11340_v39  ;;  %v6415_v36 = vsub.f32 %v11484_v10, %v13264_v40  ;;  %v6521_v34 = vand.u32 4294901760, %v6520_v31  ;;  %v6422_v40 = vsub.f32 %v11504_v7, %v13266_v28  ;;  %v13267_v31 = vand.u32 4294901760, %v11514_v20 }
 0x43e   :  { %7356 = vmatpush3.msra.mxu1 %v6388_v15  ;;  %7321 = vmatpush3.msra.mxu0 %v11364_v33  ;;  %v6409_v15 = vand.u32 4294901760, %v6408_v25  ;;  %v6535_v28 = vand.u32 4294901760, %v6534_v58 }
 0x43f   :  { %7357 = vmatprep.subr.mxu1 %v6507_v61  ;;  %7322 = vmatprep.subr.mxu0 %v11375_v26  ;;  %v6528_v61 = vand.u32 4294901760, %v6527_v12  ;;  %v6541_v45 = vsub.f32 %v11514_v20, %v13267_v31  ;;  %v6416_v2 = vand.u32 4294901760, %v6415_v36  ;;  %v6423_v63 = vand.u32 4294901760, %v6422_v40 }
 0x440   :  { %7358 = vmatpush3.msra.mxu1 %v6395_v53  ;;  %7323 = vmatpush3.msra.mxu0 %v11388_v16  ;;  %v13268_v53 = vand.u32 4294901760, %v11522_v14 }
 0x441   :  { %7359 = vmatprep.subr.mxu1 %v6514_v13  ;;  %7324 = vmatprep.subr.mxu0 %v11398_v23  ;;  %v13269_v13 = vand.u32 4294901760, %v11530_v59  ;;  %v6542_v31 = vand.u32 4294901760, %v6541_v45 }
 0x442   :  { %7360 = vmatpush3.msra.mxu1 %v6402_v4  ;;  %7325 = vmatpush3.msra.mxu0 %v11410_v8  ;;  %v6429_v25 = vsub.f32 %v11522_v14, %v13268_v53  ;;  %v13270_v4 = vand.u32 4294901760, %v11538_v51 }
 0x443   :  { %7361 = vmatprep.subr.mxu1 %v6521_v34  ;;  %7326 = vmatprep.subr.mxu0 %v11422_v35  ;;  %v6548_v12 = vsub.f32 %v11530_v59, %v13269_v13 }
 0x444   :  { %7362 = vmatpush3.msra.mxu1 %v6409_v15  ;;  %7327 = vmatpush3.msra.mxu0 %v11430_v55  ;;  %v6436_v36 = vsub.f32 %v11538_v51, %v13270_v4  ;;  %v6430_v34 = vand.u32 4294901760, %v6429_v25 }
 0x445   :  { %7363 = vmatprep.subr.mxu1 %v6528_v61  ;;  %7328 = vmatprep.subr.mxu0 %v11442_v49  ;;  %v6549_v58 = vand.u32 4294901760, %v6548_v12 }
 0x446   :  { %7364 = vmatpush3.msra.mxu1 %v6416_v2  ;;  %7329 = vmatpush3.msra.mxu0 %v11450_v17  ;;  %v6437_v15 = vand.u32 4294901760, %v6436_v36 }
 0x447   :  { %7365 = vmatprep.subr.mxu1 %v6535_v28  ;;  %7330 = vmatprep.subr.mxu0 %v11458_v42 }
 0x448   :  { %7366 = vmatpush3.msra.mxu1 %v6423_v63  ;;  %7331 = vmatpush3.msra.mxu0 %v11468_v3 }
 0x449   :  { %7367 = vmatprep.subr.mxu1 %v6542_v31  ;;  %7332 = vmatprep.subr.mxu0 %v11476_v46 }
 0x44a   :  { %7368 = vmatpush3.msra.mxu1 %v6430_v34  ;;  %7333 = vmatpush3.msra.mxu0 %v11486_v32 }
 0x44b   :  { %7369 = vmatprep.subr.mxu1 %v6549_v58  ;;  %7334 = vmatprep.subr.mxu0 %v11496_v11 }
 0x44c   :  { %7370 = vmatpush3.msra.mxu1 %v6437_v15  ;;  %7335 = vmatpush3.msra.mxu0 %v11506_v5 }
 0x44d   :  { %7409 = vmatprep.subr.mxu1 %v11147_v6  ;;  %7374 = vmatprep.subr.mxu0 %v11166_v56 }
 0x46e   :  { %v4825_v2 = vpop.f32.mrf.mxu0 }
 0x470   :  { %v4827_v63 = vpop.f32.mrf.mxu0 }
 0x477   :  { %v4937_v40 = vpop.f32.mrf.mxu1  ;;  %v5026_v45 = vpop.f32.mrf.mxu0 }
 0x478   :  { %v4938_v53 = vadd.f32 %v4937_v40, %v4825_v2 }
 0x479   :  { %v4939_v61 = vpop.f32.mrf.mxu1  ;;  %v5028_v28 = vpop.f32.mrf.mxu0 }
 0x47a   :  { %v4940_v25 = vadd.f32 %v4939_v61, %v4827_v63  ;;  %v5027_v12 = vadd.f32 %v5026_v45, %v4938_v53  ;;  %v13272_v45 = vld [vmem:[#allocation91_spill] sm:$0xff]  ;;  %v13273_v53 = vld [vmem:[#allocation94_spill] sm:$0xff] }
 0x47c   :  { %v5029_v31 = vadd.f32 %v5028_v28, %v4940_v25  ;;  %v13274_v25 = vld [vmem:[#allocation105_spill] sm:$0xff]  ;;  %v13275_v28 = vld [vmem:[#allocation115_spill] sm:$0xff] }
 0x480   :  { %v5108_v13 = vpop.f32.mrf.mxu1 }
 0x481   :  { %v5204_v36 = vpop.f32.mrf.mxu0  ;;  %v5109_v34 = vadd.f32 %v5108_v13, %v5027_v12  ;;  %v13276_v13 = vld [vmem:[#allocation117_spill] sm:$0xff] }
 0x482   :  { %v5110_v4 = vpop.f32.mrf.mxu1  ;;  %v13277_v12 = vld [vmem:[#allocation89_spill] sm:$0xff] }
 0x483   :  { %v5111_v58 = vadd.f32 %v5110_v4, %v5029_v31  ;;  %v5206_v15 = vpop.f32.mrf.mxu0  ;;  %v5205_v51 = vadd.f32 %v5204_v36, %v5109_v34  ;;  %v13278_v4 = vld [vmem:[#allocation64_spill] sm:$0xff]  ;;  %v13279_v36 = vld [vmem:[#allocation122_spill] sm:$0xff]  ;;  %v13281_v34 = vld [vmem:[#allocation99_spill] sm:$0xff] }
 0x484   :  { %v13280_v31 = vld [vmem:[#allocation98_spill] sm:$0xff] }
 0x485   :  { %v5207_v14 = vadd.f32 %v5206_v15, %v5111_v58  ;;  %v13282_v58 = vld [vmem:[#allocation29_spill] sm:$0xff]  ;;  %v13283_v15 = vld [vmem:[#allocation106_spill] sm:$0xff] }
 0x488   :  { %v5284_v59 = vpop.f32.mrf.mxu1 }
 0x489   :  { %v5285_v56 = vadd.f32 %v5284_v59, %v5205_v51  ;;  %v13271_v51 = vld [vmem:[#allocation113_spill] sm:$0xff] }
 0x48a   :  { %v5286_v20 = vpop.f32.mrf.mxu1 }
 0x48b   :  { %v11586_v7 = vand.u32 4294901760, %v5285_v56  ;;  %v5287_v19 = vadd.f32 %v5286_v20, %v5207_v14 }
 0x48d   :  { %v11589_v2 = vsub.f32 %v5285_v56, %v11586_v7  ;;  %v11591_v63 = vand.u32 4294901760, %v5287_v19 }
 0x48f   :  { %v6319_v40 = vand.u32 4294901760, %v11589_v2  ;;  %v6312_v61 = vsub.f32 %v5287_v19, %v11591_v63  ;;  %6552 = vmatprep.mubr.f32.mxu1 %v11591_v63 }
 0x490   :  { %6554 = vmatmul.mubr.f32.vlgmr.msra.gmra.mxu1 %v11586_v7 }
 0x491   :  { %7410 = vmatpush3.msra.mxu1 %v11155_v48  ;;  %v6313_v59 = vand.u32 4294901760, %v6312_v61  ;;  %v6320_v20 = vsub.f32 %v11589_v2, %v6319_v40 }
 0x492   :  { %7411 = vmatprep.subr.mxu1 %v11160_v21 }
 0x493   :  { %7412 = vmatpush3.msra.mxu1 %v11168_v47  ;;  %6796 = vmatprep.mubr.f32.mxu1 %v6313_v59  ;;  %v6314_v56 = vsub.f32 %v6312_v61, %v6313_v59  ;;  %v6321_v14 = vand.u32 4294901760, %v6320_v20  ;;  %v13285_v59 = vld [vmem:[#allocation101_spill] sm:$0xff]  ;;  %v13286_v20 = vld [vmem:[#allocation102_spill] sm:$0xff] }
 0x494   :  { %7413 = vmatprep.subr.mxu1 %v11173_v24 }
 0x495   :  { %7414 = vmatpush3.msra.mxu1 %v11181_v41  ;;  %v6315_v19 = vand.u32 4294901760, %v6314_v56  ;;  %v13287_v56 = vld [vmem:[#allocation15_spill] sm:$0xff] }
 0x496   :  { %7415 = vmatprep.subr.mxu1 %v11189_v57 }
 0x497   :  { %7416 = vmatpush3.msra.mxu1 %v11198_v9  ;;  %6316 = vmatprep.mubr.f32.mxu0 %v6315_v19  ;;  %v13288_v19 = vld [vmem:[#allocation108_spill] sm:$0xff] }
 0x498   :  { %7417 = vmatprep.subr.mxu1 %v11206_v52  ;;  %6322 = vmatmul.mubr.f32.vlgmr.msra.gmra.mxu0 %v6321_v14  ;;  %v13289_v14 = vld [vmem:[#allocation37_spill] sm:$0xff] }
 0x499   :  { %7375 = vmatpush3.msra.mxu0 %v11179_v62  ;;  %7418 = vmatpush3.msra.mxu1 %v11215_v27 }
 0x49a   :  { %7376 = vmatprep.subr.mxu0 %v11187_v37  ;;  %6689 = vmatprep.mubr.f32.mxu0 %v6312_v61  ;;  %v13284_v61 = vld [vmem:[#allocation107_spill] sm:$0xff] }
 0x49b   :  { %7419 = vmatprep.subr.mxu1 %v11224_v0  ;;  %7377 = vmatpush3.msra.mxu0 %v11196_v1 }
 0x49c   :  { %7420 = vmatpush3.msra.mxu1 %v13271_v51  ;;  %7378 = vmatprep.subr.mxu0 %v13272_v45 }
 0x49d   :  { %7421 = vmatprep.subr.mxu1 %v11247_v44  ;;  %7379 = vmatpush3.msra.mxu0 %v13273_v53 }
 0x49e   :  { %7422 = vmatpush3.msra.mxu1 %v11261_v22  ;;  %7380 = vmatprep.subr.mxu0 %v13274_v25 }
 0x49f   :  { %7423 = vmatprep.subr.mxu1 %v11275_v60  ;;  %7381 = vmatpush3.msra.mxu0 %v13275_v28 }
 0x4a0   :  { %7424 = vmatpush3.msra.mxu1 %v11302_v43  ;;  %7382 = vmatprep.subr.mxu0 %v13276_v13 }
 0x4a1   :  { %7425 = vmatprep.subr.mxu1 %v11340_v39  ;;  %7383 = vmatpush3.msra.mxu0 %v13277_v12 }
 0x4a2   :  { %7426 = vmatpush3.msra.mxu1 %v11364_v33  ;;  %7384 = vmatprep.subr.mxu0 %v13278_v4 }
 0x4a3   :  { %7427 = vmatprep.subr.mxu1 %v11375_v26  ;;  %7385 = vmatpush3.msra.mxu0 %v13279_v36 }
 0x4a4   :  { %7428 = vmatpush3.msra.mxu1 %v11388_v16  ;;  %7386 = vmatprep.subr.mxu0 %v13280_v31 }
 0x4a5   :  { %7429 = vmatprep.subr.mxu1 %v11398_v23  ;;  %7387 = vmatpush3.msra.mxu0 %v13281_v34 }
 0x4a6   :  { %7430 = vmatpush3.msra.mxu1 %v11410_v8  ;;  %7388 = vmatprep.subr.mxu0 %v13282_v58 }
 0x4a7   :  { %7431 = vmatprep.subr.mxu1 %v11422_v35  ;;  %7389 = vmatpush3.msra.mxu0 %v13283_v15 }
 0x4a8   :  { %7432 = vmatpush3.msra.mxu1 %v11430_v55  ;;  %7390 = vmatprep.subr.mxu0 %v13284_v61 }
 0x4a9   :  { %7433 = vmatprep.subr.mxu1 %v11442_v49  ;;  %7391 = vmatpush3.msra.mxu0 %v13285_v59 }
 0x4aa   :  { %7434 = vmatpush3.msra.mxu1 %v11450_v17  ;;  %7392 = vmatprep.subr.mxu0 %v13286_v20 }
 0x4ab   :  { %7435 = vmatprep.subr.mxu1 %v11458_v42  ;;  %7393 = vmatpush3.msra.mxu0 %v11428_v30 }
 0x4ac   :  { %7436 = vmatpush3.msra.mxu1 %v11468_v3  ;;  %7394 = vmatprep.subr.mxu0 %v11440_v29 }
 0x4ad   :  { %7437 = vmatprep.subr.mxu1 %v11476_v46  ;;  %7395 = vmatpush3.msra.mxu0 %v11448_v18 }
 0x4ae   :  { %7438 = vmatpush3.msra.mxu1 %v11486_v32  ;;  %7396 = vmatprep.subr.mxu0 %v11456_v50 }
 0x4af   :  { %7439 = vmatprep.subr.mxu1 %v11496_v11  ;;  %7397 = vmatpush3.msra.mxu0 %v11466_v38 }
 0x4b0   :  { %7440 = vmatpush3.msra.mxu1 %v11506_v5  ;;  %7398 = vmatprep.subr.mxu0 %v11474_v54 }
 0x4b1   :  { %6800 = vmatmul.mubr.f32.vlgmr.msra.gmra.mxu1 %v6319_v40  ;;  %7479 = vmatprep.subr.mxu1 %v11147_v6  ;;  %v13290_v40 = vld [vmem:[#allocation74_spill] sm:$0xff]  ;;  %v13291_v6 = vld [vmem:[#allocation109_spill] sm:$0xff] }
 0x4b2   :  { %7399 = vmatpush3.msra.mxu0 %v11484_v10  ;;  %7480 = vmatpush3.msra.mxu1 %v11155_v48  ;;  %v13292_v48 = vld [vmem:[#allocation39_spill] sm:$0xff] }
 0x4b3   :  { %7070 = vmatprep.mubr.f32.mxu1 %v11591_v63  ;;  %7400 = vmatprep.subr.mxu0 %v13287_v56 }
 0x4b4   :  { %7481 = vmatprep.subr.mxu1 %v11160_v21  ;;  %7401 = vmatpush3.msra.mxu0 %v13288_v19  ;;  %v13293_v21 = vld [vmem:[#allocation60_spill] sm:$0xff] }
 0x4b5   :  { %7482 = vmatpush3.msra.mxu1 %v11168_v47  ;;  %7402 = vmatprep.subr.mxu0 %v13289_v14  ;;  %v13294_v47 = vand.u32 4294901760, %v13293_v21 }
 0x4b6   :  { %7483 = vmatprep.subr.mxu1 %v11173_v24  ;;  %7403 = vmatpush3.msra.mxu0 %v13290_v40  ;;  %v13295_v24 = vand.u32 4294901760, %v11179_v62  ;;  %v13299_v62 = vand.u32 4294901760, %v13273_v53 }
 0x4b7   :  { %7484 = vmatpush3.msra.mxu1 %v11181_v41  ;;  %7404 = vmatprep.subr.mxu0 %v13291_v6  ;;  %v13296_v41 = vand.u32 4294901760, %v11187_v37  ;;  %v13300_v37 = vand.u32 4294901760, %v13274_v25 }
 0x4b8   :  { %7485 = vmatprep.subr.mxu1 %v11189_v57  ;;  %7405 = vmatpush3.msra.mxu0 %v13292_v48  ;;  %v13297_v57 = vand.u32 4294901760, %v11196_v1  ;;  %v13301_v1 = vand.u32 4294901760, %v13275_v28 }
 0x4b9   :  { %7486 = vmatpush3.msra.mxu1 %v11198_v9  ;;  %6692 = vmatmul.mubr.f32.vlgmr.msra.gmra.mxu0 %v11589_v2  ;;  %v13298_v9 = vand.u32 4294901760, %v13272_v45 }
 0x4ba   :  { %7444 = vmatprep.subr.mxu0 %v13294_v47  ;;  %7487 = vmatprep.subr.mxu1 %v11206_v52  ;;  %v13302_v52 = vand.u32 4294901760, %v13276_v13 }
 0x4bb   :  { %7445 = vmatpush3.msra.mxu0 %v13295_v24  ;;  %6966 = vmatprep.mubr.f32.mxu0 %v11591_v63 }
 0x4bc   :  { %7488 = vmatpush3.msra.mxu1 %v11215_v27  ;;  %7446 = vmatprep.subr.mxu0 %v13296_v41  ;;  %v13303_v27 = vand.u32 4294901760, %v13277_v12 }
 0x4bd   :  { %7489 = vmatprep.subr.mxu1 %v11224_v0  ;;  %7447 = vmatpush3.msra.mxu0 %v13297_v57  ;;  %v13304_v0 = vand.u32 4294901760, %v13278_v4 }
 0x4be   :  { %7490 = vmatpush3.msra.mxu1 %v13271_v51  ;;  %7448 = vmatprep.subr.mxu0 %v13298_v9 }
 0x4bf   :  { %7491 = vmatprep.subr.mxu1 %v11247_v44  ;;  %7449 = vmatpush3.msra.mxu0 %v13299_v62  ;;  %v13305_v44 = vand.u32 4294901760, %v13279_v36 }
 0x4c0   :  { %7492 = vmatpush3.msra.mxu1 %v11261_v22  ;;  %7450 = vmatprep.subr.mxu0 %v13300_v37  ;;  %v13306_v22 = vand.u32 4294901760, %v13280_v31 }
 0x4c1   :  { %7493 = vmatprep.subr.mxu1 %v11275_v60  ;;  %7451 = vmatpush3.msra.mxu0 %v13301_v1  ;;  %v13307_v60 = vand.u32 4294901760, %v13281_v34 }
 0x4c2   :  { %7494 = vmatpush3.msra.mxu1 %v11302_v43  ;;  %7452 = vmatprep.subr.mxu0 %v13302_v52  ;;  %v13309_v43 = vand.u32 4294901760, %v13283_v15 }
 0x4c3   :  { %7495 = vmatprep.subr.mxu1 %v11340_v39  ;;  %7453 = vmatpush3.msra.mxu0 %v13303_v27  ;;  %v13312_v39 = vand.u32 4294901760, %v13286_v20 }
 0x4c4   :  { %7496 = vmatpush3.msra.mxu1 %v11364_v33  ;;  %7454 = vmatprep.subr.mxu0 %v13304_v0  ;;  %v13308_v33 = vand.u32 4294901760, %v13282_v58 }
 0x4c5   :  { %7497 = vmatprep.subr.mxu1 %v11375_v26  ;;  %7455 = vmatpush3.msra.mxu0 %v13305_v44  ;;  %v13310_v26 = vand.u32 4294901760, %v13284_v61 }
 0x4c6   :  { %7498 = vmatpush3.msra.mxu1 %v11388_v16  ;;  %7456 = vmatprep.subr.mxu0 %v13306_v22  ;;  %v13318_v16 = vand.u32 4294901760, %v11474_v54  ;;  %v13324_v54 = vand.u32 4294901760, %v13291_v6 }
 0x4c7   :  { %7499 = vmatprep.subr.mxu1 %v11398_v23  ;;  %7457 = vmatpush3.msra.mxu0 %v13307_v60  ;;  %v13311_v23 = vand.u32 4294901760, %v13285_v59 }
 0x4c8   :  { %7500 = vmatpush3.msra.mxu1 %v11410_v8  ;;  %7458 = vmatprep.subr.mxu0 %v13308_v33  ;;  %v13321_v8 = vand.u32 4294901760, %v13288_v19 }
 0x4c9   :  { %7501 = vmatprep.subr.mxu1 %v11422_v35  ;;  %7459 = vmatpush3.msra.mxu0 %v13309_v43  ;;  %v13313_v35 = vand.u32 4294901760, %v11428_v30  ;;  %v13322_v30 = vand.u32 4294901760, %v13289_v14 }
 0x4ca   :  { %7502 = vmatpush3.msra.mxu1 %v11430_v55  ;;  %7460 = vmatprep.subr.mxu0 %v13310_v26  ;;  %v13314_v55 = vand.u32 4294901760, %v11440_v29  ;;  %v13325_v29 = vand.u32 4294901760, %v13292_v48 }
 0x4cb   :  { %7503 = vmatprep.subr.mxu1 %v11442_v49  ;;  %7461 = vmatpush3.msra.mxu0 %v13311_v23  ;;  %v13315_v49 = vand.u32 4294901760, %v11448_v18  ;;  %v7126_v18 = vpop.f32.mrf.mxu0 }
 0x4cc   :  { %7504 = vmatpush3.msra.mxu1 %v11450_v17  ;;  %7462 = vmatprep.subr.mxu0 %v13312_v39  ;;  %v13316_v17 = vand.u32 4294901760, %v11456_v50 }
 0x4cd   :  { %7505 = vmatprep.subr.mxu1 %v11458_v42  ;;  %7463 = vmatpush3.msra.mxu0 %v13313_v35  ;;  %v13317_v42 = vand.u32 4294901760, %v11466_v38  ;;  %v13323_v38 = vand.u32 4294901760, %v13290_v40  ;;  %v7127_v50 = vpop.f32.mrf.mxu0 }
 0x4ce   :  { %7506 = vmatpush3.msra.mxu1 %v11468_v3  ;;  %7464 = vmatprep.subr.mxu0 %v13314_v55  ;;  %v7161_v3 = vpop.f32.mrf.mxu1  ;;  %v7128_v2 = vadd.f32 %v7127_v50, %v7126_v18 }
 0x4cf   :  { %7507 = vmatprep.subr.mxu1 %v11476_v46  ;;  %7465 = vmatpush3.msra.mxu0 %v13315_v49  ;;  %v13319_v46 = vand.u32 4294901760, %v11484_v10  ;;  %v7196_v10 = vpop.f32.mrf.mxu0 }
 0x4d0   :  { %7508 = vmatpush3.msra.mxu1 %v11486_v32  ;;  %7466 = vmatprep.subr.mxu0 %v13316_v17  ;;  %v13320_v32 = vand.u32 4294901760, %v13287_v56 }
 0x4d1   :  { %7509 = vmatprep.subr.mxu1 %v11496_v11  ;;  %7467 = vmatpush3.msra.mxu0 %v13317_v42  ;;  %v7162_v11 = vpop.f32.mrf.mxu1 }
 0x4d2   :  { %7510 = vmatpush3.msra.mxu1 %v11506_v5  ;;  %7468 = vmatprep.subr.mxu0 %v13318_v16  ;;  %v7197_v5 = vpop.f32.mrf.mxu0  ;;  %v7163_v63 = vadd.f32 %v7162_v11, %v7161_v3 }
 0x4d3   :  { %7072 = vmatmul.mubr.f32.vlgmr.msra.gmra.mxu1 %v11586_v7  ;;  %7469 = vmatpush3.msra.mxu0 %v13319_v46  ;;  %v7231_v51 = vpop.f32.mrf.mxu1  ;;  %v7198_v25 = vadd.f32 %v7197_v5, %v7196_v10 }
 0x4d4   :  { %7470 = vmatprep.subr.mxu0 %v13320_v32  ;;  %v5694_v53 = vadd.f32 %v7163_v63, %v7128_v2 }
 0x4d5   :  { %7471 = vmatpush3.msra.mxu0 %v13321_v8  ;;  %v7232_v28 = vpop.f32.mrf.mxu1 }
 0x4d6   :  { %7472 = vmatprep.subr.mxu0 %v13322_v30  ;;  %v5832_v4 = vadd.f32 %v7198_v25, %v5694_v53  ;;  %v7233_v36 = vadd.f32 %v7232_v28, %v7231_v51 }
 0x4d7   :  { %7473 = vmatpush3.msra.mxu0 %v13323_v38 }
 0x4d8   :  { %7474 = vmatprep.subr.mxu0 %v13324_v54 }
 0x4d9   :  { %7475 = vmatpush3.msra.mxu0 %v13325_v29 }
 0x4da   :  { %6968 = vmatmul.mubr.f32.vlgmr.msra.gmra.mxu0 %v11586_v7  ;;  %v5940_v7 = vadd.f32 %v7233_v36, %v5832_v4 }
 0x4ea   :  { %v7266_v45 = vpop.f32.mrf.mxu0 }
 0x4ec   :  { %v7267_v13 = vpop.f32.mrf.mxu0 }
 0x4ed   :  { %v7301_v12 = vpop.f32.mrf.mxu1  ;;  %v7268_v58 = vadd.f32 %v7267_v13, %v7266_v45 }
 0x4ef   :  { %v7302_v34 = vpop.f32.mrf.mxu1  ;;  %v6108_v56 = vadd.f32 %v7268_v58, %v5940_v7 }
 0x4f0   :  { %v7303_v59 = vadd.f32 %v7302_v34, %v7301_v12 }
 0x4f2   :  { %v6212_v40 = vadd.f32 %v7303_v59, %v6108_v56 }
 0x550   :  { %v7371_v15 = vpop.f32.mrf.mxu1 }
 0x552   :  { %v7372_v14 = vpop.f32.mrf.mxu1 }
 0x553   :  { %v7373_v47 = vadd.f32 %v7372_v14, %v7371_v15 }
 0x558   :  { %v7336_v31 = vpop.f32.mrf.mxu0 }
 0x55a   :  { %v7337_v61 = vpop.f32.mrf.mxu0 }
 0x55b   :  { %v7338_v19 = vadd.f32 %v7337_v61, %v7336_v31 }
 0x55d   :  { %v6324_v21 = vadd.f32 %v7338_v19, %v6212_v40 }
 0x55f   :  { %v6556_v57 = vadd.f32 %v7373_v47, %v6324_v21 }
 0x571   :  { %v7441_v6 = vpop.f32.mrf.mxu1 }
 0x573   :  { %v7442_v41 = vpop.f32.mrf.mxu1 }
 0x574   :  { %v7443_v1 = vadd.f32 %v7442_v41, %v7441_v6 }
 0x579   :  { %v7406_v20 = vpop.f32.mrf.mxu0 }
 0x57b   :  { %v7407_v48 = vpop.f32.mrf.mxu0 }
 0x57c   :  { %v7408_v24 = vadd.f32 %v7407_v48, %v7406_v20 }
 0x57e   :  { %v6694_v62 = vadd.f32 %v7408_v24, %v6556_v57 }
 0x580   :  { %v6802_v0 = vadd.f32 %v7443_v1, %v6694_v62 }
 0x593   :  { %v7511_v9 = vpop.f32.mrf.mxu1 }
 0x595   :  { %v7512_v52 = vpop.f32.mrf.mxu1 }
 0x596   :  { %v7513_v22 = vadd.f32 %v7512_v52, %v7511_v9 }
 0x59a   :  { %v7476_v37 = vpop.f32.mrf.mxu0 }
 0x59c   :  { %v7477_v27 = vpop.f32.mrf.mxu0 }
 0x59d   :  { %v7478_v44 = vadd.f32 %v7477_v27, %v7476_v37 }
 0x59f   :  { %v6970_v60 = vadd.f32 %v7478_v44, %v6802_v0 }
 0x5a1   :  { %v7074_v33 = vadd.f32 %v7513_v22, %v6970_v60 }
 0x5a3   :  { %7077 = vst [vmem:[#allocation7] sm:$0xff] %v7074_v33 }
 0x5a4   :  { %7573 = shalt.err (!%p7570_p0)
}
 0x5a5   :  { %7087 = dma.vmem_to_hbm [thread:$0]  %s7085_s21, 128, %s11773_s5, [#allocation4]  }
 0x5a6   :  { %7586 = dma.done.wait [#allocation4], 128  }
 0x5a7   :  { %7587 = vsyncadd [#allocation4], 4294967168 }
 0x5a8   :  { %7091 = vsyncpa [#allocation3], 1 }
 0x5a9   :  { %7092 = vsyncpa [#allocation6], 1 }
 0x5aa   :  { %7093 = vsyncpa [#allocation4], 1 }

</bundles_post_ra>
